<compile_context>
chip_gen: v7x
topology: tpu7x:2x2x1
jax: 0.10.0
libtpu: 0.0.40
codegen_flags: <defaults>
</compile_context>

<pallas_src>
import functools
import math

import jax
import jax.numpy as jnp
from jax.experimental import pallas as pl
from jax.experimental.pallas import tpu as pltpu


def _round_up(x, m):
    return (x + m - 1) // m * m


# ----------------------------------------------------------------------------
# Fused kernel: one batch element per grid step, everything stays in VMEM.
# ----------------------------------------------------------------------------
def _fused_kernel(*refs, H, W, in_channels, dim, num_convs):
    x_ref = refs[0]
    conv_w = refs[1:1 + num_convs]                       # bf16 (9, cin_l, dim)
    conv_b = refs[1 + num_convs:1 + 2 * num_convs]       # f32  (1, dim)
    base = 1 + 2 * num_convs
    w_iam_ref, b_iam_ref, w_cls_ref, b_cls_ref = refs[base:base + 4]
    logits_ref, iam_ref = refs[base + 4], refs[base + 5]
    xpad_ref = refs[base + 6]                            # f32 (H+2, W+2, c_buf)

    HW = H * W
    c_buf = xpad_ref.shape[-1]

    # Zero only the 1-pixel border every step (interior is fully rewritten
    # each layer).  Border-per-step stays correct even if the batch axis is
    # split across TensorCores, unlike a program_id==0 one-time zero.
    zrow = jnp.zeros((1, W + 2, c_buf), xpad_ref.dtype)
    zcol = jnp.zeros((H + 2, 1, c_buf), xpad_ref.dtype)
    xpad_ref[0:1, :, :] = zrow
    xpad_ref[H + 1:H + 2, :, :] = zrow
    xpad_ref[:, 0:1, :] = zcol
    xpad_ref[:, W + 1:W + 2, :] = zcol

    # Input arrives bf16 (halved HBM DMA); halo buffer is f32 so every
    # +/-1 sublane-offset access stays 32-bit aligned.
    xpad_ref[1:H + 1, 1:W + 1, :in_channels] = x_ref[0].astype(xpad_ref.dtype)

    def conv3x3(cin, w_ref):
        # 3x3 conv (padding=1) as 9 shifted-slice MXU dots accumulated in f32.
        # No im2col materialization: taps are cast to bf16 right before the
        # MXU, accumulation stays f32.
        acc = None
        for k in range(9):
            kh, kw = k // 3, k % 3
            tap = (xpad_ref[kh:kh + H, kw:kw + W, :cin]
                   .reshape(HW, cin).astype(jnp.bfloat16))
            part = jnp.dot(tap, w_ref[k],
                           preferred_element_type=jnp.float32)
            acc = part if acc is None else acc + part
        return acc                                       # (HW, n_out) f32

    # ---- inst_convs: stacked 3x3 conv + ReLU, activations stay in VMEM ----
    cin = in_channels
    for li in range(num_convs):
        act = jnp.maximum(conv3x3(cin, conv_w[li]) + conv_b[li][...], 0.0)
        xpad_ref[1:H + 1, 1:W + 1, :dim] = act.reshape(H, W, dim)
        cin = dim

    # ---- iam conv: 3x3, padding=1, bias, no activation ---------------------
    iam = conv3x3(dim, w_iam_ref) + b_iam_ref[...]       # (HW, Npad) f32
    # One XLU transpose serves both the lane-dense (Npad, HW) output store
    # and the aggregation matmul that contracts over HW.
    iam_t = jnp.transpose(iam)                           # (Npad, HW) f32
    iam_ref[0] = iam_t.astype(iam_ref.dtype)             # pre-sigmoid, like PyTorch

    # ---- IAM aggregation + classification head -----------------------------
    prob_t = jax.nn.sigmoid(iam_t)                       # (Npad, HW) f32
    norm = jnp.maximum(jnp.sum(prob_t, axis=1, keepdims=True), 1e-6)  # (Npad,1)
    feat = (xpad_ref[1:H + 1, 1:W + 1, :dim]             # last conv activations
            .reshape(HW, dim).astype(jnp.bfloat16))
    inst = jnp.dot(prob_t.astype(jnp.bfloat16), feat,
                   preferred_element_type=jnp.float32) / norm        # exact divide
    logits = jnp.dot(inst.astype(jnp.bfloat16), w_cls_ref[...],
                     preferred_element_type=jnp.float32) + b_cls_ref[...]
    logits_ref[0] = logits.astype(logits_ref.dtype)


# ----------------------------------------------------------------------------
# Parameters (deterministic init mirroring InstanceBranch._init_weights)
# ----------------------------------------------------------------------------
def init_params(key, in_channels, dim, num_convs, num_masks, num_classes):
    keys = jax.random.split(key, num_convs + 2)
    conv_ws, conv_bs = [], []
    cin = in_channels
    for i in range(num_convs):
        # c2_msra_fill: kaiming_normal_(fan_out, relu) -> std = sqrt(2/fan_out)
        fan_out = 3 * 3 * dim
        std = math.sqrt(2.0 / fan_out)
        conv_ws.append(std * jax.random.normal(keys[i], (3, 3, cin, dim),
                                               jnp.float32))
        conv_bs.append(jnp.zeros((dim,), jnp.float32))
        cin = dim
    prior_prob = 0.01
    bias_value = -math.log((1.0 - prior_prob) / prior_prob)
    w_iam = 0.01 * jax.random.normal(keys[num_convs],
                                     (3, 3, dim, num_masks), jnp.float32)
    b_iam = jnp.full((num_masks,), bias_value, jnp.float32)
    w_cls = 0.01 * jax.random.normal(keys[num_convs + 1],
                                     (dim, num_classes + 1), jnp.float32)
    b_cls = jnp.full((num_classes + 1,), bias_value, jnp.float32)
    return dict(conv_ws=conv_ws, conv_bs=conv_bs,
                w_iam=w_iam, b_iam=b_iam, w_cls=w_cls, b_cls=b_cls)


def _const_spec(arr):
    nd = arr.ndim
    return pl.BlockSpec(arr.shape, lambda bi, _nd=nd: (0,) * _nd)


# ----------------------------------------------------------------------------
# Forward pass: weight prep + one fused pallas_call + output slicing.
# ----------------------------------------------------------------------------
def instance_branch_forward(x_nchw, params):
    B, Cin, H, W = x_nchw.shape
    num_convs = len(params["conv_ws"])
    assert num_convs >= 1
    dim = params["conv_ws"][0].shape[-1]
    N = params["w_iam"].shape[-1]
    K = params["w_cls"].shape[-1]
    n_pad = _round_up(N, 128)            # lane-dense iam / inst rows
    k_pad = _round_up(K, 128)            # lane-dense logits
    c_buf = max(Cin, dim)
    HW = H * W

    # NCHW -> NHWC, bf16 (halves the per-step input DMA; first MXU operand is
    # bf16 anyway).
    x = jnp.transpose(x_nchw, (0, 2, 3, 1)).astype(jnp.bfloat16)

    # Weight prep: (3,3,cin,dim) -> (9,cin,dim) so each tap's weight plane is
    # a free leading-dim index in the kernel; pad narrow channel dims to 128
    # lanes; MXU operands bf16, biases f32.
    conv_ws = [w.reshape(9, w.shape[2], dim).astype(jnp.bfloat16)
               for w in params["conv_ws"]]
    conv_bs = [b.reshape(1, dim).astype(jnp.float32) for b in params["conv_bs"]]
    w_iam = jnp.pad(params["w_iam"], ((0, 0), (0, 0), (0, 0), (0, n_pad - N)))
    w_iam = w_iam.reshape(9, dim, n_pad).astype(jnp.bfloat16)
    b_iam = jnp.pad(params["b_iam"], (0, n_pad - N)).reshape(1, n_pad)
    b_iam = b_iam.astype(jnp.float32)
    w_cls = jnp.pad(params["w_cls"], ((0, 0), (0, k_pad - K))).astype(jnp.bfloat16)
    b_cls = jnp.pad(params["b_cls"], (0, k_pad - K)).reshape(1, k_pad)
    b_cls = b_cls.astype(jnp.float32)

    kernel = functools.partial(_fused_kernel, H=H, W=W, in_channels=Cin,
                               dim=dim, num_convs=num_convs)

    in_specs = (
        [pl.BlockSpec((1, H, W, Cin), lambda bi: (bi, 0, 0, 0))]
        + [_const_spec(w) for w in conv_ws]
        + [_const_spec(b) for b in conv_bs]
        + [_const_spec(w_iam), _const_spec(b_iam),
           _const_spec(w_cls), _const_spec(b_cls)])

    out_shape = (jax.ShapeDtypeStruct((B, n_pad, k_pad), jnp.float32),
                 jax.ShapeDtypeStruct((B, n_pad, HW), jnp.float32))
    out_specs = (pl.BlockSpec((1, n_pad, k_pad), lambda bi: (bi, 0, 0)),
                 pl.BlockSpec((1, n_pad, HW), lambda bi: (bi, 0, 0)))

    scratch_shapes = [pltpu.VMEM((H + 2, W + 2, c_buf), jnp.float32)]

    # ---- explicit VMEM budget (scratch + pipelined blocks + weights + live
    # intermediates) -> vmem_limit_bytes, floored at 32 MiB, capped at the
    # v7x physical 64 MiB.
    def _weight_bytes():
        wb = 0
        cin = Cin
        for _ in range(num_convs):
            wb += 9 * cin * dim * 2 + dim * 4
            cin = dim
        wb += 9 * dim * n_pad * 2 + n_pad * 4
        wb += dim * k_pad * 2 + k_pad * 4
        return wb

    scratch_bytes = (H + 2) * (W + 2) * c_buf * 4
    x_block_bytes = 2 * HW * Cin * 2                         # double-buffered bf16
    out_block_bytes = 2 * (n_pad * k_pad * 4 + n_pad * HW * 4)
    temp_bytes = HW * (dim * 4 + dim * 2 + 3 * n_pad * 4)    # acc, bf16 taps, iam/prob
    budget = (scratch_bytes + x_block_bytes + out_block_bytes
              + 2 * _weight_bytes() + temp_bytes)
    vmem_limit = int(min(max(1.5 * budget + (2 << 20), 32 << 20), 64 << 20))

    # ---- cost estimate (conv FLOPs dominate) --------------------------------
    flops = 0
    cin = Cin
    for _ in range(num_convs):
        flops += 2 * HW * 9 * cin * dim
        cin = dim
    flops += 2 * HW * 9 * dim * n_pad          # iam conv
    flops += 2 * n_pad * HW * dim              # aggregation
    flops += 2 * n_pad * dim * k_pad           # cls head
    flops *= B
    transcendentals = B * HW * n_pad           # sigmoid
    bytes_accessed = (B * HW * Cin * 2 + _weight_bytes()
                      + B * (n_pad * k_pad + n_pad * HW) * 4)

    logits_pad, iam_pad = pl.pallas_call(
        kernel,
        out_shape=out_shape,
        grid_spec=pltpu.PrefetchScalarGridSpec(
            num_scalar_prefetch=0,
            grid=(B,),
            in_specs=in_specs,
            out_specs=out_specs,
            scratch_shapes=scratch_shapes),
        compiler_params=pltpu.CompilerParams(
            dimension_semantics=("parallel",),
            vmem_limit_bytes=vmem_limit),
        cost_estimate=pl.CostEstimate(
            flops=int(flops),
            transcendentals=int(transcendentals),
            bytes_accessed=int(bytes_accessed)),
    )(x, *conv_ws, *conv_bs, w_iam, b_iam, w_cls, b_cls)

    pred_logits = logits_pad[:, :N, :K]                       # (B, N, num_classes+1)
    iam = iam_pad[:, :N, :].reshape(B, N, H, W)               # pre-sigmoid, (B,N,H,W)
    return pred_logits, iam


if __name__ == "__main__":
    B, IN_CHANNELS, H, W = 2, 4, 16, 16
    DIM, NUM_CONVS, NUM_MASKS, NUM_CLASSES = 32, 2, 8, 4

    key = jax.random.PRNGKey(0)
    k_x, k_p = jax.random.split(key)
    x = jax.random.normal(k_x, (B, IN_CHANNELS, H, W), jnp.float32)
    params = init_params(k_p, IN_CHANNELS, DIM, NUM_CONVS, NUM_MASKS,
                         NUM_CLASSES)

    fwd = jax.jit(instance_branch_forward)
    pred_logits, iam = fwd(x, params)
    jax.block_until_ready(pred_logits)
    jax.block_until_ready(iam)

    assert pred_logits.shape == (B, NUM_MASKS, NUM_CLASSES + 1)
    assert iam.shape == (B, NUM_MASKS, H, W)
    print("KERNEL_OK")
</pallas_src>

<mosaic_0001>
module attributes {stable_mosaic.version = 11 : i64} {
  func.func @_fused_kernel(%arg0: i32, %arg1: memref<1x16x16x4xbf16, #tpu.memory_space<vmem>>, %arg2: memref<9x4x32xbf16, #tpu.memory_space<vmem>>, %arg3: memref<9x32x32xbf16, #tpu.memory_space<vmem>>, %arg4: memref<1x32xf32, #tpu.memory_space<vmem>>, %arg5: memref<1x32xf32, #tpu.memory_space<vmem>>, %arg6: memref<9x32x128xbf16, #tpu.memory_space<vmem>>, %arg7: memref<1x128xf32, #tpu.memory_space<vmem>>, %arg8: memref<32x128xbf16, #tpu.memory_space<vmem>>, %arg9: memref<1x128xf32, #tpu.memory_space<vmem>>, %arg10: memref<1x128x128xf32, #tpu.memory_space<vmem>>, %arg11: memref<1x128x256xf32, #tpu.memory_space<vmem>>, %arg12: memref<18x18x32xf32, #tpu.memory_space<vmem>>) attributes {dimension_semantics = [#tpu.dimension_semantics<parallel>], iteration_bounds = array<i64: 2>, scalar_prefetch = 0 : i64, scratch_operands = 1 : i64, tpu.core_type = #tpu.core_type<tc>, window_params = [{transform_indices = @transform_0, window_bounds = array<i64: 1, 16, 16, 4>}, {pipeline_mode = #tpu.pipeline_mode<synchronous>, transform_indices = @transform_1, window_bounds = array<i64: 9, 4, 32>}, {pipeline_mode = #tpu.pipeline_mode<synchronous>, transform_indices = @transform_2, window_bounds = array<i64: 9, 32, 32>}, {pipeline_mode = #tpu.pipeline_mode<synchronous>, transform_indices = @transform_3, window_bounds = array<i64: 1, 32>}, {pipeline_mode = #tpu.pipeline_mode<synchronous>, transform_indices = @transform_4, window_bounds = array<i64: 1, 32>}, {pipeline_mode = #tpu.pipeline_mode<synchronous>, transform_indices = @transform_5, window_bounds = array<i64: 9, 32, 128>}, {pipeline_mode = #tpu.pipeline_mode<synchronous>, transform_indices = @transform_6, window_bounds = array<i64: 1, 128>}, {pipeline_mode = #tpu.pipeline_mode<synchronous>, transform_indices = @transform_7, window_bounds = array<i64: 32, 128>}, {pipeline_mode = #tpu.pipeline_mode<synchronous>, transform_indices = @transform_8, window_bounds = array<i64: 1, 128>}, {transform_indices = @transform_9, window_bounds = array<i64: 1, 128, 128>}, {transform_indices = @transform_10, window_bounds = array<i64: 1, 128, 256>}]} {
    %cst = arith.constant 0.000000e+00 : f32
    %0 = vector.broadcast %cst : f32 to vector<1x18x32xf32>
    %cst_0 = arith.constant 0.000000e+00 : f32
    %1 = vector.broadcast %cst_0 : f32 to vector<18x1x32xf32>
    %c0 = arith.constant 0 : index
    %c0_1 = arith.constant 0 : index
    %c0_2 = arith.constant 0 : index
    %2 = vector.load %arg12[%c0, %c0_1, %c0_2] : memref<18x18x32xf32, #tpu.memory_space<vmem>>, vector<1x18x32xf32>
    tpu.vector_store %arg12[%c0, %c0_1, %c0_2], %0 {strides = array<i32>} : memref<18x18x32xf32, #tpu.memory_space<vmem>>, vector<1x18x32xf32>,
    %c17 = arith.constant 17 : index
    %c0_3 = arith.constant 0 : index
    %c0_4 = arith.constant 0 : index
    %3 = vector.load %arg12[%c17, %c0_3, %c0_4] : memref<18x18x32xf32, #tpu.memory_space<vmem>>, vector<1x18x32xf32>
    tpu.vector_store %arg12[%c17, %c0_3, %c0_4], %0 {strides = array<i32>} : memref<18x18x32xf32, #tpu.memory_space<vmem>>, vector<1x18x32xf32>,
    %c0_5 = arith.constant 0 : index
    %c0_6 = arith.constant 0 : index
    %c0_7 = arith.constant 0 : index
    %4 = vector.load %arg12[%c0_5, %c0_6, %c0_7] : memref<18x18x32xf32, #tpu.memory_space<vmem>>, vector<18x1x32xf32>
    tpu.vector_store %arg12[%c0_5, %c0_6, %c0_7], %1 {strides = array<i32>} : memref<18x18x32xf32, #tpu.memory_space<vmem>>, vector<18x1x32xf32>,
    %c0_8 = arith.constant 0 : index
    %c17_9 = arith.constant 17 : index
    %c0_10 = arith.constant 0 : index
    %5 = vector.load %arg12[%c0_8, %c17_9, %c0_10] : memref<18x18x32xf32, #tpu.memory_space<vmem>>, vector<18x1x32xf32>
    tpu.vector_store %arg12[%c0_8, %c17_9, %c0_10], %1 {strides = array<i32>} : memref<18x18x32xf32, #tpu.memory_space<vmem>>, vector<18x1x32xf32>,
    %c0_11 = arith.constant 0 : index
    %c0_12 = arith.constant 0 : index
    %c0_13 = arith.constant 0 : index
    %c0_14 = arith.constant 0 : index
    %6 = vector.load %arg1[%c0_11, %c0_12, %c0_13, %c0_14] : memref<1x16x16x4xbf16, #tpu.memory_space<vmem>>, vector<1x16x16x4xbf16>
    %7 = vector.shape_cast %6 : vector<1x16x16x4xbf16> to vector<16x16x4xbf16>
    %8 = arith.extf %7 : vector<16x16x4xbf16> to vector<16x16x4xf32>
    %c1 = arith.constant 1 : index
    %c1_15 = arith.constant 1 : index
    %c0_16 = arith.constant 0 : index
    %9 = vector.load %arg12[%c1, %c1_15, %c0_16] : memref<18x18x32xf32, #tpu.memory_space<vmem>>, vector<16x16x4xf32>
    tpu.vector_store %arg12[%c1, %c1_15, %c0_16], %8 {strides = array<i32>} : memref<18x18x32xf32, #tpu.memory_space<vmem>>, vector<16x16x4xf32>,
    %c0_17 = arith.constant 0 : index
    %c0_18 = arith.constant 0 : index
    %c0_19 = arith.constant 0 : index
    %10 = vector.load %arg12[%c0_17, %c0_18, %c0_19] : memref<18x18x32xf32, #tpu.memory_space<vmem>>, vector<16x16x4xf32>
    %11 = vector.shape_cast %10 : vector<16x16x4xf32> to vector<256x4xf32>
    %12 = arith.truncf %11 : vector<256x4xf32> to vector<256x4xbf16>
    %c0_20 = arith.constant 0 : index
    %c0_21 = arith.constant 0 : index
    %c0_22 = arith.constant 0 : index
    %13 = vector.load %arg2[%c0_20, %c0_21, %c0_22] : memref<9x4x32xbf16, #tpu.memory_space<vmem>>, vector<1x4x32xbf16>
    %14 = vector.shape_cast %13 : vector<1x4x32xbf16> to vector<4x32xbf16>
    %cst_23 = arith.constant dense<0.000000e+00> : vector<256x32xf32>
    %15 = tpu.matmul %12, %14, %cst_23 {dimension_numbers = #tpu.dot_dimension_numbers<[1], [0], [0], [1], [0, 0, 1, 1], [], []>} : vector<256x4xbf16>, vector<4x32xbf16>, vector<256x32xf32> -> vector<256x32xf32>
    %c0_24 = arith.constant 0 : index
    %c1_25 = arith.constant 1 : index
    %c0_26 = arith.constant 0 : index
    %16 = vector.load %arg12[%c0_24, %c1_25, %c0_26] : memref<18x18x32xf32, #tpu.memory_space<vmem>>, vector<16x16x4xf32>
    %17 = vector.shape_cast %16 : vector<16x16x4xf32> to vector<256x4xf32>
    %18 = arith.truncf %17 : vector<256x4xf32> to vector<256x4xbf16>
    %c1_27 = arith.constant 1 : index
    %c0_28 = arith.constant 0 : index
    %c0_29 = arith.constant 0 : index
    %19 = vector.load %arg2[%c1_27, %c0_28, %c0_29] : memref<9x4x32xbf16, #tpu.memory_space<vmem>>, vector<1x4x32xbf16>
    %20 = vector.shape_cast %19 : vector<1x4x32xbf16> to vector<4x32xbf16>
    %cst_30 = arith.constant dense<0.000000e+00> : vector<256x32xf32>
    %21 = tpu.matmul %18, %20, %cst_30 {dimension_numbers = #tpu.dot_dimension_numbers<[1], [0], [0], [1], [0, 0, 1, 1], [], []>} : vector<256x4xbf16>, vector<4x32xbf16>, vector<256x32xf32> -> vector<256x32xf32>
    %22 = arith.addf %15, %21 : vector<256x32xf32>
    %c0_31 = arith.constant 0 : index
    %c2 = arith.constant 2 : index
    %c0_32 = arith.constant 0 : index
    %23 = vector.load %arg12[%c0_31, %c2, %c0_32] : memref<18x18x32xf32, #tpu.memory_space<vmem>>, vector<16x16x4xf32>
    %24 = vector.shape_cast %23 : vector<16x16x4xf32> to vector<256x4xf32>
    %25 = arith.truncf %24 : vector<256x4xf32> to vector<256x4xbf16>
    %c2_33 = arith.constant 2 : index
    %c0_34 = arith.constant 0 : index
    %c0_35 = arith.constant 0 : index
    %26 = vector.load %arg2[%c2_33, %c0_34, %c0_35] : memref<9x4x32xbf16, #tpu.memory_space<vmem>>, vector<1x4x32xbf16>
    %27 = vector.shape_cast %26 : vector<1x4x32xbf16> to vector<4x32xbf16>
    %cst_36 = arith.constant dense<0.000000e+00> : vector<256x32xf32>
    %28 = tpu.matmul %25, %27, %cst_36 {dimension_numbers = #tpu.dot_dimension_numbers<[1], [0], [0], [1], [0, 0, 1, 1], [], []>} : vector<256x4xbf16>, vector<4x32xbf16>, vector<256x32xf32> -> vector<256x32xf32>
    %29 = arith.addf %22, %28 : vector<256x32xf32>
    %c1_37 = arith.constant 1 : index
    %c0_38 = arith.constant 0 : index
    %c0_39 = arith.constant 0 : index
    %30 = vector.load %arg12[%c1_37, %c0_38, %c0_39] : memref<18x18x32xf32, #tpu.memory_space<vmem>>, vector<16x16x4xf32>
    %31 = vector.shape_cast %30 : vector<16x16x4xf32> to vector<256x4xf32>
    %32 = arith.truncf %31 : vector<256x4xf32> to vector<256x4xbf16>
    %c3 = arith.constant 3 : index
    %c0_40 = arith.constant 0 : index
    %c0_41 = arith.constant 0 : index
    %33 = vector.load %arg2[%c3, %c0_40, %c0_41] : memref<9x4x32xbf16, #tpu.memory_space<vmem>>, vector<1x4x32xbf16>
    %34 = vector.shape_cast %33 : vector<1x4x32xbf16> to vector<4x32xbf16>
    %cst_42 = arith.constant dense<0.000000e+00> : vector<256x32xf32>
    %35 = tpu.matmul %32, %34, %cst_42 {dimension_numbers = #tpu.dot_dimension_numbers<[1], [0], [0], [1], [0, 0, 1, 1], [], []>} : vector<256x4xbf16>, vector<4x32xbf16>, vector<256x32xf32> -> vector<256x32xf32>
    %36 = arith.addf %29, %35 : vector<256x32xf32>
    %c1_43 = arith.constant 1 : index
    %c1_44 = arith.constant 1 : index
    %c0_45 = arith.constant 0 : index
    %37 = vector.load %arg12[%c1_43, %c1_44, %c0_45] : memref<18x18x32xf32, #tpu.memory_space<vmem>>, vector<16x16x4xf32>
    %38 = vector.shape_cast %37 : vector<16x16x4xf32> to vector<256x4xf32>
    %39 = arith.truncf %38 : vector<256x4xf32> to vector<256x4xbf16>
    %c4 = arith.constant 4 : index
    %c0_46 = arith.constant 0 : index
    %c0_47 = arith.constant 0 : index
    %40 = vector.load %arg2[%c4, %c0_46, %c0_47] : memref<9x4x32xbf16, #tpu.memory_space<vmem>>, vector<1x4x32xbf16>
    %41 = vector.shape_cast %40 : vector<1x4x32xbf16> to vector<4x32xbf16>
    %cst_48 = arith.constant dense<0.000000e+00> : vector<256x32xf32>
    %42 = tpu.matmul %39, %41, %cst_48 {dimension_numbers = #tpu.dot_dimension_numbers<[1], [0], [0], [1], [0, 0, 1, 1], [], []>} : vector<256x4xbf16>, vector<4x32xbf16>, vector<256x32xf32> -> vector<256x32xf32>
    %43 = arith.addf %36, %42 : vector<256x32xf32>
    %c1_49 = arith.constant 1 : index
    %c2_50 = arith.constant 2 : index
    %c0_51 = arith.constant 0 : index
    %44 = vector.load %arg12[%c1_49, %c2_50, %c0_51] : memref<18x18x32xf32, #tpu.memory_space<vmem>>, vector<16x16x4xf32>
    %45 = vector.shape_cast %44 : vector<16x16x4xf32> to vector<256x4xf32>
    %46 = arith.truncf %45 : vector<256x4xf32> to vector<256x4xbf16>
    %c5 = arith.constant 5 : index
    %c0_52 = arith.constant 0 : index
    %c0_53 = arith.constant 0 : index
    %47 = vector.load %arg2[%c5, %c0_52, %c0_53] : memref<9x4x32xbf16, #tpu.memory_space<vmem>>, vector<1x4x32xbf16>
    %48 = vector.shape_cast %47 : vector<1x4x32xbf16> to vector<4x32xbf16>
    %cst_54 = arith.constant dense<0.000000e+00> : vector<256x32xf32>
    %49 = tpu.matmul %46, %48, %cst_54 {dimension_numbers = #tpu.dot_dimension_numbers<[1], [0], [0], [1], [0, 0, 1, 1], [], []>} : vector<256x4xbf16>, vector<4x32xbf16>, vector<256x32xf32> -> vector<256x32xf32>
    %50 = arith.addf %43, %49 : vector<256x32xf32>
    %c2_55 = arith.constant 2 : index
    %c0_56 = arith.constant 0 : index
    %c0_57 = arith.constant 0 : index
    %51 = vector.load %arg12[%c2_55, %c0_56, %c0_57] : memref<18x18x32xf32, #tpu.memory_space<vmem>>, vector<16x16x4xf32>
    %52 = vector.shape_cast %51 : vector<16x16x4xf32> to vector<256x4xf32>
    %53 = arith.truncf %52 : vector<256x4xf32> to vector<256x4xbf16>
    %c6 = arith.constant 6 : index
    %c0_58 = arith.constant 0 : index
    %c0_59 = arith.constant 0 : index
    %54 = vector.load %arg2[%c6, %c0_58, %c0_59] : memref<9x4x32xbf16, #tpu.memory_space<vmem>>, vector<1x4x32xbf16>
    %55 = vector.shape_cast %54 : vector<1x4x32xbf16> to vector<4x32xbf16>
    %cst_60 = arith.constant dense<0.000000e+00> : vector<256x32xf32>
    %56 = tpu.matmul %53, %55, %cst_60 {dimension_numbers = #tpu.dot_dimension_numbers<[1], [0], [0], [1], [0, 0, 1, 1], [], []>} : vector<256x4xbf16>, vector<4x32xbf16>, vector<256x32xf32> -> vector<256x32xf32>
    %57 = arith.addf %50, %56 : vector<256x32xf32>
    %c2_61 = arith.constant 2 : index
    %c1_62 = arith.constant 1 : index
    %c0_63 = arith.constant 0 : index
    %58 = vector.load %arg12[%c2_61, %c1_62, %c0_63] : memref<18x18x32xf32, #tpu.memory_space<vmem>>, vector<16x16x4xf32>
    %59 = vector.shape_cast %58 : vector<16x16x4xf32> to vector<256x4xf32>
    %60 = arith.truncf %59 : vector<256x4xf32> to vector<256x4xbf16>
    %c7 = arith.constant 7 : index
    %c0_64 = arith.constant 0 : index
    %c0_65 = arith.constant 0 : index
    %61 = vector.load %arg2[%c7, %c0_64, %c0_65] : memref<9x4x32xbf16, #tpu.memory_space<vmem>>, vector<1x4x32xbf16>
    %62 = vector.shape_cast %61 : vector<1x4x32xbf16> to vector<4x32xbf16>
    %cst_66 = arith.constant dense<0.000000e+00> : vector<256x32xf32>
    %63 = tpu.matmul %60, %62, %cst_66 {dimension_numbers = #tpu.dot_dimension_numbers<[1], [0], [0], [1], [0, 0, 1, 1], [], []>} : vector<256x4xbf16>, vector<4x32xbf16>, vector<256x32xf32> -> vector<256x32xf32>
    %64 = arith.addf %57, %63 : vector<256x32xf32>
    %c2_67 = arith.constant 2 : index
    %c2_68 = arith.constant 2 : index
    %c0_69 = arith.constant 0 : index
    %65 = vector.load %arg12[%c2_67, %c2_68, %c0_69] : memref<18x18x32xf32, #tpu.memory_space<vmem>>, vector<16x16x4xf32>
    %66 = vector.shape_cast %65 : vector<16x16x4xf32> to vector<256x4xf32>
    %67 = arith.truncf %66 : vector<256x4xf32> to vector<256x4xbf16>
    %c8 = arith.constant 8 : index
    %c0_70 = arith.constant 0 : index
    %c0_71 = arith.constant 0 : index
    %68 = vector.load %arg2[%c8, %c0_70, %c0_71] : memref<9x4x32xbf16, #tpu.memory_space<vmem>>, vector<1x4x32xbf16>
    %69 = vector.shape_cast %68 : vector<1x4x32xbf16> to vector<4x32xbf16>
    %cst_72 = arith.constant dense<0.000000e+00> : vector<256x32xf32>
    %70 = tpu.matmul %67, %69, %cst_72 {dimension_numbers = #tpu.dot_dimension_numbers<[1], [0], [0], [1], [0, 0, 1, 1], [], []>} : vector<256x4xbf16>, vector<4x32xbf16>, vector<256x32xf32> -> vector<256x32xf32>
    %71 = arith.addf %64, %70 : vector<256x32xf32>
    %c0_73 = arith.constant 0 : index
    %c0_74 = arith.constant 0 : index
    %72 = vector.load %arg4[%c0_73, %c0_74] : memref<1x32xf32, #tpu.memory_space<vmem>>, vector<1x32xf32>
    %73 = vector.broadcast %72 : vector<1x32xf32> to vector<256x32xf32>
    %74 = arith.addf %71, %73 : vector<256x32xf32>
    %cst_75 = arith.constant 0.000000e+00 : f32
    %75 = vector.broadcast %cst_75 : f32 to vector<256x32xf32>
    %76 = arith.maximumf %74, %75 : vector<256x32xf32>
    %77 = vector.shape_cast %76 : vector<256x32xf32> to vector<16x16x32xf32>
    %c1_76 = arith.constant 1 : index
    %c1_77 = arith.constant 1 : index
    %c0_78 = arith.constant 0 : index
    %78 = vector.load %arg12[%c1_76, %c1_77, %c0_78] : memref<18x18x32xf32, #tpu.memory_space<vmem>>, vector<16x16x32xf32>
    tpu.vector_store %arg12[%c1_76, %c1_77, %c0_78], %77 {strides = array<i32>} : memref<18x18x32xf32, #tpu.memory_space<vmem>>, vector<16x16x32xf32>,
    %c0_79 = arith.constant 0 : index
    %c0_80 = arith.constant 0 : index
    %c0_81 = arith.constant 0 : index
    %79 = vector.load %arg12[%c0_79, %c0_80, %c0_81] : memref<18x18x32xf32, #tpu.memory_space<vmem>>, vector<16x16x32xf32>
    %80 = vector.shape_cast %79 : vector<16x16x32xf32> to vector<256x32xf32>
    %81 = arith.truncf %80 : vector<256x32xf32> to vector<256x32xbf16>
    %c0_82 = arith.constant 0 : index
    %c0_83 = arith.constant 0 : index
    %c0_84 = arith.constant 0 : index
    %82 = vector.load %arg3[%c0_82, %c0_83, %c0_84] : memref<9x32x32xbf16, #tpu.memory_space<vmem>>, vector<1x32x32xbf16>
    %83 = vector.shape_cast %82 : vector<1x32x32xbf16> to vector<32x32xbf16>
    %cst_85 = arith.constant dense<0.000000e+00> : vector<256x32xf32>
    %84 = tpu.matmul %81, %83, %cst_85 {dimension_numbers = #tpu.dot_dimension_numbers<[1], [0], [0], [1], [0, 0, 1, 1], [], []>} : vector<256x32xbf16>, vector<32x32xbf16>, vector<256x32xf32> -> vector<256x32xf32>
    %c0_86 = arith.constant 0 : index
    %c1_87 = arith.constant 1 : index
    %c0_88 = arith.constant 0 : index
    %85 = vector.load %arg12[%c0_86, %c1_87, %c0_88] : memref<18x18x32xf32, #tpu.memory_space<vmem>>, vector<16x16x32xf32>
    %86 = vector.shape_cast %85 : vector<16x16x32xf32> to vector<256x32xf32>
    %87 = arith.truncf %86 : vector<256x32xf32> to vector<256x32xbf16>
    %c1_89 = arith.constant 1 : index
    %c0_90 = arith.constant 0 : index
    %c0_91 = arith.constant 0 : index
    %88 = vector.load %arg3[%c1_89, %c0_90, %c0_91] : memref<9x32x32xbf16, #tpu.memory_space<vmem>>, vector<1x32x32xbf16>
    %89 = vector.shape_cast %88 : vector<1x32x32xbf16> to vector<32x32xbf16>
    %cst_92 = arith.constant dense<0.000000e+00> : vector<256x32xf32>
    %90 = tpu.matmul %87, %89, %cst_92 {dimension_numbers = #tpu.dot_dimension_numbers<[1], [0], [0], [1], [0, 0, 1, 1], [], []>} : vector<256x32xbf16>, vector<32x32xbf16>, vector<256x32xf32> -> vector<256x32xf32>
    %91 = arith.addf %84, %90 : vector<256x32xf32>
    %c0_93 = arith.constant 0 : index
    %c2_94 = arith.constant 2 : index
    %c0_95 = arith.constant 0 : index
    %92 = vector.load %arg12[%c0_93, %c2_94, %c0_95] : memref<18x18x32xf32, #tpu.memory_space<vmem>>, vector<16x16x32xf32>
    %93 = vector.shape_cast %92 : vector<16x16x32xf32> to vector<256x32xf32>
    %94 = arith.truncf %93 : vector<256x32xf32> to vector<256x32xbf16>
    %c2_96 = arith.constant 2 : index
    %c0_97 = arith.constant 0 : index
    %c0_98 = arith.constant 0 : index
    %95 = vector.load %arg3[%c2_96, %c0_97, %c0_98] : memref<9x32x32xbf16, #tpu.memory_space<vmem>>, vector<1x32x32xbf16>
    %96 = vector.shape_cast %95 : vector<1x32x32xbf16> to vector<32x32xbf16>
    %cst_99 = arith.constant dense<0.000000e+00> : vector<256x32xf32>
    %97 = tpu.matmul %94, %96, %cst_99 {dimension_numbers = #tpu.dot_dimension_numbers<[1], [0], [0], [1], [0, 0, 1, 1], [], []>} : vector<256x32xbf16>, vector<32x32xbf16>, vector<256x32xf32> -> vector<256x32xf32>
    %98 = arith.addf %91, %97 : vector<256x32xf32>
    %c1_100 = arith.constant 1 : index
    %c0_101 = arith.constant 0 : index
    %c0_102 = arith.constant 0 : index
    %99 = vector.load %arg12[%c1_100, %c0_101, %c0_102] : memref<18x18x32xf32, #tpu.memory_space<vmem>>, vector<16x16x32xf32>
    %100 = vector.shape_cast %99 : vector<16x16x32xf32> to vector<256x32xf32>
    %101 = arith.truncf %100 : vector<256x32xf32> to vector<256x32xbf16>
    %c3_103 = arith.constant 3 : index
    %c0_104 = arith.constant 0 : index
    %c0_105 = arith.constant 0 : index
    %102 = vector.load %arg3[%c3_103, %c0_104, %c0_105] : memref<9x32x32xbf16, #tpu.memory_space<vmem>>, vector<1x32x32xbf16>
    %103 = vector.shape_cast %102 : vector<1x32x32xbf16> to vector<32x32xbf16>
    %cst_106 = arith.constant dense<0.000000e+00> : vector<256x32xf32>
    %104 = tpu.matmul %101, %103, %cst_106 {dimension_numbers = #tpu.dot_dimension_numbers<[1], [0], [0], [1], [0, 0, 1, 1], [], []>} : vector<256x32xbf16>, vector<32x32xbf16>, vector<256x32xf32> -> vector<256x32xf32>
    %105 = arith.addf %98, %104 : vector<256x32xf32>
    %c1_107 = arith.constant 1 : index
    %c1_108 = arith.constant 1 : index
    %c0_109 = arith.constant 0 : index
    %106 = vector.load %arg12[%c1_107, %c1_108, %c0_109] : memref<18x18x32xf32, #tpu.memory_space<vmem>>, vector<16x16x32xf32>
    %107 = vector.shape_cast %106 : vector<16x16x32xf32> to vector<256x32xf32>
    %108 = arith.truncf %107 : vector<256x32xf32> to vector<256x32xbf16>
    %c4_110 = arith.constant 4 : index
    %c0_111 = arith.constant 0 : index
    %c0_112 = arith.constant 0 : index
    %109 = vector.load %arg3[%c4_110, %c0_111, %c0_112] : memref<9x32x32xbf16, #tpu.memory_space<vmem>>, vector<1x32x32xbf16>
    %110 = vector.shape_cast %109 : vector<1x32x32xbf16> to vector<32x32xbf16>
    %cst_113 = arith.constant dense<0.000000e+00> : vector<256x32xf32>
    %111 = tpu.matmul %108, %110, %cst_113 {dimension_numbers = #tpu.dot_dimension_numbers<[1], [0], [0], [1], [0, 0, 1, 1], [], []>} : vector<256x32xbf16>, vector<32x32xbf16>, vector<256x32xf32> -> vector<256x32xf32>
    %112 = arith.addf %105, %111 : vector<256x32xf32>
    %c1_114 = arith.constant 1 : index
    %c2_115 = arith.constant 2 : index
    %c0_116 = arith.constant 0 : index
    %113 = vector.load %arg12[%c1_114, %c2_115, %c0_116] : memref<18x18x32xf32, #tpu.memory_space<vmem>>, vector<16x16x32xf32>
    %114 = vector.shape_cast %113 : vector<16x16x32xf32> to vector<256x32xf32>
    %115 = arith.truncf %114 : vector<256x32xf32> to vector<256x32xbf16>
    %c5_117 = arith.constant 5 : index
    %c0_118 = arith.constant 0 : index
    %c0_119 = arith.constant 0 : index
    %116 = vector.load %arg3[%c5_117, %c0_118, %c0_119] : memref<9x32x32xbf16, #tpu.memory_space<vmem>>, vector<1x32x32xbf16>
    %117 = vector.shape_cast %116 : vector<1x32x32xbf16> to vector<32x32xbf16>
    %cst_120 = arith.constant dense<0.000000e+00> : vector<256x32xf32>
    %118 = tpu.matmul %115, %117, %cst_120 {dimension_numbers = #tpu.dot_dimension_numbers<[1], [0], [0], [1], [0, 0, 1, 1], [], []>} : vector<256x32xbf16>, vector<32x32xbf16>, vector<256x32xf32> -> vector<256x32xf32>
    %119 = arith.addf %112, %118 : vector<256x32xf32>
    %c2_121 = arith.constant 2 : index
    %c0_122 = arith.constant 0 : index
    %c0_123 = arith.constant 0 : index
    %120 = vector.load %arg12[%c2_121, %c0_122, %c0_123] : memref<18x18x32xf32, #tpu.memory_space<vmem>>, vector<16x16x32xf32>
    %121 = vector.shape_cast %120 : vector<16x16x32xf32> to vector<256x32xf32>
    %122 = arith.truncf %121 : vector<256x32xf32> to vector<256x32xbf16>
    %c6_124 = arith.constant 6 : index
    %c0_125 = arith.constant 0 : index
    %c0_126 = arith.constant 0 : index
    %123 = vector.load %arg3[%c6_124, %c0_125, %c0_126] : memref<9x32x32xbf16, #tpu.memory_space<vmem>>, vector<1x32x32xbf16>
    %124 = vector.shape_cast %123 : vector<1x32x32xbf16> to vector<32x32xbf16>
    %cst_127 = arith.constant dense<0.000000e+00> : vector<256x32xf32>
    %125 = tpu.matmul %122, %124, %cst_127 {dimension_numbers = #tpu.dot_dimension_numbers<[1], [0], [0], [1], [0, 0, 1, 1], [], []>} : vector<256x32xbf16>, vector<32x32xbf16>, vector<256x32xf32> -> vector<256x32xf32>
    %126 = arith.addf %119, %125 : vector<256x32xf32>
    %c2_128 = arith.constant 2 : index
    %c1_129 = arith.constant 1 : index
    %c0_130 = arith.constant 0 : index
    %127 = vector.load %arg12[%c2_128, %c1_129, %c0_130] : memref<18x18x32xf32, #tpu.memory_space<vmem>>, vector<16x16x32xf32>
    %128 = vector.shape_cast %127 : vector<16x16x32xf32> to vector<256x32xf32>
    %129 = arith.truncf %128 : vector<256x32xf32> to vector<256x32xbf16>
    %c7_131 = arith.constant 7 : index
    %c0_132 = arith.constant 0 : index
    %c0_133 = arith.constant 0 : index
    %130 = vector.load %arg3[%c7_131, %c0_132, %c0_133] : memref<9x32x32xbf16, #tpu.memory_space<vmem>>, vector<1x32x32xbf16>
    %131 = vector.shape_cast %130 : vector<1x32x32xbf16> to vector<32x32xbf16>
    %cst_134 = arith.constant dense<0.000000e+00> : vector<256x32xf32>
    %132 = tpu.matmul %129, %131, %cst_134 {dimension_numbers = #tpu.dot_dimension_numbers<[1], [0], [0], [1], [0, 0, 1, 1], [], []>} : vector<256x32xbf16>, vector<32x32xbf16>, vector<256x32xf32> -> vector<256x32xf32>
    %133 = arith.addf %126, %132 : vector<256x32xf32>
    %c2_135 = arith.constant 2 : index
    %c2_136 = arith.constant 2 : index
    %c0_137 = arith.constant 0 : index
    %134 = vector.load %arg12[%c2_135, %c2_136, %c0_137] : memref<18x18x32xf32, #tpu.memory_space<vmem>>, vector<16x16x32xf32>
    %135 = vector.shape_cast %134 : vector<16x16x32xf32> to vector<256x32xf32>
    %136 = arith.truncf %135 : vector<256x32xf32> to vector<256x32xbf16>
    %c8_138 = arith.constant 8 : index
    %c0_139 = arith.constant 0 : index
    %c0_140 = arith.constant 0 : index
    %137 = vector.load %arg3[%c8_138, %c0_139, %c0_140] : memref<9x32x32xbf16, #tpu.memory_space<vmem>>, vector<1x32x32xbf16>
    %138 = vector.shape_cast %137 : vector<1x32x32xbf16> to vector<32x32xbf16>
    %cst_141 = arith.constant dense<0.000000e+00> : vector<256x32xf32>
    %139 = tpu.matmul %136, %138, %cst_141 {dimension_numbers = #tpu.dot_dimension_numbers<[1], [0], [0], [1], [0, 0, 1, 1], [], []>} : vector<256x32xbf16>, vector<32x32xbf16>, vector<256x32xf32> -> vector<256x32xf32>
    %140 = arith.addf %133, %139 : vector<256x32xf32>
    %c0_142 = arith.constant 0 : index
    %c0_143 = arith.constant 0 : index
    %141 = vector.load %arg5[%c0_142, %c0_143] : memref<1x32xf32, #tpu.memory_space<vmem>>, vector<1x32xf32>
    %142 = vector.broadcast %141 : vector<1x32xf32> to vector<256x32xf32>
    %143 = arith.addf %140, %142 : vector<256x32xf32>
    %cst_144 = arith.constant 0.000000e+00 : f32
    %144 = vector.broadcast %cst_144 : f32 to vector<256x32xf32>
    %145 = arith.maximumf %143, %144 : vector<256x32xf32>
    %146 = vector.shape_cast %145 : vector<256x32xf32> to vector<16x16x32xf32>
    %c1_145 = arith.constant 1 : index
    %c1_146 = arith.constant 1 : index
    %c0_147 = arith.constant 0 : index
    %147 = vector.load %arg12[%c1_145, %c1_146, %c0_147] : memref<18x18x32xf32, #tpu.memory_space<vmem>>, vector<16x16x32xf32>
    tpu.vector_store %arg12[%c1_145, %c1_146, %c0_147], %146 {strides = array<i32>} : memref<18x18x32xf32, #tpu.memory_space<vmem>>, vector<16x16x32xf32>,
    %c0_148 = arith.constant 0 : index
    %c0_149 = arith.constant 0 : index
    %c0_150 = arith.constant 0 : index
    %148 = vector.load %arg12[%c0_148, %c0_149, %c0_150] : memref<18x18x32xf32, #tpu.memory_space<vmem>>, vector<16x16x32xf32>
    %149 = vector.shape_cast %148 : vector<16x16x32xf32> to vector<256x32xf32>
    %150 = arith.truncf %149 : vector<256x32xf32> to vector<256x32xbf16>
    %c0_151 = arith.constant 0 : index
    %c0_152 = arith.constant 0 : index
    %c0_153 = arith.constant 0 : index
    %151 = vector.load %arg6[%c0_151, %c0_152, %c0_153] : memref<9x32x128xbf16, #tpu.memory_space<vmem>>, vector<1x32x128xbf16>
    %152 = vector.shape_cast %151 : vector<1x32x128xbf16> to vector<32x128xbf16>
    %cst_154 = arith.constant dense<0.000000e+00> : vector<256x128xf32>
    %153 = tpu.matmul %150, %152, %cst_154 {dimension_numbers = #tpu.dot_dimension_numbers<[1], [0], [0], [1], [0, 0, 1, 1], [], []>} : vector<256x32xbf16>, vector<32x128xbf16>, vector<256x128xf32> -> vector<256x128xf32>
    %c0_155 = arith.constant 0 : index
    %c1_156 = arith.constant 1 : index
    %c0_157 = arith.constant 0 : index
    %154 = vector.load %arg12[%c0_155, %c1_156, %c0_157] : memref<18x18x32xf32, #tpu.memory_space<vmem>>, vector<16x16x32xf32>
    %155 = vector.shape_cast %154 : vector<16x16x32xf32> to vector<256x32xf32>
    %156 = arith.truncf %155 : vector<256x32xf32> to vector<256x32xbf16>
    %c1_158 = arith.constant 1 : index
    %c0_159 = arith.constant 0 : index
    %c0_160 = arith.constant 0 : index
    %157 = vector.load %arg6[%c1_158, %c0_159, %c0_160] : memref<9x32x128xbf16, #tpu.memory_space<vmem>>, vector<1x32x128xbf16>
    %158 = vector.shape_cast %157 : vector<1x32x128xbf16> to vector<32x128xbf16>
    %cst_161 = arith.constant dense<0.000000e+00> : vector<256x128xf32>
    %159 = tpu.matmul %156, %158, %cst_161 {dimension_numbers = #tpu.dot_dimension_numbers<[1], [0], [0], [1], [0, 0, 1, 1], [], []>} : vector<256x32xbf16>, vector<32x128xbf16>, vector<256x128xf32> -> vector<256x128xf32>
    %160 = arith.addf %153, %159 : vector<256x128xf32>
    %c0_162 = arith.constant 0 : index
    %c2_163 = arith.constant 2 : index
    %c0_164 = arith.constant 0 : index
    %161 = vector.load %arg12[%c0_162, %c2_163, %c0_164] : memref<18x18x32xf32, #tpu.memory_space<vmem>>, vector<16x16x32xf32>
    %162 = vector.shape_cast %161 : vector<16x16x32xf32> to vector<256x32xf32>
    %163 = arith.truncf %162 : vector<256x32xf32> to vector<256x32xbf16>
    %c2_165 = arith.constant 2 : index
    %c0_166 = arith.constant 0 : index
    %c0_167 = arith.constant 0 : index
    %164 = vector.load %arg6[%c2_165, %c0_166, %c0_167] : memref<9x32x128xbf16, #tpu.memory_space<vmem>>, vector<1x32x128xbf16>
    %165 = vector.shape_cast %164 : vector<1x32x128xbf16> to vector<32x128xbf16>
    %cst_168 = arith.constant dense<0.000000e+00> : vector<256x128xf32>
    %166 = tpu.matmul %163, %165, %cst_168 {dimension_numbers = #tpu.dot_dimension_numbers<[1], [0], [0], [1], [0, 0, 1, 1], [], []>} : vector<256x32xbf16>, vector<32x128xbf16>, vector<256x128xf32> -> vector<256x128xf32>
    %167 = arith.addf %160, %166 : vector<256x128xf32>
    %c1_169 = arith.constant 1 : index
    %c0_170 = arith.constant 0 : index
    %c0_171 = arith.constant 0 : index
    %168 = vector.load %arg12[%c1_169, %c0_170, %c0_171] : memref<18x18x32xf32, #tpu.memory_space<vmem>>, vector<16x16x32xf32>
    %169 = vector.shape_cast %168 : vector<16x16x32xf32> to vector<256x32xf32>
    %170 = arith.truncf %169 : vector<256x32xf32> to vector<256x32xbf16>
    %c3_172 = arith.constant 3 : index
    %c0_173 = arith.constant 0 : index
    %c0_174 = arith.constant 0 : index
    %171 = vector.load %arg6[%c3_172, %c0_173, %c0_174] : memref<9x32x128xbf16, #tpu.memory_space<vmem>>, vector<1x32x128xbf16>
    %172 = vector.shape_cast %171 : vector<1x32x128xbf16> to vector<32x128xbf16>
    %cst_175 = arith.constant dense<0.000000e+00> : vector<256x128xf32>
    %173 = tpu.matmul %170, %172, %cst_175 {dimension_numbers = #tpu.dot_dimension_numbers<[1], [0], [0], [1], [0, 0, 1, 1], [], []>} : vector<256x32xbf16>, vector<32x128xbf16>, vector<256x128xf32> -> vector<256x128xf32>
    %174 = arith.addf %167, %173 : vector<256x128xf32>
    %c1_176 = arith.constant 1 : index
    %c1_177 = arith.constant 1 : index
    %c0_178 = arith.constant 0 : index
    %175 = vector.load %arg12[%c1_176, %c1_177, %c0_178] : memref<18x18x32xf32, #tpu.memory_space<vmem>>, vector<16x16x32xf32>
    %176 = vector.shape_cast %175 : vector<16x16x32xf32> to vector<256x32xf32>
    %177 = arith.truncf %176 : vector<256x32xf32> to vector<256x32xbf16>
    %c4_179 = arith.constant 4 : index
    %c0_180 = arith.constant 0 : index
    %c0_181 = arith.constant 0 : index
    %178 = vector.load %arg6[%c4_179, %c0_180, %c0_181] : memref<9x32x128xbf16, #tpu.memory_space<vmem>>, vector<1x32x128xbf16>
    %179 = vector.shape_cast %178 : vector<1x32x128xbf16> to vector<32x128xbf16>
    %cst_182 = arith.constant dense<0.000000e+00> : vector<256x128xf32>
    %180 = tpu.matmul %177, %179, %cst_182 {dimension_numbers = #tpu.dot_dimension_numbers<[1], [0], [0], [1], [0, 0, 1, 1], [], []>} : vector<256x32xbf16>, vector<32x128xbf16>, vector<256x128xf32> -> vector<256x128xf32>
    %181 = arith.addf %174, %180 : vector<256x128xf32>
    %c1_183 = arith.constant 1 : index
    %c2_184 = arith.constant 2 : index
    %c0_185 = arith.constant 0 : index
    %182 = vector.load %arg12[%c1_183, %c2_184, %c0_185] : memref<18x18x32xf32, #tpu.memory_space<vmem>>, vector<16x16x32xf32>
    %183 = vector.shape_cast %182 : vector<16x16x32xf32> to vector<256x32xf32>
    %184 = arith.truncf %183 : vector<256x32xf32> to vector<256x32xbf16>
    %c5_186 = arith.constant 5 : index
    %c0_187 = arith.constant 0 : index
    %c0_188 = arith.constant 0 : index
    %185 = vector.load %arg6[%c5_186, %c0_187, %c0_188] : memref<9x32x128xbf16, #tpu.memory_space<vmem>>, vector<1x32x128xbf16>
    %186 = vector.shape_cast %185 : vector<1x32x128xbf16> to vector<32x128xbf16>
    %cst_189 = arith.constant dense<0.000000e+00> : vector<256x128xf32>
    %187 = tpu.matmul %184, %186, %cst_189 {dimension_numbers = #tpu.dot_dimension_numbers<[1], [0], [0], [1], [0, 0, 1, 1], [], []>} : vector<256x32xbf16>, vector<32x128xbf16>, vector<256x128xf32> -> vector<256x128xf32>
    %188 = arith.addf %181, %187 : vector<256x128xf32>
    %c2_190 = arith.constant 2 : index
    %c0_191 = arith.constant 0 : index
    %c0_192 = arith.constant 0 : index
    %189 = vector.load %arg12[%c2_190, %c0_191, %c0_192] : memref<18x18x32xf32, #tpu.memory_space<vmem>>, vector<16x16x32xf32>
    %190 = vector.shape_cast %189 : vector<16x16x32xf32> to vector<256x32xf32>
    %191 = arith.truncf %190 : vector<256x32xf32> to vector<256x32xbf16>
    %c6_193 = arith.constant 6 : index
    %c0_194 = arith.constant 0 : index
    %c0_195 = arith.constant 0 : index
    %192 = vector.load %arg6[%c6_193, %c0_194, %c0_195] : memref<9x32x128xbf16, #tpu.memory_space<vmem>>, vector<1x32x128xbf16>
    %193 = vector.shape_cast %192 : vector<1x32x128xbf16> to vector<32x128xbf16>
    %cst_196 = arith.constant dense<0.000000e+00> : vector<256x128xf32>
    %194 = tpu.matmul %191, %193, %cst_196 {dimension_numbers = #tpu.dot_dimension_numbers<[1], [0], [0], [1], [0, 0, 1, 1], [], []>} : vector<256x32xbf16>, vector<32x128xbf16>, vector<256x128xf32> -> vector<256x128xf32>
    %195 = arith.addf %188, %194 : vector<256x128xf32>
    %c2_197 = arith.constant 2 : index
    %c1_198 = arith.constant 1 : index
    %c0_199 = arith.constant 0 : index
    %196 = vector.load %arg12[%c2_197, %c1_198, %c0_199] : memref<18x18x32xf32, #tpu.memory_space<vmem>>, vector<16x16x32xf32>
    %197 = vector.shape_cast %196 : vector<16x16x32xf32> to vector<256x32xf32>
    %198 = arith.truncf %197 : vector<256x32xf32> to vector<256x32xbf16>
    %c7_200 = arith.constant 7 : index
    %c0_201 = arith.constant 0 : index
    %c0_202 = arith.constant 0 : index
    %199 = vector.load %arg6[%c7_200, %c0_201, %c0_202] : memref<9x32x128xbf16, #tpu.memory_space<vmem>>, vector<1x32x128xbf16>
    %200 = vector.shape_cast %199 : vector<1x32x128xbf16> to vector<32x128xbf16>
    %cst_203 = arith.constant dense<0.000000e+00> : vector<256x128xf32>
    %201 = tpu.matmul %198, %200, %cst_203 {dimension_numbers = #tpu.dot_dimension_numbers<[1], [0], [0], [1], [0, 0, 1, 1], [], []>} : vector<256x32xbf16>, vector<32x128xbf16>, vector<256x128xf32> -> vector<256x128xf32>
    %202 = arith.addf %195, %201 : vector<256x128xf32>
    %c2_204 = arith.constant 2 : index
    %c2_205 = arith.constant 2 : index
    %c0_206 = arith.constant 0 : index
    %203 = vector.load %arg12[%c2_204, %c2_205, %c0_206] : memref<18x18x32xf32, #tpu.memory_space<vmem>>, vector<16x16x32xf32>
    %204 = vector.shape_cast %203 : vector<16x16x32xf32> to vector<256x32xf32>
    %205 = arith.truncf %204 : vector<256x32xf32> to vector<256x32xbf16>
    %c8_207 = arith.constant 8 : index
    %c0_208 = arith.constant 0 : index
    %c0_209 = arith.constant 0 : index
    %206 = vector.load %arg6[%c8_207, %c0_208, %c0_209] : memref<9x32x128xbf16, #tpu.memory_space<vmem>>, vector<1x32x128xbf16>
    %207 = vector.shape_cast %206 : vector<1x32x128xbf16> to vector<32x128xbf16>
    %cst_210 = arith.constant dense<0.000000e+00> : vector<256x128xf32>
    %208 = tpu.matmul %205, %207, %cst_210 {dimension_numbers = #tpu.dot_dimension_numbers<[1], [0], [0], [1], [0, 0, 1, 1], [], []>} : vector<256x32xbf16>, vector<32x128xbf16>, vector<256x128xf32> -> vector<256x128xf32>
    %209 = arith.addf %202, %208 : vector<256x128xf32>
    %c0_211 = arith.constant 0 : index
    %c0_212 = arith.constant 0 : index
    %210 = vector.load %arg7[%c0_211, %c0_212] : memref<1x128xf32, #tpu.memory_space<vmem>>, vector<1x128xf32>
    %211 = vector.broadcast %210 : vector<1x128xf32> to vector<256x128xf32>
    %212 = arith.addf %209, %211 : vector<256x128xf32>
    %213 = tpu.transpose %212, [1, 0] : vector<256x128xf32> -> vector<128x256xf32>
    %c0_213 = arith.constant 0 : index
    %c0_214 = arith.constant 0 : index
    %c0_215 = arith.constant 0 : index
    %214 = vector.load %arg11[%c0_213, %c0_214, %c0_215] : memref<1x128x256xf32, #tpu.memory_space<vmem>>, vector<1x128x256xf32>
    %215 = vector.shape_cast %214 : vector<1x128x256xf32> to vector<128x256xf32>
    %216 = vector.shape_cast %213 : vector<128x256xf32> to vector<1x128x256xf32>
    tpu.vector_store %arg11[%c0_213, %c0_214, %c0_215], %216 {strides = array<i32>} : memref<1x128x256xf32, #tpu.memory_space<vmem>>, vector<1x128x256xf32>,
    %217 = arith.negf %213 : vector<128x256xf32>
    %218 = math.exp %217 : vector<128x256xf32>
    %cst_216 = arith.constant 1.000000e+00 : f32
    %219 = vector.broadcast %cst_216 : f32 to vector<128x256xf32>
    %220 = arith.addf %219, %218 : vector<128x256xf32>
    %221 = arith.divf %219, %220 : vector<128x256xf32>
    %cst_217 = arith.constant dense<0.000000e+00> : vector<128xf32>
    %222 = vector.multi_reduction <add>, %221, %cst_217 [1] : vector<128x256xf32> to vector<128xf32>
    %223 = vector.shape_cast %222 : vector<128xf32> to vector<128x1xf32>
    %cst_218 = arith.constant 9.99999997E-7 : f32
    %224 = vector.broadcast %cst_218 : f32 to vector<128x1xf32>
    %225 = arith.maximumf %223, %224 : vector<128x1xf32>
    %c1_219 = arith.constant 1 : index
    %c1_220 = arith.constant 1 : index
    %c0_221 = arith.constant 0 : index
    %226 = vector.load %arg12[%c1_219, %c1_220, %c0_221] : memref<18x18x32xf32, #tpu.memory_space<vmem>>, vector<16x16x32xf32>
    %227 = vector.shape_cast %226 : vector<16x16x32xf32> to vector<256x32xf32>
    %228 = arith.truncf %227 : vector<256x32xf32> to vector<256x32xbf16>
    %229 = arith.truncf %221 : vector<128x256xf32> to vector<128x256xbf16>
    %cst_222 = arith.constant dense<0.000000e+00> : vector<128x32xf32>
    %230 = tpu.matmul %229, %228, %cst_222 {dimension_numbers = #tpu.dot_dimension_numbers<[1], [0], [0], [1], [0, 0, 1, 1], [], []>} : vector<128x256xbf16>, vector<256x32xbf16>, vector<128x32xf32> -> vector<128x32xf32>
    %231 = vector.broadcast %225 : vector<128x1xf32> to vector<128x32xf32>
    %232 = arith.divf %230, %231 : vector<128x32xf32>
    %233 = arith.truncf %232 : vector<128x32xf32> to vector<128x32xbf16>
    %c0_223 = arith.constant 0 : index
    %c0_224 = arith.constant 0 : index
    %234 = vector.load %arg8[%c0_223, %c0_224] : memref<32x128xbf16, #tpu.memory_space<vmem>>, vector<32x128xbf16>
    %cst_225 = arith.constant dense<0.000000e+00> : vector<128x128xf32>
    %235 = tpu.matmul %233, %234, %cst_225 {dimension_numbers = #tpu.dot_dimension_numbers<[1], [0], [0], [1], [0, 0, 1, 1], [], []>} : vector<128x32xbf16>, vector<32x128xbf16>, vector<128x128xf32> -> vector<128x128xf32>
    %c0_226 = arith.constant 0 : index
    %c0_227 = arith.constant 0 : index
    %236 = vector.load %arg9[%c0_226, %c0_227] : memref<1x128xf32, #tpu.memory_space<vmem>>, vector<1x128xf32>
    %237 = vector.broadcast %236 : vector<1x128xf32> to vector<128x128xf32>
    %238 = arith.addf %235, %237 : vector<128x128xf32>
    %c0_228 = arith.constant 0 : index
    %c0_229 = arith.constant 0 : index
    %c0_230 = arith.constant 0 : index
    %239 = vector.load %arg10[%c0_228, %c0_229, %c0_230] : memref<1x128x128xf32, #tpu.memory_space<vmem>>, vector<1x128x128xf32>
    %240 = vector.shape_cast %239 : vector<1x128x128xf32> to vector<128x128xf32>
    %241 = vector.shape_cast %238 : vector<128x128xf32> to vector<1x128x128xf32>
    tpu.vector_store %arg10[%c0_228, %c0_229, %c0_230], %241 {strides = array<i32>} : memref<1x128x128xf32, #tpu.memory_space<vmem>>, vector<1x128x128xf32>,
    return
  }
  func.func @transform_0(%arg0: i32) -> (i32, i32, i32, i32) {
    %c0_i32 = arith.constant 0 : i32
    %c0_i32_0 = arith.constant 0 : i32
    %c0_i32_1 = arith.constant 0 : i32
    %c0_i32_2 = arith.constant 0 : i32
    return %arg0, %c0_i32, %c0_i32_0, %c0_i32_1 : i32, i32, i32, i32
  }
  func.func @transform_1(%arg0: i32) -> (i32, i32, i32) {
    %c0_i32 = arith.constant 0 : i32
    %c0_i32_0 = arith.constant 0 : i32
    %c0_i32_1 = arith.constant 0 : i32
    %c0_i32_2 = arith.constant 0 : i32
    return %c0_i32, %c0_i32_0, %c0_i32_1 : i32, i32, i32
  }
  func.func @transform_2(%arg0: i32) -> (i32, i32, i32) {
    %c0_i32 = arith.constant 0 : i32
    %c0_i32_0 = arith.constant 0 : i32
    %c0_i32_1 = arith.constant 0 : i32
    %c0_i32_2 = arith.constant 0 : i32
    return %c0_i32, %c0_i32_0, %c0_i32_1 : i32, i32, i32
  }
  func.func @transform_3(%arg0: i32) -> (i32, i32) {
    %c0_i32 = arith.constant 0 : i32
    %c0_i32_0 = arith.constant 0 : i32
    %c0_i32_1 = arith.constant 0 : i32
    return %c0_i32, %c0_i32_0 : i32, i32
  }
  func.func @transform_4(%arg0: i32) -> (i32, i32) {
    %c0_i32 = arith.constant 0 : i32
    %c0_i32_0 = arith.constant 0 : i32
    %c0_i32_1 = arith.constant 0 : i32
    return %c0_i32, %c0_i32_0 : i32, i32
  }
  func.func @transform_5(%arg0: i32) -> (i32, i32, i32) {
    %c0_i32 = arith.constant 0 : i32
    %c0_i32_0 = arith.constant 0 : i32
    %c0_i32_1 = arith.constant 0 : i32
    %c0_i32_2 = arith.constant 0 : i32
    return %c0_i32, %c0_i32_0, %c0_i32_1 : i32, i32, i32
  }
  func.func @transform_6(%arg0: i32) -> (i32, i32) {
    %c0_i32 = arith.constant 0 : i32
    %c0_i32_0 = arith.constant 0 : i32
    %c0_i32_1 = arith.constant 0 : i32
    return %c0_i32, %c0_i32_0 : i32, i32
  }
  func.func @transform_7(%arg0: i32) -> (i32, i32) {
    %c0_i32 = arith.constant 0 : i32
    %c0_i32_0 = arith.constant 0 : i32
    %c0_i32_1 = arith.constant 0 : i32
    return %c0_i32, %c0_i32_0 : i32, i32
  }
  func.func @transform_8(%arg0: i32) -> (i32, i32) {
    %c0_i32 = arith.constant 0 : i32
    %c0_i32_0 = arith.constant 0 : i32
    %c0_i32_1 = arith.constant 0 : i32
    return %c0_i32, %c0_i32_0 : i32, i32
  }
  func.func @transform_9(%arg0: i32) -> (i32, i32, i32) {
    %c0_i32 = arith.constant 0 : i32
    %c0_i32_0 = arith.constant 0 : i32
    %c0_i32_1 = arith.constant 0 : i32
    return %arg0, %c0_i32, %c0_i32_0 : i32, i32, i32
  }
  func.func @transform_10(%arg0: i32) -> (i32, i32, i32) {
    %c0_i32 = arith.constant 0 : i32
    %c0_i32_0 = arith.constant 0 : i32
    %c0_i32_1 = arith.constant 0 : i32
    return %arg0, %c0_i32, %c0_i32_0 : i32, i32, i32
  }
}

</mosaic_0001>

<bundles_post_ra>
// kernel: instance_branch_forward.1
= control target key start
LH: loop header
LB: loop body
LE: loop exit
PB: predicated region body
PF: predicated region fallthrough
CT: control target
= control target key end

     0   :  { %s12782_s13 = smov 0   ;;  %s14581_s0 = inlined_call_operand.vmem [shape: bf16[2,16,16,4], index: 0, kind: input, shape index: {}]   ;;  %s14582_s1 = inlined_call_operand.vmem [shape: bf16[9,4,32], index: 1, kind: input, shape index: {}]   ;;  %s14583_s2 = inlined_call_operand.vmem [shape: bf16[9,32,32], index: 2, kind: input, shape index: {}]   ;;  %s14584_s3 = inlined_call_operand.vmem [shape: f32[1,32], index: 3, kind: input, shape index: {}]   ;;  %s14585_s4 = inlined_call_operand.vmem [shape: f32[1,32], index: 4, kind: input, shape index: {}]   ;;  %s14586_s5 = inlined_call_operand.vmem [shape: bf16[9,32,128], index: 5, kind: input, shape index: {}]   ;;  %s14587_s6 = inlined_call_operand.vmem [shape: f32[1,128], index: 6, kind: input, shape index: {}]   ;;  %s14588_s7 = inlined_call_operand.vmem [shape: bf16[32,128], index: 7, kind: input, shape index: {}]   ;;  %s14589_s8 = inlined_call_operand.vmem [shape: f32[1,128], index: 8, kind: input, shape index: {}]   ;;  %s14590_s9 = inlined_call_operand.vmem [shape: f32[2,128,128], index: 9, kind: output, shape index: {0}]   ;;  %s14591_s10 = inlined_call_operand.vmem [shape: f32[2,128,256], index: 10, kind: output, shape index: {1}]  }
   0x1 LB: > { %s9525_s14 = sadd.s32 4294967295, %s12724_s13   ;;  %p9529_p0 = scmp.ge.s32.totalorder %s12724_s13, 1  ;;  %s12724_s13 = sphi %s12782_s13, %s21_s13  }
   0x2   : > { %p315_p1 = scmp.lt.s32.totalorder %s12724_s13, 3 }
   0x4   : > { %p316_p2 = pnand %p9529_p0, %p315_p1 }
   0x5   : > { %v9536_v0 = vld [vmem:[%s14582_s1 + $0x2] sm:$0x3] (!%p316_p2)  ;;  %vm665_vm0 = vcmask (!%p316_p2), 1041408   ;;  %v12796_v1 = vld [vmem:[%s14582_s1 + $0x6] sm:$0x3] (!%p316_p2)  ;;  %vm374_vm1 = vcmask (!%p316_p2), 261120  }
   0x6   : > { %319 = sbr.rel (%p316_p2) target bundleno = 2700 (0xa8c), region = 56  ;;  %12501 = vmatprep.subr.msk.bf16.mxu1 (!%p316_p2), %vm665_vm0, %v9536_v0  ;;  %12504 = vmatprep.subr.msk.bf16.mxu0 (!%p316_p2), %vm665_vm0, %v12796_v1  ;;  %v667_v2 = vsel (!%p316_p2), %vm665_vm0, %v9536_v0, 0  ;;  %v12804_v3 = vsel (!%p316_p2), %vm665_vm0, %v12796_v1, 0  ;;  %vm377_vm2 = vcmask (!%p316_p2), 254976   ;;  %p358_p3 = scmp.lt.s32.totalorder (!%p316_p2), %s9525_s14, 1  ;;  %v12726_v4 = vmov (!%p316_p2), 0.0  }
   0x7   : > { %10758 = vmatpush3.bf16.msra.mxu1 (!%p316_p2), %v667_v2  ;;  %10860 = vmatpush3.bf16.msra.mxu0 (!%p316_p2), %v12804_v3  ;;  %375 = vst.msk [vmem:[#allocation2] sm:$0xff] (!%p316_p2), %vm374_vm1, %v12726_v4  ;;  %376 = vst.msk [vmem:[#allocation2 + $0x8] sm:$0xff] (!%p316_p2), %vm374_vm1, %v12726_v4  ;;  %vm383_vm3 = vcmask (!%p316_p2), 253952   ;;  %v12814_v5 = vld [vmem:[%s14582_s1 + $0x8] sm:$0x3] (!%p316_p2)  ;;  %vm485_vm4 = vcmask (!%p316_p2), 31744  }
   0x8   : > { %378 = vst.msk [vmem:[#allocation2 + $0x10] sm:$0x3] (!%p316_p2), %vm377_vm2, %v12726_v4  ;;  %382 = vst.msk [vmem:[#allocation2 + $0x1a8] sm:$0x3] (!%p316_p2), %vm377_vm2, %v12726_v4  ;;  %12506 = vmatprep.subr.msk.bf16.mxu0 (!%p316_p2), %vm665_vm0, %v12814_v5  ;;  %v12859_v6 = vld [vmem:[%s14582_s1] sm:$0x3] (!%p316_p2) }
   0x9   : > { %380 = vst.msk [vmem:[#allocation2 + $0x198] sm:$0xff] (!%p316_p2), %vm374_vm1, %v12726_v4  ;;  %381 = vst.msk [vmem:[#allocation2 + $0x1a0] sm:$0xff] (!%p316_p2), %vm374_vm1, %v12726_v4  ;;  %12502 = vmatprep.subr.msk.bf16.mxu1 (!%p316_p2), %vm665_vm0, %v12859_v6  ;;  %v879_v2 = vsel (!%p316_p2), %vm665_vm0, %v12859_v6, 0  ;;  %v9620_v6 = vld [vmem:[%s14582_s1 + $0xa] sm:$0x3] (!%p316_p2) }
   0xa   : > { %385 = vst.msk [vmem:[#allocation2 + $0x18] sm:$0x1] (!%p316_p2), %vm383_vm3, %v12726_v4  ;;  %384 = vst.msk [vmem:[#allocation2] sm:$0x1] (!%p316_p2), %vm383_vm3, %v12726_v4 }
   0xb   : > { %386 = vst.msk [vmem:[#allocation2 + $0x30] sm:$0x1] (!%p316_p2), %vm383_vm3, %v12726_v4  ;;  %387 = vst.msk [vmem:[#allocation2 + $0x48] sm:$0x1] (!%p316_p2), %vm383_vm3, %v12726_v4 }
   0xc   : > { %388 = vst.msk [vmem:[#allocation2 + $0x60] sm:$0x1] (!%p316_p2), %vm383_vm3, %v12726_v4  ;;  %389 = vst.msk [vmem:[#allocation2 + $0x78] sm:$0x1] (!%p316_p2), %vm383_vm3, %v12726_v4 }
   0xd   : > { %s14593_s14 = smov (!%p358_p3, %s9525_s14), 1  ;;  %390 = vst.msk [vmem:[#allocation2 + $0x90] sm:$0x1] %vm383_vm3, %v12726_v4  ;;  %391 = vst.msk [vmem:[#allocation2 + $0xa8] sm:$0x1] %vm383_vm3, %v12726_v4 }
   0xe   : > { %392 = vst.msk [vmem:[#allocation2 + $0xc0] sm:$0x1] %vm383_vm3, %v12726_v4  ;;  %393 = vst.msk [vmem:[#allocation2 + $0xd8] sm:$0x1] %vm383_vm3, %v12726_v4  ;;  %s10124_s23 = sshll.u32 %s14593_s14, 7  ;;  %v567_v17 = vld [vmem:[#allocation2 + $0x1] sm:$0xff] }
   0xf   : > { %394 = vst.msk [vmem:[#allocation2 + $0xf0] sm:$0x1] %vm383_vm3, %v12726_v4  ;;  %395 = vst.msk [vmem:[#allocation2 + $0x108] sm:$0x1] %vm383_vm3, %v12726_v4  ;;  %s12869_s26 = scalar_lea.vmem %s14581_s0, %s10124_s23  ;;  %v568_v18 = vld [vmem:[#allocation2 + $0x9] sm:$0xff]  ;;  %s10126_s30 = sshll.u32 %s14593_s14, 8 }
  0x10   : > { %396 = vst.msk [vmem:[#allocation2 + $0x120] sm:$0x1] %vm383_vm3, %v12726_v4  ;;  %397 = vst.msk [vmem:[#allocation2 + $0x138] sm:$0x1] %vm383_vm3, %v12726_v4  ;;  %v10128_v7 = vld [vmem:[%s12869_s26] sm:$0xff]   ;;  %v10191_v8 = vld [vmem:[%s12869_s26 + $0x8] sm:$0xff]   ;;  %v599_v24 = vpack.c.bf16 %v568_v18, %v567_v17  ;;  %s14460_s15 = scalar_lea.vmem %s14591_s10, %s10126_s30  ;;  %s14560_s25 = scalar_lea.vmem %s14590_s9, %s10124_s23 }
  0x11   : > { %398 = vst.msk [vmem:[#allocation2 + $0x150] sm:$0x1] %vm383_vm3, %v12726_v4  ;;  %399 = vst.msk [vmem:[#allocation2 + $0x168] sm:$0x1] %vm383_vm3, %v12726_v4  ;;  %v10192_v9 = vld [vmem:[%s12869_s26 + $0x10] sm:$0xff]   ;;  %v10129_v10 = vunpack.c.l.bf16 %v10128_v7  ;;  %v10130_v11 = vunpack.c.h.bf16 %v10128_v7  ;;  %v10133_v12 = vunpack.c.l.bf16 %v10191_v8  ;;  %v10134_v13 = vunpack.c.h.bf16 %v10191_v8  ;;  %v10193_v14 = vld [vmem:[%s12869_s26 + $0x18] sm:$0xff]  }
  0x12   : > { %400 = vst.msk [vmem:[#allocation2 + $0x180] sm:$0x1] %vm383_vm3, %v12726_v4  ;;  %401 = vst.msk [vmem:[#allocation2 + $0x198] sm:$0x1] %vm383_vm3, %v12726_v4  ;;  %v10194_v15 = vld [vmem:[%s12869_s26 + $0x20] sm:$0xff]   ;;  %v10195_v16 = vld [vmem:[%s12869_s26 + $0x28] sm:$0xff]   ;;  %v10137_v19 = vunpack.c.l.bf16 %v10192_v9  ;;  %v10138_v20 = vunpack.c.h.bf16 %v10192_v9  ;;  %v10141_v21 = vunpack.c.l.bf16 %v10193_v14  ;;  %v10142_v22 = vunpack.c.h.bf16 %v10193_v14  ;;  %10759 = vmatprep.mubr.msk.bf16.mxu1 %vm485_vm4, %v599_v24 }
  0x13   : > { %402 = vst.msk [vmem:[#allocation2 + $0x11] sm:$0x1] %vm383_vm3, %v12726_v4  ;;  %403 = vst.msk [vmem:[#allocation2 + $0x29] sm:$0x1] %vm383_vm3, %v12726_v4  ;;  %v10196_v23 = vld [vmem:[%s12869_s26 + $0x30] sm:$0xff]   ;;  %v10145_v25 = vunpack.c.l.bf16 %v10194_v15  ;;  %v10146_v26 = vunpack.c.h.bf16 %v10194_v15  ;;  %v10149_v27 = vunpack.c.l.bf16 %v10195_v16  ;;  %v10197_v28 = vld [vmem:[%s12869_s26 + $0x38] sm:$0xff]   ;;  %v10150_v31 = vunpack.c.h.bf16 %v10195_v16 }
  0x14   : > { %404 = vst.msk [vmem:[#allocation2 + $0x41] sm:$0x1] %vm383_vm3, %v12726_v4  ;;  %405 = vst.msk [vmem:[#allocation2 + $0x59] sm:$0x1] %vm383_vm3, %v12726_v4  ;;  %v10198_v29 = vld [vmem:[%s12869_s26 + $0x40] sm:$0xff]   ;;  %v10199_v30 = vld [vmem:[%s12869_s26 + $0x48] sm:$0xff]   ;;  %v10153_v32 = vunpack.c.l.bf16 %v10196_v23  ;;  %v10154_v33 = vunpack.c.h.bf16 %v10196_v23  ;;  %v10157_v34 = vunpack.c.l.bf16 %v10197_v28  ;;  %v10158_v38 = vunpack.c.h.bf16 %v10197_v28 }
  0x15   : > { %406 = vst.msk [vmem:[#allocation2 + $0x71] sm:$0x1] %vm383_vm3, %v12726_v4  ;;  %407 = vst.msk [vmem:[#allocation2 + $0x89] sm:$0x1] %vm383_vm3, %v12726_v4  ;;  %v10200_v35 = vld [vmem:[%s12869_s26 + $0x50] sm:$0xff]   ;;  %v10201_v36 = vld [vmem:[%s12869_s26 + $0x58] sm:$0xff]   ;;  %v10161_v39 = vunpack.c.l.bf16 %v10198_v29  ;;  %v10162_v40 = vunpack.c.h.bf16 %v10198_v29  ;;  %v10165_v41 = vunpack.c.l.bf16 %v10199_v30  ;;  %v10166_v44 = vunpack.c.h.bf16 %v10199_v30 }
  0x16   : > { %408 = vst.msk [vmem:[#allocation2 + $0xa1] sm:$0x1] %vm383_vm3, %v12726_v4  ;;  %409 = vst.msk [vmem:[#allocation2 + $0xb9] sm:$0x1] %vm383_vm3, %v12726_v4  ;;  %v10202_v37 = vld [vmem:[%s12869_s26 + $0x60] sm:$0xff]   ;;  %v10203_v42 = vld [vmem:[%s12869_s26 + $0x68] sm:$0xff]   ;;  %v10169_v45 = vunpack.c.l.bf16 %v10200_v35  ;;  %v10170_v46 = vunpack.c.h.bf16 %v10200_v35  ;;  %v10173_v47 = vunpack.c.l.bf16 %v10201_v36  ;;  %v10174_v49 = vunpack.c.h.bf16 %v10201_v36 }
  0x17   : > { %410 = vst.msk [vmem:[#allocation2 + $0xd1] sm:$0x1] %vm383_vm3, %v12726_v4  ;;  %411 = vst.msk [vmem:[#allocation2 + $0xe9] sm:$0x1] %vm383_vm3, %v12726_v4  ;;  %v10204_v43 = vld [vmem:[%s12869_s26 + $0x70] sm:$0xff]   ;;  %v10205_v48 = vld [vmem:[%s12869_s26 + $0x78] sm:$0xff]   ;;  %v10177_v50 = vunpack.c.l.bf16 %v10202_v37  ;;  %v10178_v51 = vunpack.c.h.bf16 %v10202_v37  ;;  %v10181_v52 = vunpack.c.l.bf16 %v10203_v42  ;;  %v10182_v53 = vunpack.c.h.bf16 %v10203_v42 }
  0x18   : > { %412 = vst.msk [vmem:[#allocation2 + $0x101] sm:$0x1] %vm383_vm3, %v12726_v4  ;;  %413 = vst.msk [vmem:[#allocation2 + $0x119] sm:$0x1] %vm383_vm3, %v12726_v4  ;;  %v10185_v54 = vunpack.c.l.bf16 %v10204_v43  ;;  %v10186_v55 = vunpack.c.h.bf16 %v10204_v43  ;;  %v10189_v56 = vunpack.c.l.bf16 %v10205_v48  ;;  %v10190_v57 = vunpack.c.h.bf16 %v10205_v48 }
  0x19   : > { %414 = vst.msk [vmem:[#allocation2 + $0x131] sm:$0x1] %vm383_vm3, %v12726_v4  ;;  %415 = vst.msk [vmem:[#allocation2 + $0x149] sm:$0x1] %vm383_vm3, %v12726_v4  ;;  %v2023_v30 = vsel %vm665_vm0, %v9620_v6, 0 }
  0x1a   : > { %416 = vst.msk [vmem:[#allocation2 + $0x161] sm:$0x1] %vm383_vm3, %v12726_v4  ;;  %417 = vst.msk [vmem:[#allocation2 + $0x179] sm:$0x1] %vm383_vm3, %v12726_v4 }
  0x1b   : > { %418 = vst.msk [vmem:[#allocation2 + $0x191] sm:$0x1] %vm383_vm3, %v12726_v4  ;;  %419 = vst.msk [vmem:[#allocation2 + $0x1a9] sm:$0x1] %vm383_vm3, %v12726_v4 }
  0x1c   : > { %486 = vst.msk [vmem:[#allocation2 + $0x19] sm:$0xff] %vm485_vm4, %v10129_v10  ;;  %487 = vst.msk [vmem:[#allocation2 + $0x21] sm:$0xff] %vm485_vm4, %v10130_v11  ;;  %v1729_v10 = vsel %vm665_vm0, %v12814_v5, 0  ;;  %v12941_v5 = vld [vmem:[%s14582_s1 + $0x4] sm:$0x3] }
  0x1d   : > { %488 = vst.msk [vmem:[#allocation2 + $0x31] sm:$0xff] %vm485_vm4, %v10133_v12  ;;  %489 = vst.msk [vmem:[#allocation2 + $0x39] sm:$0xff] %vm485_vm4, %v10134_v13 }
  0x1e   : > { %490 = vst.msk [vmem:[#allocation2 + $0x49] sm:$0xff] %vm485_vm4, %v10137_v19  ;;  %491 = vst.msk [vmem:[#allocation2 + $0x51] sm:$0xff] %vm485_vm4, %v10138_v20 }
  0x1f   : > { %492 = vst.msk [vmem:[#allocation2 + $0x61] sm:$0xff] %vm485_vm4, %v10141_v21  ;;  %493 = vst.msk [vmem:[#allocation2 + $0x69] sm:$0xff] %vm485_vm4, %v10142_v22 }
  0x20   : > { %494 = vst.msk [vmem:[#allocation2 + $0x79] sm:$0xff] %vm485_vm4, %v10145_v25  ;;  %495 = vst.msk [vmem:[#allocation2 + $0x81] sm:$0xff] %vm485_vm4, %v10146_v26 }
  0x21   : > { %496 = vst.msk [vmem:[#allocation2 + $0x91] sm:$0xff] %vm485_vm4, %v10149_v27  ;;  %497 = vst.msk [vmem:[#allocation2 + $0x99] sm:$0xff] %vm485_vm4, %v10150_v31 }
  0x22   : > { %498 = vst.msk [vmem:[#allocation2 + $0xa9] sm:$0xff] %vm485_vm4, %v10153_v32  ;;  %499 = vst.msk [vmem:[#allocation2 + $0xb1] sm:$0xff] %vm485_vm4, %v10154_v33  ;;  %v12977_v33 = vld [vmem:[%s14582_s1 + $0xc] sm:$0x3] }
  0x23   : > { %500 = vst.msk [vmem:[#allocation2 + $0xc1] sm:$0xff] %vm485_vm4, %v10157_v34  ;;  %501 = vst.msk [vmem:[#allocation2 + $0xc9] sm:$0xff] %vm485_vm4, %v10158_v38  ;;  %v569_v58 = vld [vmem:[#allocation2 + $0x19] sm:$0xff]  ;;  %v570_v59 = vld [vmem:[#allocation2 + $0x21] sm:$0xff] }
  0x24   : > { %502 = vst.msk [vmem:[#allocation2 + $0xd9] sm:$0xff] %vm485_vm4, %v10161_v39  ;;  %503 = vst.msk [vmem:[#allocation2 + $0xe1] sm:$0xff] %vm485_vm4, %v10162_v40  ;;  %v1336_v60 = vld [vmem:[#allocation2 + $0x18] sm:$0xff]  ;;  %v600_v61 = vpack.c.bf16 %v570_v59, %v569_v58  ;;  %v1337_v62 = vld [vmem:[#allocation2 + $0x20] sm:$0xff] }
  0x25   : > { %504 = vst.msk [vmem:[#allocation2 + $0xf1] sm:$0xff] %vm485_vm4, %v10165_v41  ;;  %505 = vst.msk [vmem:[#allocation2 + $0xf9] sm:$0xff] %vm485_vm4, %v10166_v44  ;;  %v1338_v63 = vld [vmem:[#allocation2 + $0x30] sm:$0xff]  ;;  %v1339_v0 = vld [vmem:[#allocation2 + $0x38] sm:$0xff]  ;;  %v12922_v4 = vpack.c.bf16 %v1337_v62, %v1336_v60  ;;  %v1141_v62 = vsel %vm665_vm0, %v12941_v5, 0 }
  0x26   : > { %506 = vst.msk [vmem:[#allocation2 + $0x109] sm:$0xff] %vm485_vm4, %v10169_v45  ;;  %507 = vst.msk [vmem:[#allocation2 + $0x111] sm:$0xff] %vm485_vm4, %v10170_v46  ;;  %v12924_v7 = vpack.c.bf16 %v1339_v0, %v1338_v63  ;;  %v571_v8 = vld [vmem:[#allocation2 + $0x31] sm:$0xff]  ;;  %v572_v9 = vld [vmem:[#allocation2 + $0x39] sm:$0xff]  ;;  %10760 = vmatmul.mubr.msk.bf16.vlgmr.msra.gmra.mrb[0].mxu1 %vm485_vm4, %v600_v61 }
  0x27   : > { %508 = vst.msk [vmem:[#allocation2 + $0x121] sm:$0xff] %vm485_vm4, %v10173_v47  ;;  %509 = vst.msk [vmem:[#allocation2 + $0x129] sm:$0xff] %vm485_vm4, %v10174_v49  ;;  %v12929_v11 = vpack.c.bf16 %v572_v9, %v571_v8  ;;  %v1340_v12 = vld [vmem:[#allocation2 + $0x48] sm:$0xff]  ;;  %v1341_v13 = vld [vmem:[#allocation2 + $0x50] sm:$0xff]  ;;  %10861 = vmatprep.mubr.msk.bf16.mxu0 %vm485_vm4, %v12922_v4  ;;  %10792 = vmatpush3.bf16.msra.mxu1 %v879_v2 }
  0x28   : > { %510 = vst.msk [vmem:[#allocation2 + $0x139] sm:$0xff] %vm485_vm4, %v10177_v50  ;;  %511 = vst.msk [vmem:[#allocation2 + $0x141] sm:$0xff] %vm485_vm4, %v10178_v51  ;;  %v573_v14 = vld [vmem:[#allocation2 + $0x49] sm:$0xff]  ;;  %v574_v15 = vld [vmem:[#allocation2 + $0x51] sm:$0xff]  ;;  %v12936_v16 = vpack.c.bf16 %v1341_v13, %v1340_v12  ;;  %10862 = vmatmul.mubr.msk.bf16.vlgmr.msra.gmra.mrb[0].mxu0 %vm485_vm4, %v12924_v7  ;;  %12503 = vmatprep.subr.msk.bf16.mxu1 %vm665_vm0, %v12941_v5 }
  0x29   : > { %512 = vst.msk [vmem:[#allocation2 + $0x151] sm:$0xff] %vm485_vm4, %v10181_v52  ;;  %513 = vst.msk [vmem:[#allocation2 + $0x159] sm:$0xff] %vm485_vm4, %v10182_v53  ;;  %10763 = vmatprep.mubr.msk.bf16.mxu1 %vm485_vm4, %v12929_v11  ;;  %v575_v17 = vld [vmem:[#allocation2 + $0x61] sm:$0xff]  ;;  %v576_v18 = vld [vmem:[#allocation2 + $0x69] sm:$0xff]  ;;  %10894 = vmatpush3.bf16.msra.mxu0 %v1729_v10  ;;  %v12949_v21 = vpack.c.bf16 %v574_v15, %v573_v14 }
  0x2a   : > { %514 = vst.msk [vmem:[#allocation2 + $0x169] sm:$0xff] %vm485_vm4, %v10185_v54  ;;  %515 = vst.msk [vmem:[#allocation2 + $0x171] sm:$0xff] %vm485_vm4, %v10186_v55  ;;  %10865 = vmatprep.mubr.msk.bf16.mxu0 %vm485_vm4, %v12936_v16  ;;  %v1342_v19 = vld [vmem:[#allocation2 + $0x60] sm:$0xff]  ;;  %v1343_v20 = vld [vmem:[#allocation2 + $0x68] sm:$0xff]  ;;  %12507 = vmatprep.subr.msk.bf16.mxu0 %vm665_vm0, %v9620_v6  ;;  %v12954_v22 = vpack.c.bf16 %v576_v18, %v575_v17 }
  0x2b   : > { %516 = vst.msk [vmem:[#allocation2 + $0x181] sm:$0xff] %vm485_vm4, %v10189_v56  ;;  %517 = vst.msk [vmem:[#allocation2 + $0x189] sm:$0xff] %vm485_vm4, %v10190_v57  ;;  %v12956_v23 = vpack.c.bf16 %v1343_v20, %v1342_v19  ;;  %v577_v24 = vld [vmem:[#allocation2 + $0x79] sm:$0xff]  ;;  %v578_v25 = vld [vmem:[#allocation2 + $0x81] sm:$0xff] }
  0x2c   : > { %v579_v26 = vld [vmem:[#allocation2 + $0x91] sm:$0xff]  ;;  %v580_v27 = vld [vmem:[#allocation2 + $0x99] sm:$0xff]  ;;  %v12965_v28 = vpack.c.bf16 %v578_v25, %v577_v24  ;;  %v581_v31 = vld [vmem:[#allocation2 + $0xa9] sm:$0xff]  ;;  %v2318_v24 = vsel %vm665_vm0, %v12977_v33, 0 }
  0x2d   : > { %v12967_v29 = vpack.c.bf16 %v580_v27, %v579_v26  ;;  %v582_v32 = vld [vmem:[#allocation2 + $0xb1] sm:$0xff]  ;;  %v583_v34 = vld [vmem:[#allocation2 + $0xc1] sm:$0xff]  ;;  %v584_v35 = vld [vmem:[#allocation2 + $0xc9] sm:$0xff] }
  0x2e   : > { %10764 = vmatmul.mubr.msk.bf16.gmra.mrb[4].mxu1 %vm485_vm4, %v12949_v21  ;;  %v12983_v36 = vpack.c.bf16 %v582_v32, %v581_v31  ;;  %v12987_v37 = vpack.c.bf16 %v584_v35, %v583_v34  ;;  %v585_v38 = vld [vmem:[#allocation2 + $0xd9] sm:$0xff]  ;;  %v586_v39 = vld [vmem:[#allocation2 + $0xe1] sm:$0xff]  ;;  %v587_v40 = vld [vmem:[#allocation2 + $0xf1] sm:$0xff] }
  0x2f   : > { %10767 = vmatprep.mubr.msk.bf16.mxu1 %vm485_vm4, %v12954_v22  ;;  %v588_v41 = vld [vmem:[#allocation2 + $0xf9] sm:$0xff]  ;;  %v12997_v42 = vpack.c.bf16 %v586_v39, %v585_v38  ;;  %v589_v44 = vld [vmem:[#allocation2 + $0x109] sm:$0xff]  ;;  %v590_v45 = vld [vmem:[#allocation2 + $0x111] sm:$0xff] }
  0x30   : > { %10866 = vmatmul.mubr.msk.bf16.gmra.mrb[4].mxu0 %vm485_vm4, %v12956_v23  ;;  %v12999_v43 = vpack.c.bf16 %v588_v41, %v587_v40  ;;  %v591_v46 = vld [vmem:[#allocation2 + $0x121] sm:$0xff]  ;;  %v592_v47 = vld [vmem:[#allocation2 + $0x129] sm:$0xff]  ;;  %v13009_v48 = vpack.c.bf16 %v590_v45, %v589_v44  ;;  %v593_v50 = vld [vmem:[#allocation2 + $0x139] sm:$0xff] }
  0x31   : > { %10895 = vmatprep.mubr.msk.bf16.mxu0 %vm485_vm4, %v600_v61  ;;  %v13011_v49 = vpack.c.bf16 %v592_v47, %v591_v46  ;;  %v594_v51 = vld [vmem:[#allocation2 + $0x141] sm:$0xff]  ;;  %v595_v52 = vld [vmem:[#allocation2 + $0x151] sm:$0xff]  ;;  %v596_v53 = vld [vmem:[#allocation2 + $0x159] sm:$0xff] }
  0x32   : > { %v13021_v54 = vpack.c.bf16 %v594_v51, %v593_v50  ;;  %v13023_v55 = vpack.c.bf16 %v596_v53, %v595_v52  ;;  %v597_v56 = vld [vmem:[#allocation2 + $0x169] sm:$0xff]  ;;  %v598_v57 = vld [vmem:[#allocation2 + $0x171] sm:$0xff]  ;;  %v518_v58 = vld [vmem:[#allocation2] sm:$0xff] }
  0x33   : > { %v519_v59 = vld [vmem:[#allocation2 + $0x8] sm:$0xff]  ;;  %v13033_v60 = vpack.c.bf16 %v598_v57, %v597_v56  ;;  %v1924_v2 = vld [vmem:[#allocation2 + $0x1a] sm:$0xff]  ;;  %v1926_v6 = vld [vmem:[#allocation2 + $0x32] sm:$0xff] }
  0x34   : > { %v550_v61 = vpack.c.bf16 %v519_v59, %v518_v58  ;;  %v1660_v63 = vld [vmem:[#allocation2 + $0x181] sm:$0xff]  ;;  %v1661_v0 = vld [vmem:[#allocation2 + $0x189] sm:$0xff]  ;;  %v528_v10 = vld [vmem:[#allocation2 + $0x78] sm:$0xff] }
  0x35   : > { %v1925_v8 = vld [vmem:[#allocation2 + $0x22] sm:$0xff]  ;;  %v13054_v9 = vpack.c.bf16 %v1661_v0, %v1660_v63  ;;  %v531_v13 = vld [vmem:[#allocation2 + $0x98] sm:$0xff]  ;;  %v1928_v5 = vld [vmem:[#allocation2 + $0x4a] sm:$0xff] }
  0x36   : > { %10768 = vmatmul.mubr.msk.bf16.gmra.mrb[8].mxu1 %vm485_vm4, %v12965_v28  ;;  %v529_v12 = vld [vmem:[#allocation2 + $0x80] sm:$0xff]  ;;  %v1929_v17 = vld [vmem:[#allocation2 + $0x52] sm:$0xff]  ;;  %v532_v25 = vld [vmem:[#allocation2 + $0xa8] sm:$0xff] }
  0x37   : > { %10771 = vmatprep.mubr.msk.bf16.mxu1 %vm485_vm4, %v12967_v29  ;;  %v1927_v14 = vld [vmem:[#allocation2 + $0x3a] sm:$0xff]  ;;  %v13066_v15 = vpack.c.bf16 %v529_v12, %v528_v10  ;;  %v13072_v20 = vpack.c.bf16 %v1929_v17, %v1928_v5  ;;  %v533_v26 = vld [vmem:[#allocation2 + $0xb0] sm:$0xff]  ;;  %v13083_v27 = vld [vmem:[%s14582_s1 + $0xe] sm:$0x3] }
  0x38   : > { %10896 = vmatmul.mubr.msk.bf16.vlgmr.msra.gmra.mrb[0].mxu0 %vm485_vm4, %v12929_v11  ;;  %v13070_v19 = vpack.c.bf16 %v1927_v14, %v1926_v6  ;;  %v535_v31 = vld [vmem:[#allocation2 + $0xc8] sm:$0xff]  ;;  %v13089_v34 = vpack.c.bf16 %v533_v26, %v532_v25  ;;  %v1932_v35 = vld [vmem:[#allocation2 + $0x7a] sm:$0xff]  ;;  %v538_v46 = vld [vmem:[#allocation2 + $0xf0] sm:$0xff] }
  0x39   : > { %10928 = vmatpush3.bf16.msra.mxu0 %v2023_v30  ;;  %10899 = vmatprep.mubr.msk.bf16.mxu0 %vm485_vm4, %v12949_v21  ;;  %v534_v30 = vld [vmem:[#allocation2 + $0xc0] sm:$0xff]  ;;  %v536_v44 = vld [vmem:[#allocation2 + $0xd8] sm:$0xff]  ;;  %v1936_v53 = vld [vmem:[#allocation2 + $0xaa] sm:$0xff] }
  0x3a   : > { %12508 = vmatprep.subr.msk.bf16.mxu0 %vm665_vm0, %v12977_v33  ;;  %v1930_v32 = vld [vmem:[#allocation2 + $0x62] sm:$0xff]  ;;  %v1931_v33 = vld [vmem:[#allocation2 + $0x6a] sm:$0xff]  ;;  %v13093_v39 = vpack.c.bf16 %v535_v31, %v534_v30  ;;  %v539_v47 = vld [vmem:[#allocation2 + $0xf8] sm:$0xff] }
  0x3b   : > { %v1933_v38 = vld [vmem:[#allocation2 + $0x82] sm:$0xff]  ;;  %v13095_v40 = vpack.c.bf16 %v1931_v33, %v1930_v32  ;;  %v1934_v50 = vld [vmem:[#allocation2 + $0x92] sm:$0xff]  ;;  %v1935_v51 = vld [vmem:[#allocation2 + $0x9a] sm:$0xff]  ;;  %v13109_v57 = vpack.c.bf16 %v539_v47, %v538_v46 }
  0x3c   : > { %v13097_v41 = vpack.c.bf16 %v1933_v38, %v1932_v35  ;;  %v537_v45 = vld [vmem:[#allocation2 + $0xe0] sm:$0xff]  ;;  %v1937_v56 = vld [vmem:[#allocation2 + $0xb2] sm:$0xff]  ;;  %v13111_v58 = vpack.c.bf16 %v1935_v51, %v1934_v50  ;;  %v543_v0 = vld [vmem:[#allocation2 + $0x128] sm:$0xff] }
  0x3d   : > { %v13107_v52 = vpack.c.bf16 %v537_v45, %v536_v44  ;;  %v13113_v59 = vpack.c.bf16 %v1937_v56, %v1936_v53  ;;  %v542_v63 = vld [vmem:[#allocation2 + $0x120] sm:$0xff]  ;;  %v544_v5 = vld [vmem:[#allocation2 + $0x138] sm:$0xff]  ;;  %v1944_v32 = vld [vmem:[#allocation2 + $0x10a] sm:$0xff] }
  0x3e   : > { %10772 = vmatmul.mubr.msk.bf16.gmra.mrb[12].mxu1 %vm485_vm4, %v12983_v36  ;;  %v1940_v12 = vld [vmem:[#allocation2 + $0xda] sm:$0xff]  ;;  %v1942_v26 = vld [vmem:[#allocation2 + $0xf2] sm:$0xff]  ;;  %v548_v45 = vld [vmem:[#allocation2 + $0x168] sm:$0xff] }
  0x3f   : > { %10775 = vmatprep.mubr.msk.bf16.mxu1 %vm485_vm4, %v12987_v37  ;;  %v545_v17 = vld [vmem:[#allocation2 + $0x140] sm:$0xff]  ;;  %v547_v25 = vld [vmem:[#allocation2 + $0x158] sm:$0xff]  ;;  %v549_v46 = vld [vmem:[#allocation2 + $0x170] sm:$0xff] }
  0x40   : > { %10900 = vmatmul.mubr.msk.bf16.gmra.mrb[4].mxu0 %vm485_vm4, %v12954_v22  ;;  %v1943_v30 = vld [vmem:[#allocation2 + $0xfa] sm:$0xff]  ;;  %v13139_v31 = vpack.c.bf16 %v545_v17, %v544_v5  ;;  %v1945_v33 = vld [vmem:[#allocation2 + $0x112] sm:$0xff]  ;;  %v1042_v47 = vld [vmem:[#allocation2 + $0x2] sm:$0xff]  ;;  %v13155_v56 = vpack.c.bf16 %v549_v46, %v548_v45 }
  0x41   : > { %10903 = vmatprep.mubr.msk.bf16.mxu0 %vm485_vm4, %v12965_v28  ;;  %v13143_v38 = vpack.c.bf16 %v1943_v30, %v1942_v26  ;;  %v13145_v44 = vpack.c.bf16 %v1945_v33, %v1944_v32  ;;  %v1043_v50 = vld [vmem:[#allocation2 + $0xa] sm:$0xff]  ;;  %v1946_v51 = vld [vmem:[#allocation2 + $0x122] sm:$0xff]  ;;  %v1953_v5 = vld [vmem:[#allocation2 + $0x172] sm:$0xff] }
  0x42   : > { %v1947_v53 = vld [vmem:[#allocation2 + $0x12a] sm:$0xff] }
  0x43   : > { %v1955_v26 = vld [vmem:[#allocation2 + $0x18a] sm:$0xff] }
  0x46   : > { %10776 = vmatmul.mubr.msk.bf16.gmra.mrb[16].mxu1 %vm485_vm4, %v12997_v42 }
  0x47   : > { %10779 = vmatprep.mubr.msk.bf16.mxu1 %vm485_vm4, %v12999_v43 }
  0x48   : > { %10904 = vmatmul.mubr.msk.bf16.gmra.mrb[8].mxu0 %vm485_vm4, %v12967_v29 }
  0x49   : > { %10907 = vmatprep.mubr.msk.bf16.mxu0 %vm485_vm4, %v12983_v36 }
  0x4e   : > { %10780 = vmatmul.mubr.msk.bf16.gmra.mrb[20].mxu1 %vm485_vm4, %v13009_v48 }
  0x4f   : > { %10783 = vmatprep.mubr.msk.bf16.mxu1 %vm485_vm4, %v13011_v49 }
  0x50   : > { %10908 = vmatmul.mubr.msk.bf16.gmra.mrb[12].mxu0 %vm485_vm4, %v12987_v37 }
  0x51   : > { %10911 = vmatprep.mubr.msk.bf16.mxu0 %vm485_vm4, %v12997_v42 }
  0x56   : > { %10784 = vmatmul.mubr.msk.bf16.gmra.mrb[24].mxu1 %vm485_vm4, %v13021_v54 }
  0x57   : > { %10787 = vmatprep.mubr.msk.bf16.mxu1 %vm485_vm4, %v13023_v55 }
  0x58   : > { %10912 = vmatmul.mubr.msk.bf16.gmra.mrb[16].mxu0 %vm485_vm4, %v12999_v43 }
  0x59   : > { %10915 = vmatprep.mubr.msk.bf16.mxu0 %vm485_vm4, %v13009_v48 }
  0x5e   : > { %10788 = vmatmul.mubr.msk.bf16.gmra.mrb[28].mxu1 %vm485_vm4, %v13033_v60 }
  0x5f   : > { %10793 = vmatprep.mubr.msk.bf16.mxu1 %vm485_vm4, %v550_v61  ;;  %v540_v61 = vld [vmem:[#allocation2 + $0x108] sm:$0xff] }
  0x60   : > { %10916 = vmatmul.mubr.msk.bf16.gmra.mrb[20].mxu0 %vm485_vm4, %v13011_v49 }
  0x61   : > { %10919 = vmatprep.mubr.msk.bf16.mxu0 %vm485_vm4, %v13021_v54 }
  0x66   : > { %10794 = vmatmul.mubr.msk.bf16.vlgmr.msra.gmra.mrb[0].mxu1 %vm485_vm4, %v12922_v4  ;;  %v13056_v4 = vpack.c.bf16 %v1925_v8, %v1924_v2  ;;  %v1938_v2 = vld [vmem:[#allocation2 + $0xc2] sm:$0xff]  ;;  %v1939_v8 = vld [vmem:[#allocation2 + $0xca] sm:$0xff] }
  0x67   : > { %10797 = vmatprep.mubr.msk.bf16.mxu1 %vm485_vm4, %v12924_v7  ;;  %10826 = vmatpush3.bf16.msra.mxu1 %v1141_v62  ;;  %v541_v62 = vld [vmem:[#allocation2 + $0x110] sm:$0xff]  ;;  %v13127_v6 = vpack.c.bf16 %v1939_v8, %v1938_v2 }
  0x68   : > { %10920 = vmatmul.mubr.msk.bf16.gmra.mrb[24].mxu0 %vm485_vm4, %v13023_v55  ;;  %12505 = vmatprep.subr.msk.bf16.mxu1 %vm665_vm0, %v12796_v1  ;;  %v530_v1 = vld [vmem:[#allocation2 + $0x90] sm:$0xff]  ;;  %v13123_v10 = vpack.c.bf16 %v541_v62, %v540_v61  ;;  %v1948_v61 = vld [vmem:[#allocation2 + $0x13a] sm:$0xff]  ;;  %v1949_v62 = vld [vmem:[#allocation2 + $0x142] sm:$0xff] }
  0x69   : > { %10923 = vmatprep.mubr.msk.bf16.mxu0 %vm485_vm4, %v13033_v60  ;;  %v13068_v18 = vpack.c.bf16 %v531_v13, %v530_v1  ;;  %v1941_v1 = vld [vmem:[#allocation2 + $0xe2] sm:$0xff]  ;;  %v13125_v13 = vpack.c.bf16 %v543_v0, %v542_v63  ;;  %v1074_v63 = vpack.c.bf16 %v1043_v50, %v1042_v47  ;;  %v13157_v0 = vpack.c.bf16 %v1947_v53, %v1946_v51  ;;  %v1950_v8 = vld [vmem:[#allocation2 + $0x152] sm:$0xff] }
  0x6a   : > { %v13129_v14 = vpack.c.bf16 %v1941_v1, %v1940_v12  ;;  %v13159_v2 = vpack.c.bf16 %v1949_v62, %v1948_v61  ;;  %v1951_v12 = vld [vmem:[#allocation2 + $0x15a] sm:$0xff]  ;;  %v1952_v1 = vld [vmem:[#allocation2 + $0x16a] sm:$0xff] }
  0x6b   : > { %v13168_v17 = vpack.c.bf16 %v1951_v12, %v1950_v8 }
  0x6e   : > { %10798 = vmatmul.mubr.msk.bf16.gmra.mrb[4].mxu1 %vm485_vm4, %v12936_v16 }
  0x6f   : > { %10801 = vmatprep.mubr.msk.bf16.mxu1 %vm485_vm4, %v12956_v23 }
  0x70   : > { %10924 = vmatmul.mubr.msk.bf16.gmra.mrb[28].mxu0 %vm485_vm4, %v13054_v9 }
  0x71   : > { %10929 = vmatprep.mubr.msk.bf16.mxu0 %vm485_vm4, %v13056_v4 }
  0x76   : > { %10802 = vmatmul.mubr.msk.bf16.gmra.mrb[8].mxu1 %vm485_vm4, %v13066_v15 }
  0x77   : > { %10805 = vmatprep.mubr.msk.bf16.mxu1 %vm485_vm4, %v13068_v18 }
  0x78   : > { %10930 = vmatmul.mubr.msk.bf16.vlgmr.msra.gmra.mrb[0].mxu0 %vm485_vm4, %v13070_v19 }
  0x79   : > { %10962 = vmatpush3.bf16.msra.mxu0 %v2318_v24  ;;  %10933 = vmatprep.mubr.msk.bf16.mxu0 %vm485_vm4, %v13072_v20  ;;  %v546_v24 = vld [vmem:[#allocation2 + $0x150] sm:$0xff] }
  0x7a   : > { %12509 = vmatprep.subr.msk.bf16.mxu0 %vm665_vm0, %v13083_v27  ;;  %v13141_v35 = vpack.c.bf16 %v547_v25, %v546_v24  ;;  %v13170_v24 = vpack.c.bf16 %v1953_v5, %v1952_v1  ;;  %v1954_v25 = vld [vmem:[#allocation2 + $0x182] sm:$0xff] }
  0x7b   : > { %v13181_v30 = vpack.c.bf16 %v1955_v26, %v1954_v25 }
  0x7e   : > { %10806 = vmatmul.mubr.msk.bf16.gmra.mrb[12].mxu1 %vm485_vm4, %v13089_v34 }
  0x7f   : > { %10809 = vmatprep.mubr.msk.bf16.mxu1 %vm485_vm4, %v13093_v39 }
  0x80   : > { %10934 = vmatmul.mubr.msk.bf16.gmra.mrb[4].mxu0 %vm485_vm4, %v13095_v40 }
  0x81   : > { %10937 = vmatprep.mubr.msk.bf16.mxu0 %vm485_vm4, %v13097_v41 }
  0x86   : > { %10810 = vmatmul.mubr.msk.bf16.gmra.mrb[16].mxu1 %vm485_vm4, %v13107_v52 }
  0x87   : > { %10813 = vmatprep.mubr.msk.bf16.mxu1 %vm485_vm4, %v13109_v57 }
  0x88   : > { %10938 = vmatmul.mubr.msk.bf16.gmra.mrb[8].mxu0 %vm485_vm4, %v13111_v58 }
  0x89   : > { %10941 = vmatprep.mubr.msk.bf16.mxu0 %vm485_vm4, %v13113_v59 }
  0x8e   : > { %10814 = vmatmul.mubr.msk.bf16.gmra.mrb[20].mxu1 %vm485_vm4, %v13123_v10 }
  0x8f   : > { %10817 = vmatprep.mubr.msk.bf16.mxu1 %vm485_vm4, %v13125_v13 }
  0x90   : > { %10942 = vmatmul.mubr.msk.bf16.gmra.mrb[12].mxu0 %vm485_vm4, %v13127_v6 }
  0x91   : > { %10945 = vmatprep.mubr.msk.bf16.mxu0 %vm485_vm4, %v13129_v14 }
  0x96   : > { %10818 = vmatmul.mubr.msk.bf16.gmra.mrb[24].mxu1 %vm485_vm4, %v13139_v31 }
  0x97   : > { %10821 = vmatprep.mubr.msk.bf16.mxu1 %vm485_vm4, %v13141_v35 }
  0x98   : > { %10946 = vmatmul.mubr.msk.bf16.gmra.mrb[16].mxu0 %vm485_vm4, %v13143_v38 }
  0x99   : > { %10949 = vmatprep.mubr.msk.bf16.mxu0 %vm485_vm4, %v13145_v44 }
  0x9e   : > { %10822 = vmatmul.mubr.msk.bf16.gmra.mrb[28].mxu1 %vm485_vm4, %v13155_v56 }
  0x9f   : > { %10827 = vmatprep.mubr.msk.bf16.mxu1 %vm485_vm4, %v1074_v63 }
  0xa0   : > { %10950 = vmatmul.mubr.msk.bf16.gmra.mrb[20].mxu0 %vm485_vm4, %v13157_v0 }
  0xa1   : > { %10953 = vmatprep.mubr.msk.bf16.mxu0 %vm485_vm4, %v13159_v2 }
  0xa6   : > { %10828 = vmatmul.mubr.msk.bf16.vlgmr.msra.gmra.mrb[0].mxu1 %vm485_vm4, %v13056_v4  ;;  %v9671_v4 = vld [vmem:[%s14582_s1 + $0x10] sm:$0x3] }
  0xa7   : > { %10831 = vmatprep.mubr.msk.bf16.mxu1 %vm485_vm4, %v13070_v19  ;;  %11732 = vmatpush3.bf16.msra.mxu1 %v12804_v3  ;;  %v2612_v3 = vsel %vm665_vm0, %v13083_v27, 0  ;;  %v2250_v27 = vld [vmem:[#allocation2 + $0x1a0] sm:$0xff] }
  0xa8   : > { %10954 = vmatmul.mubr.msk.bf16.gmra.mrb[24].mxu0 %vm485_vm4, %v13168_v17 }
  0xa9   : > { %10957 = vmatprep.mubr.msk.bf16.mxu0 %vm485_vm4, %v13170_v24 }
  0xae   : > { %10832 = vmatmul.mubr.msk.bf16.gmra.mrb[4].mxu1 %vm485_vm4, %v13072_v20 }
  0xaf   : > { %10835 = vmatprep.mubr.msk.bf16.mxu1 %vm485_vm4, %v13095_v40 }
  0xb0   : > { %10958 = vmatmul.mubr.msk.bf16.gmra.mrb[28].mxu0 %vm485_vm4, %v13181_v30 }
  0xb1   : > { %10963 = vmatprep.mubr.msk.bf16.mxu0 %vm485_vm4, %v12924_v7  ;;  %v2247_v7 = vld [vmem:[#allocation2 + $0x180] sm:$0xff] }
  0xb6   : > { %10836 = vmatmul.mubr.msk.bf16.gmra.mrb[8].mxu1 %vm485_vm4, %v13097_v41 }
  0xb7   : > { %10839 = vmatprep.mubr.msk.bf16.mxu1 %vm485_vm4, %v13111_v58 }
  0xb8   : > { %10964 = vmatmul.mubr.msk.bf16.vlgmr.msra.gmra.mrb[0].mxu0 %vm485_vm4, %v12936_v16  ;;  %v2248_v16 = vld [vmem:[#allocation2 + $0x188] sm:$0xff] }
  0xb9   : > { %10996 = vmatpush3.bf16.msra.mxu0 %v2612_v3  ;;  %10967 = vmatprep.mubr.msk.bf16.mxu0 %vm485_vm4, %v12956_v23  ;;  %v2265_v23 = vpack.c.bf16 %v2248_v16, %v2247_v7 }
  0xba   : > { %12510 = vmatprep.subr.msk.bf16.mxu0 %vm665_vm0, %v9671_v4 }
  0xbe   : > { %10840 = vmatmul.mubr.msk.bf16.gmra.mrb[12].mxu1 %vm485_vm4, %v13113_v59 }
  0xbf   : > { %10843 = vmatprep.mubr.msk.bf16.mxu1 %vm485_vm4, %v13127_v6 }
  0xc0   : > { %10968 = vmatmul.mubr.msk.bf16.gmra.mrb[4].mxu0 %vm485_vm4, %v13066_v15 }
  0xc1   : > { %10971 = vmatprep.mubr.msk.bf16.mxu0 %vm485_vm4, %v13068_v18 }
  0xc6   : > { %10844 = vmatmul.mubr.msk.bf16.gmra.mrb[16].mxu1 %vm485_vm4, %v13129_v14 }
  0xc7   : > { %10847 = vmatprep.mubr.msk.bf16.mxu1 %vm485_vm4, %v13143_v38 }
  0xc8   : > { %10972 = vmatmul.mubr.msk.bf16.gmra.mrb[8].mxu0 %vm485_vm4, %v13089_v34 }
  0xc9   : > { %10975 = vmatprep.mubr.msk.bf16.mxu0 %vm485_vm4, %v13093_v39 }
  0xce   : > { %10848 = vmatmul.mubr.msk.bf16.gmra.mrb[20].mxu1 %vm485_vm4, %v13145_v44 }
  0xcf   : > { %10851 = vmatprep.mubr.msk.bf16.mxu1 %vm485_vm4, %v13157_v0 }
  0xd0   : > { %10976 = vmatmul.mubr.msk.bf16.gmra.mrb[12].mxu0 %vm485_vm4, %v13107_v52 }
  0xd1   : > { %10979 = vmatprep.mubr.msk.bf16.mxu0 %vm485_vm4, %v13109_v57 }
  0xd6   : > { %10852 = vmatmul.mubr.msk.bf16.gmra.mrb[24].mxu1 %vm485_vm4, %v13159_v2 }
  0xd7   : > { %10855 = vmatprep.mubr.msk.bf16.mxu1 %vm485_vm4, %v13168_v17 }
  0xd8   : > { %10980 = vmatmul.mubr.msk.bf16.gmra.mrb[16].mxu0 %vm485_vm4, %v13123_v10 }
  0xd9   : > { %10983 = vmatprep.mubr.msk.bf16.mxu0 %vm485_vm4, %v13125_v13 }
  0xde   : > { %10856 = vmatmul.mubr.msk.bf16.gmra.mrb[28].mxu1 %vm485_vm4, %v13170_v24 }
  0xdf   : > { %10869 = vmatprep.mubr.msk.bf16.mxu1 %vm485_vm4, %v13066_v15  ;;  %v2249_v15 = vld [vmem:[#allocation2 + $0x198] sm:$0xff] }
  0xe0   : > { %10984 = vmatmul.mubr.msk.bf16.gmra.mrb[20].mxu0 %vm485_vm4, %v13139_v31  ;;  %v2266_v32 = vpack.c.bf16 %v2250_v27, %v2249_v15 }
  0xe1   : > { %10987 = vmatprep.mubr.msk.bf16.mxu0 %vm485_vm4, %v13141_v35 }
  0xe6   : > { %10870 = vmatmul.mubr.msk.bf16.vlgmr.msra.gmra.mrb[8].mxu1 %vm485_vm4, %v13068_v18  ;;  %v2906_v18 = vsel %vm665_vm0, %v9671_v4, 0 }
  0xe7   : > { %10873 = vmatprep.mubr.msk.bf16.mxu1 %vm485_vm4, %v13089_v34  ;;  %v3257_v34 = vld [vmem:[#allocation2 + $0x9] sm:$0xff] }
  0xe8   : > { %10988 = vmatmul.mubr.msk.bf16.gmra.mrb[24].mxu0 %vm485_vm4, %v13155_v56 }
  0xe9   : > { %10991 = vmatprep.mubr.msk.bf16.mxu0 %vm485_vm4, %v2265_v23 }
  0xee   : > { %10874 = vmatmul.mubr.msk.bf16.gmra.mrb[12].mxu1 %vm485_vm4, %v13093_v39 }
  0xef   : > { %10877 = vmatprep.mubr.msk.bf16.mxu1 %vm485_vm4, %v13107_v52 }
  0xf0   : > { %10992 = vmatmul.mubr.msk.bf16.gmra.mrb[28].mxu0 %vm485_vm4, %v2266_v32 }
  0xf1   : > { %10997 = vmatprep.mubr.msk.bf16.mxu0 %vm485_vm4, %v12929_v11  ;;  %v2543_v11 = vld [vmem:[#allocation2 + $0x199] sm:$0xff] }
  0xf6   : > { %10878 = vmatmul.mubr.msk.bf16.gmra.mrb[16].mxu1 %vm485_vm4, %v13109_v57 }
  0xf7   : > { %10881 = vmatprep.mubr.msk.bf16.mxu1 %vm485_vm4, %v13123_v10 }
  0xf8   : > { %10998 = vmatmul.mubr.msk.bf16.vlgmr.msra.gmra.mrb[0].mxu0 %vm485_vm4, %v12949_v21  ;;  %v2544_v21 = vld [vmem:[#allocation2 + $0x1a1] sm:$0xff] }
  0xf9   : > { %11030 = vmatpush3.bf16.msra.mxu0 %v2906_v18  ;;  %11001 = vmatprep.mubr.msk.bf16.mxu0 %vm485_vm4, %v12954_v22  ;;  %v2560_v22 = vpack.c.bf16 %v2544_v21, %v2543_v11 }
  0xfe   : > { %10882 = vmatmul.mubr.msk.bf16.gmra.mrb[20].mxu1 %vm485_vm4, %v13125_v13 }
  0xff   : > { %10885 = vmatprep.mubr.msk.bf16.mxu1 %vm485_vm4, %v13139_v31 }
 0x100   : > { %11002 = vmatmul.mubr.msk.bf16.gmra.mrb[4].mxu0 %vm485_vm4, %v12965_v28  ;;  %v12520_v28 = vld [vmem:[%s14583_s2 + $0x10] sm:$0xff]  }
 0x101   : > { %11005 = vmatprep.mubr.msk.bf16.mxu0 %vm485_vm4, %v12967_v29  ;;  %v12521_v29 = vld [vmem:[%s14583_s2 + $0x18] sm:$0xff]   ;;  %11063 = vmatprep.subr.bf16.mxu1 %v12520_v28 }
 0x102   : > { %11064 = vmatpush3.bf16.msra.mxu1 %v12520_v28 }
 0x103   : > { %11065 = vmatprep.subr.bf16.mxu1 %v12521_v29 }
 0x106   : > { %10886 = vmatmul.mubr.msk.bf16.gmra.mrb[24].mxu1 %vm485_vm4, %v13141_v35 }
 0x107   : > { %10889 = vmatprep.mubr.msk.bf16.mxu1 %vm485_vm4, %v13155_v56  ;;  %11066 = vmatpush3.bf16.msra.mxu1 %v12521_v29 }
 0x108   : > { %11006 = vmatmul.mubr.msk.bf16.gmra.mrb[8].mxu0 %vm485_vm4, %v12983_v36  ;;  %v2837_v36 = vld [vmem:[#allocation2 + $0x19a] sm:$0xff] }
 0x109   : > { %11009 = vmatprep.mubr.msk.bf16.mxu0 %vm485_vm4, %v12987_v37  ;;  %v2838_v37 = vld [vmem:[#allocation2 + $0x1a2] sm:$0xff] }
 0x10e   : > { %10890 = vmatmul.mubr.msk.bf16.gmra.mrb[28].mxu1 %vm485_vm4, %v2265_v23 }
 0x110   : > { %11010 = vmatmul.mubr.msk.bf16.gmra.mrb[12].mxu0 %vm485_vm4, %v12997_v42  ;;  %v2854_v42 = vpack.c.bf16 %v2838_v37, %v2837_v36 }
 0x111   : > { %11013 = vmatprep.mubr.msk.bf16.mxu0 %vm485_vm4, %v12999_v43 }
 0x118   : > { %11014 = vmatmul.mubr.msk.bf16.gmra.mrb[16].mxu0 %vm485_vm4, %v13009_v48 }
 0x119   : > { %11017 = vmatprep.mubr.msk.bf16.mxu0 %vm485_vm4, %v13011_v49 }
 0x120   : > { %11018 = vmatmul.mubr.msk.bf16.gmra.mrb[20].mxu0 %vm485_vm4, %v13021_v54 }
 0x121   : > { %11021 = vmatprep.mubr.msk.bf16.mxu0 %vm485_vm4, %v13023_v55 }
 0x128   : > { %11022 = vmatmul.mubr.msk.bf16.gmra.mrb[24].mxu0 %vm485_vm4, %v13033_v60 }
 0x129   : > { %11025 = vmatprep.mubr.msk.bf16.mxu0 %vm485_vm4, %v13054_v9 }
 0x130   : > { %11026 = vmatmul.mubr.msk.bf16.gmra.mrb[28].mxu0 %vm485_vm4, %v2560_v22 }
 0x131   : > { %11031 = vmatprep.mubr.msk.bf16.mxu0 %vm485_vm4, %v13070_v19 }
 0x138   : > { %11032 = vmatmul.mubr.msk.bf16.vlgmr.msra.gmra.mrb[0].mxu0 %vm485_vm4, %v13072_v20  ;;  %v3256_v20 = vld [vmem:[#allocation2 + $0x1] sm:$0xff] }
 0x139   : > { %11035 = vmatprep.mubr.msk.bf16.mxu0 %vm485_vm4, %v13095_v40  ;;  %v3288_v39 = vpack.c.bf16 %v3257_v34, %v3256_v20  ;;  %v13343_v40 = vld [vmem:[%s14583_s2] sm:$0xff]  }
 0x13a   : > { %11099 = vmatprep.subr.bf16.mxu1 %v13343_v40 }
 0x13b   : > { %11067 = vmatprep.mubr.msk.bf16.mxu1 %vm374_vm1, %v3288_v39 }
 0x140   : > { %11036 = vmatmul.mubr.msk.bf16.gmra.mrb[4].mxu0 %vm485_vm4, %v13097_v41 }
 0x141   : > { %11039 = vmatprep.mubr.msk.bf16.mxu0 %vm485_vm4, %v13111_v58 }
 0x148   : > { %11040 = vmatmul.mubr.msk.bf16.gmra.mrb[8].mxu0 %vm485_vm4, %v13113_v59 }
 0x149   : > { %11043 = vmatprep.mubr.msk.bf16.mxu0 %vm485_vm4, %v13127_v6 }
 0x150   : > { %11044 = vmatmul.mubr.msk.bf16.gmra.mrb[12].mxu0 %vm485_vm4, %v13129_v14 }
 0x151   : > { %11047 = vmatprep.mubr.msk.bf16.mxu0 %vm485_vm4, %v13143_v38 }
 0x158   : > { %11048 = vmatmul.mubr.msk.bf16.gmra.mrb[16].mxu0 %vm485_vm4, %v13145_v44 }
 0x159   : > { %11051 = vmatprep.mubr.msk.bf16.mxu0 %vm485_vm4, %v13157_v0 }
 0x160   : > { %11052 = vmatmul.mubr.msk.bf16.gmra.mrb[20].mxu0 %vm485_vm4, %v13159_v2  ;;  %v13397_v2 = vld [vmem:[%s14584_s3] ss:$0 sm:$0xff] }
 0x161   : > { %11055 = vmatprep.mubr.msk.bf16.mxu0 %vm485_vm4, %v13168_v17 }
 0x168   : > { %11056 = vmatmul.mubr.msk.bf16.gmra.mrb[24].mxu0 %vm485_vm4, %v13170_v24 }
 0x169   : > { %11059 = vmatprep.mubr.msk.bf16.mxu0 %vm485_vm4, %v13181_v30 }
 0x170   : > { %11060 = vmatmul.mubr.msk.bf16.gmra.mrb[28].mxu0 %vm485_vm4, %v2854_v42 }
 0x179   : > { %v10829_v43 = vpop.f32.mrb[0].mxu1 }
 0x17a   : > { %v1177_v48 = vpop.f32.mrb[1].mxu1 }
 0x17b   : > { %v10830_v49 = vpop.f32.mrb[2].mxu1 }
 0x17c   : > { %v1180_v54 = vpop.f32.mrb[3].mxu1 }
 0x181   : > { %v10833_v55 = vpop.f32.mrb[4].mxu1 }
 0x182   : > { %v1193_v60 = vpop.f32.mrb[5].mxu1 }
 0x183   : > { %v10834_v9 = vpop.f32.mrb[6].mxu1 }
 0x184   : > { %v1196_v19 = vpop.f32.mrb[7].mxu1 }
 0x1b9   : > { %v13346_v41 = vpop.f32.mrb[8].mxu1 }
 0x1ba   : > { %v13348_v52 = vpop.f32.mrb[9].mxu1 }
 0x1bb   : > { %v13350_v57 = vpop.f32.mrb[10].mxu1 }
 0x1bc   : > { %v13352_v58 = vpop.f32.mrb[11].mxu1 }
 0x1c1   : > { %v13354_v59 = vpop.f32.mrb[12].mxu1 }
 0x1c2   : > { %v13356_v10 = vpop.f32.mrb[13].mxu1 }
 0x1c3   : > { %v13358_v13 = vpop.f32.mrb[14].mxu1 }
 0x1c4   : > { %v13360_v6 = vpop.f32.mrb[15].mxu1 }
 0x1c9   : > { %v13362_v14 = vpop.f32.mrb[16].mxu1 }
 0x1ca   : > { %v13364_v31 = vpop.f32.mrb[17].mxu1 }
 0x1cb   : > { %v13366_v33 = vpop.f32.mrb[18].mxu1 }
 0x1cc   : > { %v13368_v35 = vpop.f32.mrb[19].mxu1 }
 0x1d1   : > { %v13370_v38 = vpop.f32.mrb[20].mxu1 }
 0x1d2   : > { %v13372_v44 = vpop.f32.mrb[21].mxu1 }
 0x1d3   : > { %v13374_v45 = vpop.f32.mrb[22].mxu1 }
 0x1d4   : > { %v13376_v46 = vpop.f32.mrb[23].mxu1 }
 0x1d9   : > { %v13378_v47 = vpop.f32.mrb[24].mxu1 }
 0x1da   : > { %v13380_v50 = vpop.f32.mrb[25].mxu1 }
 0x1db   : > { %v13382_v51 = vpop.f32.mrb[26].mxu1 }
 0x1dc   : > { %v13384_v53 = vpop.f32.mrb[27].mxu1 }
 0x1e1   : > { %v13386_v56 = vpop.f32.mrb[28].mxu1 }
 0x1e2   : > { %v13388_v61 = vpop.f32.mrb[29].mxu1 }
 0x1e3   : > { %v13390_v62 = vpop.f32.mrb[30].mxu1 }
 0x1e4   : > { %v13392_v63 = vpop.f32.mrb[31].mxu1 }
 0x20b   : > { %v11033_v0 = vpop.f32.mrb[0].mxu0 }
 0x20c   : > { %v11733_v8 = vadd.f32 %v11033_v0, %v10829_v43  ;;  %v2942_v12 = vpop.f32.mrb[1].mxu0 }
 0x20d   : > { %v11734_v1 = vadd.f32 %v2942_v12, %v1177_v48  ;;  %v11034_v5 = vpop.f32.mrb[2].mxu0 }
 0x20e   : > { %v3110_v17 = vadd.f32 %v11733_v8, %v13397_v2  ;;  %v11735_v24 = vadd.f32 %v11034_v5, %v10830_v49  ;;  %v2945_v25 = vpop.f32.mrb[3].mxu0  ;;  %v12523_v5 = vld [vmem:[%s14583_s2 + $0x8] sm:$0xff]  }
 0x20f   : > { %v3108_v26 = vadd.f32 %v11734_v1, %v13397_v2  ;;  %v11736_v30 = vadd.f32 %v2945_v25, %v1180_v54 }
 0x210   : > { %v3142_v3 = vmax.f32 %v3110_v17, 0.0  ;;  %v3111_v4 = vadd.f32 %v11735_v24, %v13397_v2 }
 0x211   : > { %v3140_v7 = vmax.f32 %v3108_v26, 0.0  ;;  %v3109_v16 = vadd.f32 %v11736_v30, %v13397_v2 }
 0x212   : > { %3174 = vst.msk [vmem:[#allocation2 + $0x31] sm:$0xff] %vm374_vm1, %v3142_v3  ;;  %v3143_v23 = vmax.f32 %v3111_v4, 0.0 }
 0x213   : > { %3172 = vst.msk [vmem:[#allocation2 + $0x19] sm:$0xff] %vm374_vm1, %v3140_v7  ;;  %v3141_v15 = vmax.f32 %v3109_v16, 0.0  ;;  %v11037_v27 = vpop.f32.mrb[4].mxu0  ;;  %v13438_v7 = vld [vmem:[%s14583_s2 + $0x20] sm:$0xff]  }
 0x214   : > { %3175 = vst.msk [vmem:[#allocation2 + $0x39] sm:$0xff] %vm374_vm1, %v3143_v23  ;;  %v11737_v32 = vadd.f32 %v11037_v27, %v10833_v55  ;;  %v2958_v18 = vpop.f32.mrb[5].mxu0 }
 0x215   : > { %3173 = vst.msk [vmem:[#allocation2 + $0x21] sm:$0xff] %vm374_vm1, %v3141_v15  ;;  %v11738_v11 = vadd.f32 %v2958_v18, %v1193_v60  ;;  %v11038_v21 = vpop.f32.mrb[6].mxu0 }
 0x216   : > { %v3114_v22 = vadd.f32 %v11737_v32, %v13397_v2  ;;  %v11739_v28 = vadd.f32 %v11038_v21, %v10834_v9  ;;  %v2961_v29 = vpop.f32.mrb[7].mxu0 }
 0x217   : > { %v3112_v36 = vadd.f32 %v11738_v11, %v13397_v2  ;;  %v11740_v37 = vadd.f32 %v2961_v29, %v1196_v19 }
 0x218   : > { %v3146_v42 = vmax.f32 %v3114_v22, 0.0  ;;  %v3115_v43 = vadd.f32 %v11739_v28, %v13397_v2 }
 0x219   : > { %v3144_v48 = vmax.f32 %v3112_v36, 0.0  ;;  %v3113_v49 = vadd.f32 %v11740_v37, %v13397_v2  ;;  %v3260_v1 = vld [vmem:[#allocation2 + $0x31] sm:$0xff] }
 0x21a   : > { %3178 = vst.msk [vmem:[#allocation2 + $0x61] sm:$0xff] %vm374_vm1, %v3146_v42  ;;  %v3147_v54 = vmax.f32 %v3115_v43, 0.0  ;;  %v3258_v19 = vld [vmem:[#allocation2 + $0x19] sm:$0xff] }
 0x21b   : > { %3176 = vst.msk [vmem:[#allocation2 + $0x49] sm:$0xff] %vm374_vm1, %v3144_v48  ;;  %v3145_v55 = vmax.f32 %v3113_v49, 0.0  ;;  %v11041_v60 = vpop.f32.mrb[8].mxu0  ;;  %v3261_v20 = vld [vmem:[#allocation2 + $0x39] sm:$0xff] }
 0x21c   : > { %3179 = vst.msk [vmem:[#allocation2 + $0x69] sm:$0xff] %vm374_vm1, %v3147_v54  ;;  %v11741_v9 = vadd.f32 %v11041_v60, %v13346_v41  ;;  %v2974_v34 = vpop.f32.mrb[9].mxu0  ;;  %v3259_v39 = vld [vmem:[#allocation2 + $0x21] sm:$0xff]  ;;  %v13424_v25 = vpack.c.bf16 %v3261_v20, %v3260_v1 }
 0x21d   : > { %3177 = vst.msk [vmem:[#allocation2 + $0x51] sm:$0xff] %vm374_vm1, %v3145_v55  ;;  %v11742_v0 = vadd.f32 %v2974_v34, %v13348_v52  ;;  %v11042_v8 = vpop.f32.mrb[10].mxu0  ;;  %v13417_v12 = vpack.c.bf16 %v3259_v39, %v3258_v19 }
 0x21e   : > { %v3118_v17 = vadd.f32 %v11741_v9, %v13397_v2  ;;  %v11743_v24 = vadd.f32 %v11042_v8, %v13350_v57  ;;  %v2977_v41 = vpop.f32.mrb[11].mxu0 }
 0x21f   : > { %v3116_v26 = vadd.f32 %v11742_v0, %v13397_v2  ;;  %v11744_v30 = vadd.f32 %v2977_v41, %v13352_v58  ;;  %11068 = vmatmul.mubr.msk.bf16.vlgmr.msra.gmra.mrb[32].mxu1 %vm374_vm1, %v13417_v12 }
 0x220   : > { %v3150_v52 = vmax.f32 %v3118_v17, 0.0  ;;  %v3119_v3 = vadd.f32 %v11743_v24, %v13397_v2  ;;  %11100 = vmatpush3.bf16.msra.mxu1 %v13343_v40  ;;  %11071 = vmatprep.mubr.msk.bf16.mxu1 %vm374_vm1, %v13424_v25 }
 0x221   : > { %v3148_v4 = vmax.f32 %v3116_v26, 0.0  ;;  %v3117_v57 = vadd.f32 %v11744_v30, %v13397_v2  ;;  %11101 = vmatprep.subr.bf16.mxu1 %v12523_v5  ;;  %v3264_v28 = vld [vmem:[#allocation2 + $0x61] sm:$0xff] }
 0x222   : > { %3182 = vst.msk [vmem:[#allocation2 + $0x91] sm:$0xff] %vm374_vm1, %v3150_v52  ;;  %v3151_v58 = vmax.f32 %v3119_v3, 0.0  ;;  %v3262_v32 = vld [vmem:[#allocation2 + $0x49] sm:$0xff] }
 0x223   : > { %3180 = vst.msk [vmem:[#allocation2 + $0x79] sm:$0xff] %vm374_vm1, %v3148_v4  ;;  %v3149_v16 = vmax.f32 %v3117_v57, 0.0  ;;  %v11045_v23 = vpop.f32.mrb[12].mxu0  ;;  %v3265_v40 = vld [vmem:[#allocation2 + $0x69] sm:$0xff] }
 0x224   : > { %3183 = vst.msk [vmem:[#allocation2 + $0x99] sm:$0xff] %vm374_vm1, %v3151_v58  ;;  %v11745_v15 = vadd.f32 %v11045_v23, %v13354_v59  ;;  %v2990_v27 = vpop.f32.mrb[13].mxu0  ;;  %v3263_v18 = vld [vmem:[#allocation2 + $0x51] sm:$0xff]  ;;  %11102 = vmatpush3.bf16.msra.mxu1 %v12523_v5  ;;  %v13451_v59 = vpack.c.bf16 %v3265_v40, %v3264_v28 }
 0x225   : > { %3181 = vst.msk [vmem:[#allocation2 + $0x81] sm:$0xff] %vm374_vm1, %v3149_v16  ;;  %v11746_v11 = vadd.f32 %v2990_v27, %v13356_v10  ;;  %v11046_v21 = vpop.f32.mrb[14].mxu0  ;;  %v13446_v22 = vpack.c.bf16 %v3263_v18, %v3262_v32  ;;  %11135 = vmatprep.subr.bf16.mxu1 %v13438_v7 }
 0x226   : > { %v3122_v29 = vadd.f32 %v11745_v15, %v13397_v2  ;;  %v11747_v36 = vadd.f32 %v11046_v21, %v13358_v13  ;;  %v2993_v37 = vpop.f32.mrb[15].mxu0 }
 0x227   : > { %v3120_v42 = vadd.f32 %v11746_v11, %v13397_v2  ;;  %v11748_v43 = vadd.f32 %v2993_v37, %v13360_v6  ;;  %11072 = vmatmul.mubr.msk.bf16.gmra.mrb[36].mxu1 %vm374_vm1, %v13446_v22 }
 0x228   : > { %v3154_v10 = vmax.f32 %v3122_v29, 0.0  ;;  %v3123_v48 = vadd.f32 %v11747_v36, %v13397_v2  ;;  %11075 = vmatprep.mubr.msk.bf16.mxu1 %vm374_vm1, %v13451_v59 }
 0x229   : > { %v3152_v49 = vmax.f32 %v3120_v42, 0.0  ;;  %v3121_v54 = vadd.f32 %v11748_v43, %v13397_v2  ;;  %v3268_v1 = vld [vmem:[#allocation2 + $0x91] sm:$0xff] }
 0x22a   : > { %3186 = vst.msk [vmem:[#allocation2 + $0xc1] sm:$0xff] %vm374_vm1, %v3154_v10  ;;  %v3155_v13 = vmax.f32 %v3123_v48, 0.0  ;;  %v3266_v34 = vld [vmem:[#allocation2 + $0x79] sm:$0xff] }
 0x22b   : > { %3184 = vst.msk [vmem:[#allocation2 + $0xa9] sm:$0xff] %vm374_vm1, %v3152_v49  ;;  %v3153_v55 = vmax.f32 %v3121_v54, 0.0  ;;  %v11049_v60 = vpop.f32.mrb[16].mxu0  ;;  %v3269_v6 = vld [vmem:[#allocation2 + $0x99] sm:$0xff] }
 0x22c   : > { %3187 = vst.msk [vmem:[#allocation2 + $0xc9] sm:$0xff] %vm374_vm1, %v3155_v13  ;;  %v11749_v20 = vadd.f32 %v11049_v60, %v13362_v14  ;;  %v3006_v9 = vpop.f32.mrb[17].mxu0  ;;  %v3267_v19 = vld [vmem:[#allocation2 + $0x81] sm:$0xff]  ;;  %v13471_v41 = vpack.c.bf16 %v3269_v6, %v3268_v1 }
 0x22d   : > { %3185 = vst.msk [vmem:[#allocation2 + $0xb1] sm:$0xff] %vm374_vm1, %v3153_v55  ;;  %v11750_v39 = vadd.f32 %v3006_v9, %v13364_v31  ;;  %v11050_v0 = vpop.f32.mrb[18].mxu0  ;;  %v13467_v8 = vpack.c.bf16 %v3267_v19, %v3266_v34 }
 0x22e   : > { %v3126_v5 = vadd.f32 %v11749_v20, %v13397_v2  ;;  %v11751_v17 = vadd.f32 %v11050_v0, %v13366_v33  ;;  %v3009_v24 = vpop.f32.mrb[19].mxu0 }
 0x22f   : > { %v3124_v14 = vadd.f32 %v11750_v39, %v13397_v2  ;;  %v11752_v26 = vadd.f32 %v3009_v24, %v13368_v35  ;;  %11076 = vmatmul.mubr.msk.bf16.gmra.mrb[40].mxu1 %vm374_vm1, %v13467_v8 }
 0x230   : > { %v3158_v30 = vmax.f32 %v3126_v5, 0.0  ;;  %v3127_v31 = vadd.f32 %v11751_v17, %v13397_v2  ;;  %11079 = vmatprep.mubr.msk.bf16.mxu1 %vm374_vm1, %v13471_v41 }
 0x231   : > { %v3156_v52 = vmax.f32 %v3124_v14, 0.0  ;;  %v3125_v3 = vadd.f32 %v11752_v26, %v13397_v2  ;;  %v3272_v18 = vld [vmem:[#allocation2 + $0xc1] sm:$0xff] }
 0x232   : > { %3190 = vst.msk [vmem:[#allocation2 + $0xf1] sm:$0xff] %vm374_vm1, %v3158_v30  ;;  %v3159_v33 = vmax.f32 %v3127_v31, 0.0  ;;  %v3270_v23 = vld [vmem:[#allocation2 + $0xa9] sm:$0xff] }
 0x233   : > { %3188 = vst.msk [vmem:[#allocation2 + $0xd9] sm:$0xff] %vm374_vm1, %v3156_v52  ;;  %v3157_v4 = vmax.f32 %v3125_v3, 0.0  ;;  %v11053_v57 = vpop.f32.mrb[20].mxu0  ;;  %v3273_v35 = vld [vmem:[#allocation2 + $0xc9] sm:$0xff] }
 0x234   : > { %3191 = vst.msk [vmem:[#allocation2 + $0xf9] sm:$0xff] %vm374_vm1, %v3159_v33  ;;  %v11753_v58 = vadd.f32 %v11053_v57, %v13370_v38  ;;  %v3022_v16 = vpop.f32.mrb[21].mxu0  ;;  %v3271_v40 = vld [vmem:[#allocation2 + $0xb1] sm:$0xff]  ;;  %v13491_v29 = vpack.c.bf16 %v3273_v35, %v3272_v18 }
 0x235   : > { %3189 = vst.msk [vmem:[#allocation2 + $0xe1] sm:$0xff] %vm374_vm1, %v3157_v4  ;;  %v11754_v15 = vadd.f32 %v3022_v16, %v13372_v44  ;;  %v11054_v27 = vpop.f32.mrb[22].mxu0  ;;  %v13487_v32 = vpack.c.bf16 %v3271_v40, %v3270_v23 }
 0x236   : > { %v3130_v11 = vadd.f32 %v11753_v58, %v13397_v2  ;;  %v11755_v21 = vadd.f32 %v11054_v27, %v13374_v45  ;;  %v3025_v28 = vpop.f32.mrb[23].mxu0 }
 0x237   : > { %v3128_v38 = vadd.f32 %v11754_v15, %v13397_v2  ;;  %v11756_v36 = vadd.f32 %v3025_v28, %v13376_v46  ;;  %11080 = vmatmul.mubr.msk.bf16.gmra.mrb[44].mxu1 %vm374_vm1, %v13487_v32 }
 0x238   : > { %v3162_v37 = vmax.f32 %v3130_v11, 0.0  ;;  %v3131_v44 = vadd.f32 %v11755_v21, %v13397_v2  ;;  %11083 = vmatprep.mubr.msk.bf16.mxu1 %vm374_vm1, %v13491_v29 }
 0x239   : > { %v3160_v42 = vmax.f32 %v3128_v38, 0.0  ;;  %v3129_v43 = vadd.f32 %v11756_v36, %v13397_v2  ;;  %v3276_v9 = vld [vmem:[#allocation2 + $0xf1] sm:$0xff] }
 0x23a   : > { %3194 = vst.msk [vmem:[#allocation2 + $0x121] sm:$0xff] %vm374_vm1, %v3162_v37  ;;  %v3163_v45 = vmax.f32 %v3131_v44, 0.0  ;;  %v3274_v13 = vld [vmem:[#allocation2 + $0xd9] sm:$0xff] }
 0x23b   : > { %3192 = vst.msk [vmem:[#allocation2 + $0x109] sm:$0xff] %vm374_vm1, %v3160_v42  ;;  %v3161_v10 = vmax.f32 %v3129_v43, 0.0  ;;  %v11057_v48 = vpop.f32.mrb[24].mxu0  ;;  %v3277_v46 = vld [vmem:[#allocation2 + $0xf9] sm:$0xff]  ;;  %v3205_v42 = vld [vmem:[#allocation2 + $0x8] sm:$0xff] }
 0x23c   : > { %3195 = vst.msk [vmem:[#allocation2 + $0x129] sm:$0xff] %vm374_vm1, %v3163_v45  ;;  %v11757_v49 = vadd.f32 %v11057_v48, %v13378_v47  ;;  %v3038_v54 = vpop.f32.mrb[25].mxu0  ;;  %v3275_v55 = vld [vmem:[#allocation2 + $0xe1] sm:$0xff]  ;;  %v13511_v0 = vpack.c.bf16 %v3277_v46, %v3276_v9  ;;  %v13573_v9 = vld [vmem:[%s14583_s2 + $0x30] sm:$0xff]  }
 0x23d   : > { %3193 = vst.msk [vmem:[#allocation2 + $0x111] sm:$0xff] %vm374_vm1, %v3161_v10  ;;  %v11758_v60 = vadd.f32 %v3038_v54, %v13380_v50  ;;  %v11058_v6 = vpop.f32.mrb[26].mxu0  ;;  %v13507_v20 = vpack.c.bf16 %v3275_v55, %v3274_v13  ;;  %v3207_v46 = vld [vmem:[#allocation2 + $0x20] sm:$0xff]  ;;  %v3206_v54 = vld [vmem:[#allocation2 + $0x18] sm:$0xff]  ;;  %v3208_v55 = vld [vmem:[#allocation2 + $0x30] sm:$0xff] }
 0x23e   : > { %v3134_v34 = vadd.f32 %v11757_v49, %v13397_v2  ;;  %v11759_v19 = vadd.f32 %v11058_v6, %v13382_v51  ;;  %v3041_v39 = vpop.f32.mrb[27].mxu0  ;;  %v3209_v49 = vld [vmem:[#allocation2 + $0x38] sm:$0xff]  ;;  %v13558_v13 = vpack.c.bf16 %v3207_v46, %v3206_v54  ;;  %v3754_v54 = vld [vmem:[#allocation2 + $0x22] sm:$0xff] }
 0x23f   : > { %v3132_v47 = vadd.f32 %v11758_v60, %v13397_v2  ;;  %v11760_v1 = vadd.f32 %v3041_v39, %v13384_v53  ;;  %11084 = vmatmul.mubr.msk.bf16.gmra.mrb[48].mxu1 %vm374_vm1, %v13507_v20  ;;  %v12525_v60 = vld [vmem:[%s14583_s2 + $0x28] sm:$0xff]   ;;  %v13563_v6 = vpack.c.bf16 %v3209_v49, %v3208_v55  ;;  %v3753_v49 = vld [vmem:[#allocation2 + $0x1a] sm:$0xff]  ;;  %v3755_v55 = vld [vmem:[#allocation2 + $0x32] sm:$0xff] }
 0x240   : > { %v3166_v5 = vmax.f32 %v3134_v34, 0.0  ;;  %v3135_v50 = vadd.f32 %v11759_v19, %v13397_v2  ;;  %11087 = vmatprep.mubr.msk.bf16.mxu1 %vm374_vm1, %v13511_v0  ;;  %v3211_v34 = vld [vmem:[#allocation2 + $0x50] sm:$0xff]  ;;  %v3213_v19 = vld [vmem:[#allocation2 + $0x68] sm:$0xff] }
 0x241   : > { %v3164_v17 = vmax.f32 %v3132_v47, 0.0  ;;  %v3133_v24 = vadd.f32 %v11760_v1, %v13397_v2  ;;  %v3280_v35 = vld [vmem:[#allocation2 + $0x121] sm:$0xff] }
 0x242   : > { %3198 = vst.msk [vmem:[#allocation2 + $0x151] sm:$0xff] %vm374_vm1, %v3166_v5  ;;  %v3167_v51 = vmax.f32 %v3135_v50, 0.0  ;;  %v3278_v52 = vld [vmem:[#allocation2 + $0x109] sm:$0xff]  ;;  %v3212_v1 = vld [vmem:[#allocation2 + $0x60] sm:$0xff]  ;;  %v3217_v50 = vld [vmem:[#allocation2 + $0x98] sm:$0xff] }
 0x243   : > { %3196 = vst.msk [vmem:[#allocation2 + $0x139] sm:$0xff] %vm374_vm1, %v3164_v17  ;;  %v3165_v14 = vmax.f32 %v3133_v24, 0.0  ;;  %v11061_v26 = vpop.f32.mrb[28].mxu0  ;;  %v3281_v53 = vld [vmem:[#allocation2 + $0x129] sm:$0xff]  ;;  %v13578_v5 = vpack.c.bf16 %v3213_v19, %v3212_v1  ;;  %v3214_v17 = vld [vmem:[#allocation2 + $0x78] sm:$0xff]  ;;  %v12528_v1 = vld [vmem:[%s14583_s2 + $0x40] sm:$0xff]  }
 0x244   : > { %3199 = vst.msk [vmem:[#allocation2 + $0x159] sm:$0xff] %vm374_vm1, %v3167_v51  ;;  %v11761_v30 = vadd.f32 %v11061_v26, %v13386_v56  ;;  %v3054_v31 = vpop.f32.mrb[29].mxu0  ;;  %v3279_v3 = vld [vmem:[#allocation2 + $0x111] sm:$0xff]  ;;  %v13531_v40 = vpack.c.bf16 %v3281_v53, %v3280_v35  ;;  %v3210_v39 = vld [vmem:[#allocation2 + $0x48] sm:$0xff] }
 0x245   : > { %3197 = vst.msk [vmem:[#allocation2 + $0x141] sm:$0xff] %vm374_vm1, %v3165_v14  ;;  %v11762_v33 = vadd.f32 %v3054_v31, %v13388_v61  ;;  %v11062_v4 = vpop.f32.mrb[30].mxu0  ;;  %v13527_v57 = vpack.c.bf16 %v3279_v3, %v3278_v52  ;;  %v13575_v47 = vpack.c.bf16 %v3211_v34, %v3210_v39  ;;  %v3216_v51 = vld [vmem:[#allocation2 + $0x90] sm:$0xff]  ;;  %v3221_v53 = vld [vmem:[#allocation2 + $0xc8] sm:$0xff]  ;;  %v3220_v52 = vld [vmem:[#allocation2 + $0xc0] sm:$0xff]  ;;  %v13629_v34 = vpack.c.bf16 %v3754_v54, %v3753_v49 }
 0x246   : > { %v3138_v58 = vadd.f32 %v11761_v30, %v13397_v2  ;;  %v11763_v16 = vadd.f32 %v11062_v4, %v13390_v62  ;;  %v3057_v23 = vpop.f32.mrb[31].mxu0  ;;  %v13586_v14 = vpack.c.bf16 %v3217_v50, %v3216_v51  ;;  %v3219_v26 = vld [vmem:[#allocation2 + $0xb0] sm:$0xff]  ;;  %v3218_v30 = vld [vmem:[#allocation2 + $0xa8] sm:$0xff]  ;;  %v13594_v3 = vpack.c.bf16 %v3221_v53, %v3220_v52  ;;  %v3225_v4 = vld [vmem:[#allocation2 + $0xf8] sm:$0xff] }
 0x247   : > { %v3136_v56 = vadd.f32 %v11762_v33, %v13397_v2  ;;  %v11764_v15 = vadd.f32 %v3057_v23, %v13392_v63  ;;  %11088 = vmatmul.mubr.msk.bf16.gmra.mrb[52].mxu1 %vm374_vm1, %v13527_v57  ;;  %v13592_v31 = vpack.c.bf16 %v3219_v26, %v3218_v30  ;;  %v3223_v33 = vld [vmem:[#allocation2 + $0xe0] sm:$0xff]  ;;  %v3222_v35 = vld [vmem:[#allocation2 + $0xd8] sm:$0xff]  ;;  %v3760_v51 = vld [vmem:[#allocation2 + $0x6a] sm:$0xff] }
 0x248   : > { %v3170_v27 = vmax.f32 %v3138_v58, 0.0  ;;  %v3139_v61 = vadd.f32 %v11763_v16, %v13397_v2  ;;  %11091 = vmatprep.mubr.msk.bf16.mxu1 %vm374_vm1, %v13531_v40  ;;  %v13600_v58 = vpack.c.bf16 %v3223_v33, %v3222_v35  ;;  %v3224_v16 = vld [vmem:[#allocation2 + $0xf0] sm:$0xff]  ;;  %v12527_v19 = vld [vmem:[%s14583_s2 + $0x38] sm:$0xff]   ;;  %v3762_v30 = vld [vmem:[#allocation2 + $0x82] sm:$0xff] }
 0x249   : > { %v3168_v18 = vmax.f32 %v3136_v56, 0.0  ;;  %v3137_v11 = vadd.f32 %v11764_v15, %v13397_v2  ;;  %v3284_v37 = vld [vmem:[#allocation2 + $0x151] sm:$0xff]  ;;  %v3204_v2 = vld [vmem:[#allocation2] sm:$0xff]  ;;  %v13602_v23 = vpack.c.bf16 %v3225_v4, %v3224_v16  ;;  %v3229_v15 = vld [vmem:[#allocation2 + $0x128] sm:$0xff] }
 0x24a   : > { %3202 = vst.msk [vmem:[#allocation2 + $0x181] sm:$0xff] %vm374_vm1, %v3170_v27  ;;  %v3171_v62 = vmax.f32 %v3139_v61, 0.0  ;;  %v3282_v63 = vld [vmem:[#allocation2 + $0x139] sm:$0xff]  ;;  %v3236_v10 = vpack.c.bf16 %v3205_v42, %v3204_v2  ;;  %v3227_v56 = vld [vmem:[#allocation2 + $0x110] sm:$0xff]  ;;  %v3226_v27 = vld [vmem:[#allocation2 + $0x108] sm:$0xff] }
 0x24b   : > { %3200 = vst.msk [vmem:[#allocation2 + $0x169] sm:$0xff] %vm374_vm1, %v3168_v18  ;;  %v3169_v21 = vmax.f32 %v3137_v11, 0.0  ;;  %v3285_v28 = vld [vmem:[#allocation2 + $0x159] sm:$0xff]  ;;  %v13608_v61 = vpack.c.bf16 %v3227_v56, %v3226_v27  ;;  %v3751_v2 = vld [vmem:[#allocation2 + $0x2] sm:$0xff]  ;;  %v3752_v42 = vld [vmem:[#allocation2 + $0xa] sm:$0xff] }
 0x24c   : > { %3203 = vst.msk [vmem:[#allocation2 + $0x189] sm:$0xff] %vm374_vm1, %v3171_v62  ;;  %v3283_v38 = vld [vmem:[#allocation2 + $0x141] sm:$0xff]  ;;  %v13547_v44 = vpack.c.bf16 %v3285_v28, %v3284_v37  ;;  %v3230_v28 = vld [vmem:[#allocation2 + $0x138] sm:$0xff]  ;;  %v3765_v16 = vld [vmem:[#allocation2 + $0xaa] sm:$0xff] }
 0x24d   : > { %3201 = vst.msk [vmem:[#allocation2 + $0x171] sm:$0xff] %vm374_vm1, %v3169_v21  ;;  %v13545_v36 = vpack.c.bf16 %v3283_v38, %v3282_v63  ;;  %v3228_v18 = vld [vmem:[#allocation2 + $0x120] sm:$0xff]  ;;  %v3233_v21 = vld [vmem:[#allocation2 + $0x158] sm:$0xff]  ;;  %v3232_v38 = vld [vmem:[#allocation2 + $0x150] sm:$0xff] }
 0x24e   : > { %v13610_v11 = vpack.c.bf16 %v3229_v15, %v3228_v18  ;;  %v3231_v62 = vld [vmem:[#allocation2 + $0x140] sm:$0xff]  ;;  %v13618_v37 = vpack.c.bf16 %v3233_v21, %v3232_v38  ;;  %v3758_v50 = vld [vmem:[#allocation2 + $0x52] sm:$0xff]  ;;  %v3768_v27 = vld [vmem:[#allocation2 + $0xca] sm:$0xff] }
 0x24f   : > { %11092 = vmatmul.mubr.msk.bf16.gmra.mrb[56].mxu1 %vm374_vm1, %v13545_v36  ;;  %v13616_v63 = vpack.c.bf16 %v3231_v62, %v3230_v28  ;;  %v3763_v52 = vld [vmem:[#allocation2 + $0x92] sm:$0xff]  ;;  %v3764_v33 = vld [vmem:[#allocation2 + $0x9a] sm:$0xff]  ;;  %v3767_v15 = vld [vmem:[#allocation2 + $0xc2] sm:$0xff] }
 0x250   : > { %11095 = vmatprep.mubr.msk.bf16.mxu1 %vm374_vm1, %v13547_v44  ;;  %v13654_v35 = vpack.c.bf16 %v3764_v33, %v3763_v52  ;;  %v3766_v56 = vld [vmem:[#allocation2 + $0xb2] sm:$0xff]  ;;  %v13662_v62 = vpack.c.bf16 %v3768_v27, %v3767_v15  ;;  %v3769_v21 = vld [vmem:[#allocation2 + $0xda] sm:$0xff]  ;;  %v3770_v28 = vld [vmem:[#allocation2 + $0xe2] sm:$0xff] }
 0x251   : > { %v13660_v18 = vpack.c.bf16 %v3766_v56, %v3765_v16  ;;  %v3771_v38 = vld [vmem:[#allocation2 + $0xf2] sm:$0xff]  ;;  %v3775_v49 = vld [vmem:[#allocation2 + $0x122] sm:$0xff]  ;;  %v3776_v54 = vld [vmem:[#allocation2 + $0x12a] sm:$0xff] }
 0x252   : > { %v3286_v43 = vld [vmem:[#allocation2 + $0x169] sm:$0xff]  ;;  %v12531_v27 = vld [vmem:[%s14583_s2 + $0x58] sm:$0xff]  }
 0x253   : > { %v12529_v16 = vld [vmem:[%s14583_s2 + $0x48] sm:$0xff]   ;;  %v12530_v56 = vld [vmem:[%s14583_s2 + $0x50] sm:$0xff]  }
 0x254   : > { %v3287_v45 = vld [vmem:[#allocation2 + $0x171] sm:$0xff] }
 0x255   : > { %v13553_v48 = vpack.c.bf16 %v3287_v45, %v3286_v43  ;;  %v3235_v43 = vld [vmem:[#allocation2 + $0x170] sm:$0xff]  ;;  %v3234_v45 = vld [vmem:[#allocation2 + $0x168] sm:$0xff] }
 0x256   : > { %v13624_v46 = vpack.c.bf16 %v3235_v43, %v3234_v45  ;;  %v3773_v45 = vld [vmem:[#allocation2 + $0x10a] sm:$0xff]  ;;  %v3782_v52 = vld [vmem:[#allocation2 + $0x172] sm:$0xff] }
 0x257   : > { %11096 = vmatmul.mubr.msk.bf16.gmra.mrb[60].mxu1 %vm374_vm1, %v13553_v48 }
 0x258   : > { %11103 = vmatprep.mubr.msk.bf16.mxu1 %vm374_vm1, %v3236_v10  ;;  %v3783_v10 = vpack.c.bf16 %v3752_v42, %v3751_v2  ;;  %v3772_v2 = vld [vmem:[#allocation2 + $0xfa] sm:$0xff]  ;;  %v13668_v42 = vpack.c.bf16 %v3770_v28, %v3769_v21 }
 0x259   : > { %v13670_v43 = vpack.c.bf16 %v3772_v2, %v3771_v38  ;;  %v12532_v21 = vld [vmem:[%s14583_s2 + $0x60] sm:$0xff]  }
 0x25a   : > { %v5288_v28 = vld [vmem:[#allocation2 + $0x81] sm:$0xff]  ;;  %v5290_v38 = vld [vmem:[#allocation2 + $0x99] sm:$0xff] }
 0x25b   : > { %v5287_v2 = vld [vmem:[#allocation2 + $0x79] sm:$0xff] }
 0x25f   : > { %11104 = vmatmul.mubr.msk.bf16.vlgmr.msra.gmra.mrb[32].mxu1 %vm374_vm1, %v13558_v13 }
 0x260   : > { %11136 = vmatpush3.bf16.msra.mxu1 %v13438_v7  ;;  %11107 = vmatprep.mubr.msk.bf16.mxu1 %vm374_vm1, %v13563_v6  ;;  %v3215_v7 = vld [vmem:[#allocation2 + $0x80] sm:$0xff] }
 0x261   : > { %11137 = vmatprep.subr.bf16.mxu1 %v12525_v60  ;;  %v13584_v24 = vpack.c.bf16 %v3215_v7, %v3214_v17  ;;  %v3757_v7 = vld [vmem:[#allocation2 + $0x4a] sm:$0xff]  ;;  %v3759_v17 = vld [vmem:[#allocation2 + $0x62] sm:$0xff] }
 0x262   : > { %v13644_v26 = vpack.c.bf16 %v3758_v50, %v3757_v7  ;;  %v13646_v53 = vpack.c.bf16 %v3760_v51, %v3759_v17  ;;  %v3778_v7 = vld [vmem:[#allocation2 + $0x142] sm:$0xff]  ;;  %v3779_v50 = vld [vmem:[#allocation2 + $0x152] sm:$0xff]  ;;  %v3780_v17 = vld [vmem:[#allocation2 + $0x15a] sm:$0xff] }
 0x264   : > { %11138 = vmatpush3.bf16.msra.mxu1 %v12525_v60  ;;  %v3756_v60 = vld [vmem:[#allocation2 + $0x3a] sm:$0xff] }
 0x265   : > { %11171 = vmatprep.subr.bf16.mxu1 %v13573_v9  ;;  %v13634_v39 = vpack.c.bf16 %v3756_v60, %v3755_v55  ;;  %v13678_v60 = vpack.c.bf16 %v3776_v54, %v3775_v49  ;;  %v5292_v54 = vld [vmem:[#allocation2 + $0xb1] sm:$0xff] }
 0x267   : > { %11108 = vmatmul.mubr.msk.bf16.gmra.mrb[36].mxu1 %vm374_vm1, %v13575_v47 }
 0x268   : > { %11111 = vmatprep.mubr.msk.bf16.mxu1 %vm374_vm1, %v13578_v5 }
 0x26f   : > { %11112 = vmatmul.mubr.msk.bf16.gmra.mrb[40].mxu1 %vm374_vm1, %v13584_v24 }
 0x270   : > { %11115 = vmatprep.mubr.msk.bf16.mxu1 %vm374_vm1, %v13586_v14 }
 0x277   : > { %11116 = vmatmul.mubr.msk.bf16.gmra.mrb[44].mxu1 %vm374_vm1, %v13592_v31 }
 0x278   : > { %11119 = vmatprep.mubr.msk.bf16.mxu1 %vm374_vm1, %v13594_v3 }
 0x27f   : > { %11120 = vmatmul.mubr.msk.bf16.gmra.mrb[48].mxu1 %vm374_vm1, %v13600_v58 }
 0x280   : > { %11123 = vmatprep.mubr.msk.bf16.mxu1 %vm374_vm1, %v13602_v23 }
 0x287   : > { %11124 = vmatmul.mubr.msk.bf16.gmra.mrb[52].mxu1 %vm374_vm1, %v13608_v61 }
 0x288   : > { %11127 = vmatprep.mubr.msk.bf16.mxu1 %vm374_vm1, %v13610_v11 }
 0x28f   : > { %11128 = vmatmul.mubr.msk.bf16.gmra.mrb[56].mxu1 %vm374_vm1, %v13616_v63 }
 0x290   : > { %11131 = vmatprep.mubr.msk.bf16.mxu1 %vm374_vm1, %v13618_v37 }
 0x297   : > { %11132 = vmatmul.mubr.msk.bf16.gmra.mrb[60].mxu1 %vm374_vm1, %v13624_v46 }
 0x298   : > { %11139 = vmatprep.mubr.msk.bf16.mxu1 %vm374_vm1, %v3783_v10  ;;  %v3774_v10 = vld [vmem:[#allocation2 + $0x112] sm:$0xff] }
 0x299   : > { %v13676_v55 = vpack.c.bf16 %v3774_v10, %v3773_v45  ;;  %v5316_v45 = vpack.c.bf16 %v5288_v28, %v5287_v2  ;;  %v5289_v10 = vld [vmem:[#allocation2 + $0x91] sm:$0xff] }
 0x29a   : > { %v5317_v49 = vpack.c.bf16 %v5290_v38, %v5289_v10 }
 0x29f   : > { %11140 = vmatmul.mubr.msk.bf16.vlgmr.msra.gmra.mrb[32].mxu1 %vm374_vm1, %v13629_v34 }
 0x2a0   : > { %11172 = vmatpush3.bf16.msra.mxu1 %v13573_v9  ;;  %11143 = vmatprep.mubr.msk.bf16.mxu1 %vm374_vm1, %v13634_v39  ;;  %v3761_v9 = vld [vmem:[#allocation2 + $0x7a] sm:$0xff] }
 0x2a1   : > { %11173 = vmatprep.subr.bf16.mxu1 %v12527_v19  ;;  %v13652_v4 = vpack.c.bf16 %v3762_v30, %v3761_v9  ;;  %v13686_v9 = vpack.c.bf16 %v3780_v17, %v3779_v50  ;;  %v3781_v30 = vld [vmem:[#allocation2 + $0x16a] sm:$0xff]  ;;  %v5293_v17 = vld [vmem:[#allocation2 + $0xc1] sm:$0xff] }
 0x2a2   : > { %v13692_v33 = vpack.c.bf16 %v3782_v52, %v3781_v30  ;;  %v5296_v52 = vld [vmem:[#allocation2 + $0xe1] sm:$0xff] }
 0x2a4   : > { %11174 = vmatpush3.bf16.msra.mxu1 %v12527_v19  ;;  %v3777_v19 = vld [vmem:[#allocation2 + $0x13a] sm:$0xff] }
 0x2a5   : > { %11207 = vmatprep.subr.bf16.mxu1 %v12528_v1  ;;  %v13684_v51 = vpack.c.bf16 %v3778_v7, %v3777_v19  ;;  %v5294_v19 = vld [vmem:[#allocation2 + $0xc9] sm:$0xff] }
 0x2a6   : > { %v5291_v7 = vld [vmem:[#allocation2 + $0xa9] sm:$0xff]  ;;  %v5319_v30 = vpack.c.bf16 %v5294_v19, %v5293_v17 }
 0x2a7   : > { %11144 = vmatmul.mubr.msk.bf16.gmra.mrb[36].mxu1 %vm374_vm1, %v13644_v26  ;;  %v5318_v50 = vpack.c.bf16 %v5292_v54, %v5291_v7  ;;  %v13958_v54 = vld [vmem:[%s14586_s5 + $0x20] sm:$0xff]  }
 0x2a8   : > { %11147 = vmatprep.mubr.msk.bf16.mxu1 %vm374_vm1, %v13646_v53 }
 0x2af   : > { %11148 = vmatmul.mubr.msk.bf16.gmra.mrb[40].mxu1 %vm374_vm1, %v13652_v4 }
 0x2b0   : > { %11151 = vmatprep.mubr.msk.bf16.mxu1 %vm374_vm1, %v13654_v35 }
 0x2b7   : > { %11152 = vmatmul.mubr.msk.bf16.gmra.mrb[44].mxu1 %vm374_vm1, %v13660_v18 }
 0x2b8   : > { %11155 = vmatprep.mubr.msk.bf16.mxu1 %vm374_vm1, %v13662_v62 }
 0x2bf   : > { %11156 = vmatmul.mubr.msk.bf16.gmra.mrb[48].mxu1 %vm374_vm1, %v13668_v42 }
 0x2c0   : > { %11159 = vmatprep.mubr.msk.bf16.mxu1 %vm374_vm1, %v13670_v43 }
 0x2c7   : > { %11160 = vmatmul.mubr.msk.bf16.gmra.mrb[52].mxu1 %vm374_vm1, %v13676_v55 }
 0x2c8   : > { %11163 = vmatprep.mubr.msk.bf16.mxu1 %vm374_vm1, %v13678_v60 }
 0x2cf   : > { %11164 = vmatmul.mubr.msk.bf16.gmra.mrb[56].mxu1 %vm374_vm1, %v13684_v51 }
 0x2d0   : > { %11167 = vmatprep.mubr.msk.bf16.mxu1 %vm374_vm1, %v13686_v9 }
 0x2d7   : > { %11168 = vmatmul.mubr.msk.bf16.gmra.mrb[60].mxu1 %vm374_vm1, %v13692_v33 }
 0x2d8   : > { %11175 = vmatprep.mubr.msk.bf16.mxu1 %vm374_vm1, %v13558_v13  ;;  %v4088_v13 = vld [vmem:[#allocation2 + $0x188] sm:$0xff] }
 0x2df   : > { %11176 = vmatmul.mubr.msk.bf16.vlgmr.msra.gmra.mrb[32].mxu1 %vm374_vm1, %v13563_v6 }
 0x2e0   : > { %11208 = vmatpush3.bf16.msra.mxu1 %v12528_v1  ;;  %11179 = vmatprep.mubr.msk.bf16.mxu1 %vm374_vm1, %v13575_v47  ;;  %v4087_v1 = vld [vmem:[#allocation2 + $0x180] sm:$0xff] }
 0x2e1   : > { %11209 = vmatprep.subr.bf16.mxu1 %v12529_v16  ;;  %v13732_v15 = vpack.c.bf16 %v4088_v13, %v4087_v1  ;;  %v5297_v1 = vld [vmem:[#allocation2 + $0xf1] sm:$0xff] }
 0x2e4   : > { %11210 = vmatpush3.bf16.msra.mxu1 %v12529_v16  ;;  %v5298_v16 = vld [vmem:[#allocation2 + $0xf9] sm:$0xff] }
 0x2e5   : > { %11243 = vmatprep.subr.bf16.mxu1 %v12530_v56 }
 0x2e7   : > { %11180 = vmatmul.mubr.msk.bf16.gmra.mrb[36].mxu1 %vm374_vm1, %v13578_v5 }
 0x2e8   : > { %11183 = vmatprep.mubr.msk.bf16.mxu1 %vm374_vm1, %v13584_v24 }
 0x2ef   : > { %11184 = vmatmul.mubr.msk.bf16.gmra.mrb[40].mxu1 %vm374_vm1, %v13586_v14 }
 0x2f0   : > { %11187 = vmatprep.mubr.msk.bf16.mxu1 %vm374_vm1, %v13592_v31 }
 0x2f7   : > { %11188 = vmatmul.mubr.msk.bf16.gmra.mrb[44].mxu1 %vm374_vm1, %v13594_v3 }
 0x2f8   : > { %11191 = vmatprep.mubr.msk.bf16.mxu1 %vm374_vm1, %v13600_v58 }
 0x2ff   : > { %11192 = vmatmul.mubr.msk.bf16.gmra.mrb[48].mxu1 %vm374_vm1, %v13602_v23 }
 0x300   : > { %11195 = vmatprep.mubr.msk.bf16.mxu1 %vm374_vm1, %v13608_v61 }
 0x307   : > { %11196 = vmatmul.mubr.msk.bf16.gmra.mrb[52].mxu1 %vm374_vm1, %v13610_v11 }
 0x308   : > { %11199 = vmatprep.mubr.msk.bf16.mxu1 %vm374_vm1, %v13616_v63 }
 0x30f   : > { %11200 = vmatmul.mubr.msk.bf16.gmra.mrb[56].mxu1 %vm374_vm1, %v13618_v37 }
 0x310   : > { %11203 = vmatprep.mubr.msk.bf16.mxu1 %vm374_vm1, %v13624_v46 }
 0x317   : > { %11204 = vmatmul.mubr.msk.bf16.gmra.mrb[60].mxu1 %vm374_vm1, %v13732_v15 }
 0x318   : > { %11211 = vmatprep.mubr.msk.bf16.mxu1 %vm374_vm1, %v13417_v12  ;;  %v4394_v12 = vld [vmem:[#allocation2 + $0x189] sm:$0xff] }
 0x31f   : > { %11212 = vmatmul.mubr.msk.bf16.vlgmr.msra.gmra.mrb[32].mxu1 %vm374_vm1, %v13424_v25  ;;  %v4393_v25 = vld [vmem:[#allocation2 + $0x181] sm:$0xff] }
 0x320   : > { %11244 = vmatpush3.bf16.msra.mxu1 %v12530_v56  ;;  %11215 = vmatprep.mubr.msk.bf16.mxu1 %vm374_vm1, %v13446_v22  ;;  %v13772_v22 = vpack.c.bf16 %v4394_v12, %v4393_v25  ;;  %v5295_v56 = vld [vmem:[#allocation2 + $0xd9] sm:$0xff] }
 0x321   : > { %11245 = vmatprep.subr.bf16.mxu1 %v12531_v27  ;;  %v5320_v13 = vpack.c.bf16 %v5296_v52, %v5295_v56 }
 0x324   : > { %11246 = vmatpush3.bf16.msra.mxu1 %v12531_v27  ;;  %v5311_v27 = vld [vmem:[#allocation2 + $0x199] sm:$0xff] }
 0x325   : > { %11279 = vmatprep.subr.bf16.mxu1 %v12532_v21 }
 0x327   : > { %11216 = vmatmul.mubr.msk.bf16.gmra.mrb[36].mxu1 %vm374_vm1, %v13451_v59  ;;  %v12533_v59 = vld [vmem:[%s14583_s2 + $0x68] sm:$0xff]  }
 0x328   : > { %11219 = vmatprep.mubr.msk.bf16.mxu1 %vm374_vm1, %v13467_v8  ;;  %v12534_v8 = vld [vmem:[%s14583_s2 + $0x70] sm:$0xff]  }
 0x32f   : > { %11220 = vmatmul.mubr.msk.bf16.gmra.mrb[40].mxu1 %vm374_vm1, %v13471_v41  ;;  %v4699_v41 = vld [vmem:[#allocation2 + $0x182] sm:$0xff] }
 0x330   : > { %11223 = vmatprep.mubr.msk.bf16.mxu1 %vm374_vm1, %v13487_v32  ;;  %v4700_v32 = vld [vmem:[#allocation2 + $0x18a] sm:$0xff] }
 0x337   : > { %11224 = vmatmul.mubr.msk.bf16.gmra.mrb[44].mxu1 %vm374_vm1, %v13491_v29  ;;  %v13812_v29 = vpack.c.bf16 %v4700_v32, %v4699_v41 }
 0x338   : > { %11227 = vmatprep.mubr.msk.bf16.mxu1 %vm374_vm1, %v13507_v20  ;;  %v12535_v20 = vld [vmem:[%s14583_s2 + $0x78] sm:$0xff]  }
 0x33f   : > { %11228 = vmatmul.mubr.msk.bf16.gmra.mrb[48].mxu1 %vm374_vm1, %v13511_v0  ;;  %v12536_v0 = vld [vmem:[%s14583_s2 + $0x80] sm:$0xff]  }
 0x340   : > { %11231 = vmatprep.mubr.msk.bf16.mxu1 %vm374_vm1, %v13527_v57 }
 0x347   : > { %11232 = vmatmul.mubr.msk.bf16.gmra.mrb[52].mxu1 %vm374_vm1, %v13531_v40 }
 0x348   : > { %11235 = vmatprep.mubr.msk.bf16.mxu1 %vm374_vm1, %v13545_v36 }
 0x34f   : > { %11236 = vmatmul.mubr.msk.bf16.gmra.mrb[56].mxu1 %vm374_vm1, %v13547_v44 }
 0x350   : > { %11239 = vmatprep.mubr.msk.bf16.mxu1 %vm374_vm1, %v13553_v48 }
 0x357   : > { %11240 = vmatmul.mubr.msk.bf16.gmra.mrb[60].mxu1 %vm374_vm1, %v13772_v22 }
 0x358   : > { %11247 = vmatprep.mubr.msk.bf16.mxu1 %vm374_vm1, %v13629_v34 }
 0x35f   : > { %11248 = vmatmul.mubr.msk.bf16.vlgmr.msra.gmra.mrb[32].mxu1 %vm374_vm1, %v13634_v39 }
 0x360   : > { %11280 = vmatpush3.bf16.msra.mxu1 %v12532_v21  ;;  %11251 = vmatprep.mubr.msk.bf16.mxu1 %vm374_vm1, %v13644_v26  ;;  %v5312_v21 = vld [vmem:[#allocation2 + $0x1a1] sm:$0xff] }
 0x361   : > { %11281 = vmatprep.subr.bf16.mxu1 %v12533_v59  ;;  %v5328_v12 = vpack.c.bf16 %v5312_v21, %v5311_v27 }
 0x364   : > { %11282 = vmatpush3.bf16.msra.mxu1 %v12533_v59 }
 0x365   : > { %11315 = vmatprep.subr.bf16.mxu1 %v12534_v8 }
 0x367   : > { %11252 = vmatmul.mubr.msk.bf16.gmra.mrb[36].mxu1 %vm374_vm1, %v13646_v53 }
 0x368   : > { %11255 = vmatprep.mubr.msk.bf16.mxu1 %vm374_vm1, %v13652_v4 }
 0x36f   : > { %11256 = vmatmul.mubr.msk.bf16.gmra.mrb[40].mxu1 %vm374_vm1, %v13654_v35 }
 0x370   : > { %11259 = vmatprep.mubr.msk.bf16.mxu1 %vm374_vm1, %v13660_v18 }
 0x377   : > { %11260 = vmatmul.mubr.msk.bf16.gmra.mrb[44].mxu1 %vm374_vm1, %v13662_v62 }
 0x378   : > { %11263 = vmatprep.mubr.msk.bf16.mxu1 %vm374_vm1, %v13668_v42 }
 0x37f   : > { %11264 = vmatmul.mubr.msk.bf16.gmra.mrb[48].mxu1 %vm374_vm1, %v13670_v43 }
 0x380   : > { %11267 = vmatprep.mubr.msk.bf16.mxu1 %vm374_vm1, %v13676_v55 }
 0x387   : > { %11268 = vmatmul.mubr.msk.bf16.gmra.mrb[52].mxu1 %vm374_vm1, %v13678_v60 }
 0x388   : > { %11271 = vmatprep.mubr.msk.bf16.mxu1 %vm374_vm1, %v13684_v51 }
 0x38f   : > { %11272 = vmatmul.mubr.msk.bf16.gmra.mrb[56].mxu1 %vm374_vm1, %v13686_v9 }
 0x390   : > { %11275 = vmatprep.mubr.msk.bf16.mxu1 %vm374_vm1, %v13692_v33 }
 0x397   : > { %11276 = vmatmul.mubr.msk.bf16.gmra.mrb[60].mxu1 %vm374_vm1, %v13812_v29 }
 0x398   : > { %11283 = vmatprep.mubr.msk.bf16.mxu1 %vm374_vm1, %v13563_v6  ;;  %v5005_v6 = vld [vmem:[#allocation2 + $0x198] sm:$0xff] }
 0x39f   : > { %11284 = vmatmul.mubr.msk.bf16.vlgmr.msra.gmra.mrb[32].mxu1 %vm374_vm1, %v13575_v47  ;;  %v5006_v47 = vld [vmem:[#allocation2 + $0x1a0] sm:$0xff] }
 0x3a0   : > { %11316 = vmatpush3.bf16.msra.mxu1 %v12534_v8  ;;  %11287 = vmatprep.mubr.msk.bf16.mxu1 %vm374_vm1, %v13578_v5  ;;  %v5022_v5 = vpack.c.bf16 %v5006_v47, %v5005_v6 }
 0x3a1   : > { %11317 = vmatprep.subr.bf16.mxu1 %v12535_v20 }
 0x3a4   : > { %11318 = vmatpush3.bf16.msra.mxu1 %v12535_v20 }
 0x3a5   : > { %11351 = vmatprep.subr.bf16.mxu1 %v12536_v0 }
 0x3a7   : > { %11288 = vmatmul.mubr.msk.bf16.gmra.mrb[36].mxu1 %vm374_vm1, %v13584_v24  ;;  %v5282_v24 = vld [vmem:[#allocation2 + $0x39] sm:$0xff] }
 0x3a8   : > { %11291 = vmatprep.mubr.msk.bf16.mxu1 %vm374_vm1, %v13586_v14  ;;  %v5281_v14 = vld [vmem:[#allocation2 + $0x31] sm:$0xff] }
 0x3af   : > { %11292 = vmatmul.mubr.msk.bf16.gmra.mrb[40].mxu1 %vm374_vm1, %v13592_v31  ;;  %v5313_v31 = vpack.c.bf16 %v5282_v24, %v5281_v14 }
 0x3b0   : > { %11295 = vmatprep.mubr.msk.bf16.mxu1 %vm374_vm1, %v13594_v3  ;;  %v12538_v3 = vld [vmem:[%s14586_s5 + $0x10] sm:$0xff]  }
 0x3b1   : > { %11387 = vmatprep.subr.bf16.mxu0 %v12538_v3 }
 0x3b2   : > { %11388 = vmatpush3.bf16.msra.mxu0 %v12538_v3 }
 0x3b7   : > { %11296 = vmatmul.mubr.msk.bf16.gmra.mrb[44].mxu1 %vm374_vm1, %v13600_v58  ;;  %v12539_v58 = vld [vmem:[%s14586_s5 + $0x18] sm:$0xff]  }
 0x3b8   : > { %11299 = vmatprep.mubr.msk.bf16.mxu1 %vm374_vm1, %v13602_v23  ;;  %v5284_v23 = vld [vmem:[#allocation2 + $0x51] sm:$0xff]  ;;  %11389 = vmatprep.subr.bf16.mxu0 %v12539_v58 }
 0x3b9   : > { %11390 = vmatpush3.bf16.msra.mxu0 %v12539_v58 }
 0x3bf   : > { %11300 = vmatmul.mubr.msk.bf16.gmra.mrb[48].mxu1 %vm374_vm1, %v13608_v61  ;;  %v5286_v61 = vld [vmem:[#allocation2 + $0x69] sm:$0xff] }
 0x3c0   : > { %11303 = vmatprep.mubr.msk.bf16.mxu1 %vm374_vm1, %v13610_v11  ;;  %v5283_v11 = vld [vmem:[#allocation2 + $0x49] sm:$0xff] }
 0x3c7   : > { %11304 = vmatmul.mubr.msk.bf16.gmra.mrb[52].mxu1 %vm374_vm1, %v13616_v63  ;;  %v5314_v63 = vpack.c.bf16 %v5284_v23, %v5283_v11  ;;  %v12541_v11 = vld [vmem:[%s14586_s5 + $0x8] sm:$0xff]  }
 0x3c8   : > { %11307 = vmatprep.mubr.msk.bf16.mxu1 %vm374_vm1, %v13618_v37  ;;  %v5285_v37 = vld [vmem:[#allocation2 + $0x61] sm:$0xff] }
 0x3c9   : > { %v5315_v34 = vpack.c.bf16 %v5286_v61, %v5285_v37 }
 0x3cf   : > { %11308 = vmatmul.mubr.msk.bf16.gmra.mrb[56].mxu1 %vm374_vm1, %v13624_v46  ;;  %v12537_v46 = vld [vmem:[%s14583_s2 + $0x88] sm:$0xff]  }
 0x3d0   : > { %11311 = vmatprep.mubr.msk.bf16.mxu1 %vm374_vm1, %v13732_v15  ;;  %v5321_v15 = vpack.c.bf16 %v5298_v16, %v5297_v1 }
 0x3d7   : > { %11312 = vmatmul.mubr.msk.bf16.gmra.mrb[60].mxu1 %vm374_vm1, %v5022_v5 }
 0x3d8   : > { %11319 = vmatprep.mubr.msk.bf16.mxu1 %vm374_vm1, %v5313_v31 }
 0x3df   : > { %11320 = vmatmul.mubr.msk.bf16.vlgmr.msra.gmra.mrb[32].mxu1 %vm374_vm1, %v5314_v63 }
 0x3e0   : > { %11352 = vmatpush3.bf16.msra.mxu1 %v12536_v0  ;;  %11323 = vmatprep.mubr.msk.bf16.mxu1 %vm374_vm1, %v5315_v34 }
 0x3e1   : > { %11353 = vmatprep.subr.bf16.mxu1 %v12537_v46 }
 0x3e4   : > { %11354 = vmatpush3.bf16.msra.mxu1 %v12537_v46 }
 0x3e7   : > { %11324 = vmatmul.mubr.msk.bf16.gmra.mrb[36].mxu1 %vm374_vm1, %v5316_v45 }
 0x3e8   : > { %11327 = vmatprep.mubr.msk.bf16.mxu1 %vm374_vm1, %v5317_v49 }
 0x3ef   : > { %11328 = vmatmul.mubr.msk.bf16.gmra.mrb[40].mxu1 %vm374_vm1, %v5318_v50 }
 0x3f0   : > { %11331 = vmatprep.mubr.msk.bf16.mxu1 %vm374_vm1, %v5319_v30 }
 0x3f7   : > { %11332 = vmatmul.mubr.msk.bf16.gmra.mrb[44].mxu1 %vm374_vm1, %v5320_v13 }
 0x3f8   : > { %11335 = vmatprep.mubr.msk.bf16.mxu1 %vm374_vm1, %v5321_v15 }
 0x3ff   : > { %11336 = vmatmul.mubr.msk.bf16.gmra.mrb[48].mxu1 %vm374_vm1, %v13527_v57  ;;  %v5617_v57 = vld [vmem:[#allocation2 + $0x19a] sm:$0xff] }
 0x400   : > { %11339 = vmatprep.mubr.msk.bf16.mxu1 %vm374_vm1, %v13531_v40  ;;  %v5618_v40 = vld [vmem:[#allocation2 + $0x1a2] sm:$0xff] }
 0x407   : > { %11340 = vmatmul.mubr.msk.bf16.gmra.mrb[52].mxu1 %vm374_vm1, %v13545_v36  ;;  %v5634_v36 = vpack.c.bf16 %v5618_v40, %v5617_v57 }
 0x408   : > { %11343 = vmatprep.mubr.msk.bf16.mxu1 %vm374_vm1, %v13547_v44  ;;  %v6048_v44 = vld [vmem:[#allocation2 + $0x1] sm:$0xff] }
 0x40f   : > { %11344 = vmatmul.mubr.msk.bf16.gmra.mrb[56].mxu1 %vm374_vm1, %v13553_v48  ;;  %v6049_v48 = vld [vmem:[#allocation2 + $0x9] sm:$0xff] }
 0x410   : > { %11347 = vmatprep.mubr.msk.bf16.mxu1 %vm374_vm1, %v13772_v22 }
 0x417   : > { %11348 = vmatmul.mubr.msk.bf16.gmra.mrb[60].mxu1 %vm374_vm1, %v5328_v12 }
 0x418   : > { %11355 = vmatprep.mubr.msk.bf16.mxu1 %vm374_vm1, %v13634_v39  ;;  %v6080_v39 = vpack.c.bf16 %v6049_v48, %v6048_v44 }
 0x41a   : > { %11391 = vmatprep.mubr.msk.bf16.mxu0 %vm374_vm1, %v6080_v39 }
 0x41f   : > { %11356 = vmatmul.mubr.msk.bf16.vlgmr.msra.gmra.mrb[32].mxu1 %vm374_vm1, %v13644_v26  ;;  %v12540_v26 = vld [vmem:[%s14586_s5] sm:$0xff]  }
 0x420   : > { %11359 = vmatprep.mubr.msk.bf16.mxu1 %vm374_vm1, %v13646_v53  ;;  %11423 = vmatprep.subr.bf16.mxu0 %v12540_v26  ;;  %v13922_v53 = vld [vmem:[%s14585_s4] ss:$0 sm:$0xff] }
 0x427   : > { %11360 = vmatmul.mubr.msk.bf16.gmra.mrb[36].mxu1 %vm374_vm1, %v13652_v4 }
 0x428   : > { %11363 = vmatprep.mubr.msk.bf16.mxu1 %vm374_vm1, %v13654_v35 }
 0x42f   : > { %11364 = vmatmul.mubr.msk.bf16.gmra.mrb[40].mxu1 %vm374_vm1, %v13660_v18 }
 0x430   : > { %11367 = vmatprep.mubr.msk.bf16.mxu1 %vm374_vm1, %v13662_v62 }
 0x437   : > { %11368 = vmatmul.mubr.msk.bf16.gmra.mrb[44].mxu1 %vm374_vm1, %v13668_v42 }
 0x438   : > { %11371 = vmatprep.mubr.msk.bf16.mxu1 %vm374_vm1, %v13670_v43 }
 0x43f   : > { %11372 = vmatmul.mubr.msk.bf16.gmra.mrb[48].mxu1 %vm374_vm1, %v13676_v55 }
 0x440   : > { %11375 = vmatprep.mubr.msk.bf16.mxu1 %vm374_vm1, %v13678_v60 }
 0x447   : > { %11376 = vmatmul.mubr.msk.bf16.gmra.mrb[52].mxu1 %vm374_vm1, %v13684_v51 }
 0x448   : > { %11379 = vmatprep.mubr.msk.bf16.mxu1 %vm374_vm1, %v13686_v9 }
 0x44f   : > { %11380 = vmatmul.mubr.msk.bf16.gmra.mrb[56].mxu1 %vm374_vm1, %v13692_v33 }
 0x450   : > { %11383 = vmatprep.mubr.msk.bf16.mxu1 %vm374_vm1, %v13812_v29 }
 0x457   : > { %11384 = vmatmul.mubr.msk.bf16.gmra.mrb[60].mxu1 %vm374_vm1, %v5634_v36 }
 0x4f2   : > { %v11357_v4 = vpop.f32.mrb[32].mxu1 }
 0x4f3   : > { %v5902_v35 = vadd.f32 %v11357_v4, %v13922_v53  ;;  %v5734_v18 = vpop.f32.mrb[33].mxu1 }
 0x4f4   : > { %v5900_v62 = vadd.f32 %v13922_v53, %v5734_v18  ;;  %v11358_v42 = vpop.f32.mrb[34].mxu1 }
 0x4f5   : > { %v5934_v43 = vmax.f32 %v5902_v35, 0.0  ;;  %v5903_v55 = vadd.f32 %v11358_v42, %v13922_v53  ;;  %v5737_v60 = vpop.f32.mrb[35].mxu1 }
 0x4f6   : > { %v5932_v51 = vmax.f32 %v5900_v62, 0.0  ;;  %v5901_v9 = vadd.f32 %v13922_v53, %v5737_v60 }
 0x4f7   : > { %5966 = vst.msk [vmem:[#allocation2 + $0x31] sm:$0xff] %vm374_vm1, %v5934_v43  ;;  %v5935_v33 = vmax.f32 %v5903_v55, 0.0 }
 0x4f8   : > { %5964 = vst.msk [vmem:[#allocation2 + $0x19] sm:$0xff] %vm374_vm1, %v5932_v51  ;;  %v5933_v25 = vmax.f32 %v5901_v9, 0.0 }
 0x4f9   : > { %5967 = vst.msk [vmem:[#allocation2 + $0x39] sm:$0xff] %vm374_vm1, %v5935_v33 }
 0x4fa   : > { %5965 = vst.msk [vmem:[#allocation2 + $0x21] sm:$0xff] %vm374_vm1, %v5933_v25  ;;  %v11361_v22 = vpop.f32.mrb[36].mxu1 }
 0x4fb   : > { %v5906_v59 = vadd.f32 %v11361_v22, %v13922_v53  ;;  %v5750_v8 = vpop.f32.mrb[37].mxu1 }
 0x4fc   : > { %v5904_v41 = vadd.f32 %v13922_v53, %v5750_v8  ;;  %v11362_v32 = vpop.f32.mrb[38].mxu1 }
 0x4fd   : > { %v5938_v29 = vmax.f32 %v5906_v59, 0.0  ;;  %v5907_v20 = vadd.f32 %v11362_v32, %v13922_v53  ;;  %v5753_v0 = vpop.f32.mrb[39].mxu1 }
 0x4fe   : > { %v5936_v6 = vmax.f32 %v5904_v41, 0.0  ;;  %v5905_v47 = vadd.f32 %v13922_v53, %v5753_v0  ;;  %v6052_v61 = vld [vmem:[#allocation2 + $0x31] sm:$0xff] }
 0x4ff   : > { %5970 = vst.msk [vmem:[#allocation2 + $0x61] sm:$0xff] %vm374_vm1, %v5938_v29  ;;  %v5939_v5 = vmax.f32 %v5907_v20, 0.0  ;;  %v6050_v31 = vld [vmem:[#allocation2 + $0x19] sm:$0xff] }
 0x500   : > { %5968 = vst.msk [vmem:[#allocation2 + $0x49] sm:$0xff] %vm374_vm1, %v5936_v6  ;;  %v5937_v24 = vmax.f32 %v5905_v47, 0.0  ;;  %v6053_v14 = vld [vmem:[#allocation2 + $0x39] sm:$0xff] }
 0x501   : > { %5971 = vst.msk [vmem:[#allocation2 + $0x69] sm:$0xff] %vm374_vm1, %v5939_v5  ;;  %v6051_v3 = vld [vmem:[#allocation2 + $0x21] sm:$0xff]  ;;  %v13946_v46 = vpack.c.bf16 %v6053_v14, %v6052_v61 }
 0x502   : > { %5969 = vst.msk [vmem:[#allocation2 + $0x51] sm:$0xff] %vm374_vm1, %v5937_v24  ;;  %v11365_v58 = vpop.f32.mrb[40].mxu1  ;;  %v13940_v23 = vpack.c.bf16 %v6051_v3, %v6050_v31 }
 0x503   : > { %v5910_v63 = vadd.f32 %v11365_v58, %v13922_v53  ;;  %v5766_v37 = vpop.f32.mrb[41].mxu1 }
 0x504   : > { %v5908_v34 = vadd.f32 %v13922_v53, %v5766_v37  ;;  %v11366_v28 = vpop.f32.mrb[42].mxu1  ;;  %11392 = vmatmul.mubr.msk.bf16.vlgmr.msra.gmra.mrb[32].mxu0 %vm374_vm1, %v13940_v23 }
 0x505   : > { %v5942_v38 = vmax.f32 %v5910_v63, 0.0  ;;  %v5911_v2 = vadd.f32 %v11366_v28, %v13922_v53  ;;  %11424 = vmatpush3.bf16.msra.mxu0 %v12540_v26  ;;  %v5769_v45 = vpop.f32.mrb[43].mxu1  ;;  %11395 = vmatprep.mubr.msk.bf16.mxu0 %vm374_vm1, %v13946_v46 }
 0x506   : > { %v5940_v10 = vmax.f32 %v5908_v34, 0.0  ;;  %v5909_v49 = vadd.f32 %v13922_v53, %v5769_v45  ;;  %11425 = vmatprep.subr.bf16.mxu0 %v12541_v11  ;;  %v6056_v56 = vld [vmem:[#allocation2 + $0x61] sm:$0xff] }
 0x507   : > { %5974 = vst.msk [vmem:[#allocation2 + $0x91] sm:$0xff] %vm374_vm1, %v5942_v38  ;;  %v5943_v19 = vmax.f32 %v5911_v2, 0.0  ;;  %v6054_v17 = vld [vmem:[#allocation2 + $0x49] sm:$0xff] }
 0x508   : > { %5972 = vst.msk [vmem:[#allocation2 + $0x79] sm:$0xff] %vm374_vm1, %v5940_v10  ;;  %v5941_v7 = vmax.f32 %v5909_v49, 0.0  ;;  %v6057_v50 = vld [vmem:[#allocation2 + $0x69] sm:$0xff] }
 0x509   : > { %5975 = vst.msk [vmem:[#allocation2 + $0x99] sm:$0xff] %vm374_vm1, %v5943_v19  ;;  %v6055_v30 = vld [vmem:[#allocation2 + $0x51] sm:$0xff]  ;;  %11426 = vmatpush3.bf16.msra.mxu0 %v12541_v11  ;;  %v13968_v15 = vpack.c.bf16 %v6057_v50, %v6056_v56 }
 0x50a   : > { %5973 = vst.msk [vmem:[#allocation2 + $0x81] sm:$0xff] %vm374_vm1, %v5941_v7  ;;  %v11369_v52 = vpop.f32.mrb[44].mxu1  ;;  %v13964_v16 = vpack.c.bf16 %v6055_v30, %v6054_v17  ;;  %11459 = vmatprep.subr.bf16.mxu0 %v13958_v54 }
 0x50b   : > { %v5914_v13 = vadd.f32 %v11369_v52, %v13922_v53  ;;  %v5782_v1 = vpop.f32.mrb[45].mxu1 }
 0x50c   : > { %v5912_v27 = vadd.f32 %v13922_v53, %v5782_v1  ;;  %v11370_v21 = vpop.f32.mrb[46].mxu1  ;;  %11396 = vmatmul.mubr.msk.bf16.gmra.mrb[36].mxu0 %vm374_vm1, %v13964_v16 }
 0x50d   : > { %v5946_v12 = vmax.f32 %v5914_v13, 0.0  ;;  %v5915_v57 = vadd.f32 %v11370_v21, %v13922_v53  ;;  %v5785_v40 = vpop.f32.mrb[47].mxu1  ;;  %11399 = vmatprep.mubr.msk.bf16.mxu0 %vm374_vm1, %v13968_v15 }
 0x50e   : > { %v5944_v36 = vmax.f32 %v5912_v27, 0.0  ;;  %v5913_v44 = vadd.f32 %v13922_v53, %v5785_v40  ;;  %v6060_v42 = vld [vmem:[#allocation2 + $0x91] sm:$0xff] }
 0x50f   : > { %5978 = vst.msk [vmem:[#allocation2 + $0xc1] sm:$0xff] %vm374_vm1, %v5946_v12  ;;  %v5947_v48 = vmax.f32 %v5915_v57, 0.0  ;;  %v6058_v4 = vld [vmem:[#allocation2 + $0x79] sm:$0xff] }
 0x510   : > { %5976 = vst.msk [vmem:[#allocation2 + $0xa9] sm:$0xff] %vm374_vm1, %v5944_v36  ;;  %v5945_v39 = vmax.f32 %v5913_v44, 0.0  ;;  %v6061_v26 = vld [vmem:[#allocation2 + $0x99] sm:$0xff] }
 0x511   : > { %5979 = vst.msk [vmem:[#allocation2 + $0xc9] sm:$0xff] %vm374_vm1, %v5947_v48  ;;  %v6059_v35 = vld [vmem:[#allocation2 + $0x81] sm:$0xff]  ;;  %v13984_v60 = vpack.c.bf16 %v6061_v26, %v6060_v42 }
 0x512   : > { %5977 = vst.msk [vmem:[#allocation2 + $0xb1] sm:$0xff] %vm374_vm1, %v5945_v39  ;;  %v11373_v18 = vpop.f32.mrb[48].mxu1  ;;  %v13981_v62 = vpack.c.bf16 %v6059_v35, %v6058_v4 }
 0x513   : > { %v5918_v43 = vadd.f32 %v11373_v18, %v13922_v53  ;;  %v5798_v55 = vpop.f32.mrb[49].mxu1 }
 0x514   : > { %v5916_v51 = vadd.f32 %v13922_v53, %v5798_v55  ;;  %v11374_v9 = vpop.f32.mrb[50].mxu1  ;;  %11400 = vmatmul.mubr.msk.bf16.gmra.mrb[40].mxu0 %vm374_vm1, %v13981_v62 }
 0x515   : > { %v5950_v33 = vmax.f32 %v5918_v43, 0.0  ;;  %v5919_v25 = vadd.f32 %v11374_v9, %v13922_v53  ;;  %v5801_v22 = vpop.f32.mrb[51].mxu1  ;;  %11403 = vmatprep.mubr.msk.bf16.mxu0 %vm374_vm1, %v13984_v60 }
 0x516   : > { %v5948_v59 = vmax.f32 %v5916_v51, 0.0  ;;  %v5917_v8 = vadd.f32 %v13922_v53, %v5801_v22  ;;  %v6064_v5 = vld [vmem:[#allocation2 + $0xc1] sm:$0xff] }
 0x517   : > { %5982 = vst.msk [vmem:[#allocation2 + $0xf1] sm:$0xff] %vm374_vm1, %v5950_v33  ;;  %v5951_v41 = vmax.f32 %v5919_v25, 0.0  ;;  %v6062_v20 = vld [vmem:[#allocation2 + $0xa9] sm:$0xff] }
 0x518   : > { %5980 = vst.msk [vmem:[#allocation2 + $0xd9] sm:$0xff] %vm374_vm1, %v5948_v59  ;;  %v5949_v32 = vmax.f32 %v5917_v8, 0.0  ;;  %v6065_v29 = vld [vmem:[#allocation2 + $0xc9] sm:$0xff] }
 0x519   : > { %5983 = vst.msk [vmem:[#allocation2 + $0xf9] sm:$0xff] %vm374_vm1, %v5951_v41  ;;  %v6063_v0 = vld [vmem:[#allocation2 + $0xb1] sm:$0xff]  ;;  %v14000_v31 = vpack.c.bf16 %v6065_v29, %v6064_v5  ;;  %v5997_v5 = vld [vmem:[#allocation2 + $0x8] sm:$0xff] }
 0x51a   : > { %5981 = vst.msk [vmem:[#allocation2 + $0xe1] sm:$0xff] %vm374_vm1, %v5949_v32  ;;  %v11377_v6 = vpop.f32.mrb[52].mxu1  ;;  %v13997_v47 = vpack.c.bf16 %v6063_v0, %v6062_v20 }
 0x51b   : > { %v5922_v24 = vadd.f32 %v11377_v6, %v13922_v53  ;;  %v5814_v14 = vpop.f32.mrb[53].mxu1  ;;  %v5996_v6 = vld [vmem:[#allocation2] sm:$0xff] }
 0x51c   : > { %v5920_v3 = vadd.f32 %v13922_v53, %v5814_v14  ;;  %v11378_v58 = vpop.f32.mrb[54].mxu1  ;;  %11404 = vmatmul.mubr.msk.bf16.gmra.mrb[44].mxu0 %vm374_vm1, %v13997_v47 }
 0x51d   : > { %v5954_v61 = vmax.f32 %v5922_v24, 0.0  ;;  %v5923_v11 = vadd.f32 %v11378_v58, %v13922_v53  ;;  %v5817_v63 = vpop.f32.mrb[55].mxu1  ;;  %11407 = vmatprep.mubr.msk.bf16.mxu0 %vm374_vm1, %v14000_v31  ;;  %v6028_v58 = vpack.c.bf16 %v5997_v5, %v5996_v6 }
 0x51e   : > { %v5952_v37 = vmax.f32 %v5920_v3, 0.0  ;;  %v5921_v34 = vadd.f32 %v13922_v53, %v5817_v63  ;;  %v6068_v7 = vld [vmem:[#allocation2 + $0xf1] sm:$0xff] }
 0x51f   : > { %5986 = vst.msk [vmem:[#allocation2 + $0x121] sm:$0xff] %vm374_vm1, %v5954_v61  ;;  %v5955_v28 = vmax.f32 %v5923_v11, 0.0  ;;  %v6066_v45 = vld [vmem:[#allocation2 + $0xd9] sm:$0xff] }
 0x520   : > { %5984 = vst.msk [vmem:[#allocation2 + $0x109] sm:$0xff] %vm374_vm1, %v5952_v37  ;;  %v5953_v38 = vmax.f32 %v5921_v34, 0.0  ;;  %v6069_v2 = vld [vmem:[#allocation2 + $0xf9] sm:$0xff] }
 0x521   : > { %5987 = vst.msk [vmem:[#allocation2 + $0x129] sm:$0xff] %vm374_vm1, %v5955_v28  ;;  %v6067_v10 = vld [vmem:[#allocation2 + $0xe1] sm:$0xff]  ;;  %v14016_v30 = vpack.c.bf16 %v6069_v2, %v6068_v7  ;;  %v6001_v34 = vld [vmem:[#allocation2 + $0x38] sm:$0xff]  ;;  %v6000_v2 = vld [vmem:[#allocation2 + $0x30] sm:$0xff] }
 0x522   : > { %5985 = vst.msk [vmem:[#allocation2 + $0x111] sm:$0xff] %vm374_vm1, %v5953_v38  ;;  %v11381_v49 = vpop.f32.mrb[56].mxu1  ;;  %v14013_v19 = vpack.c.bf16 %v6067_v10, %v6066_v45  ;;  %v5999_v37 = vld [vmem:[#allocation2 + $0x20] sm:$0xff]  ;;  %v5998_v28 = vld [vmem:[#allocation2 + $0x18] sm:$0xff]  ;;  %v12543_v45 = vld [vmem:[%s14586_s5 + $0x28] sm:$0xff]   ;;  %v14081_v10 = vpack.c.bf16 %v6001_v34, %v6000_v2 }
 0x523   : > { %v5926_v50 = vadd.f32 %v11381_v49, %v13922_v53  ;;  %v5830_v17 = vpop.f32.mrb[57].mxu1  ;;  %v14076_v38 = vpack.c.bf16 %v5999_v37, %v5998_v28  ;;  %v14091_v49 = vld [vmem:[%s14586_s5 + $0x30] sm:$0xff]   ;;  %v6545_v28 = vld [vmem:[#allocation2 + $0x1a] sm:$0xff]  ;;  %v6546_v2 = vld [vmem:[#allocation2 + $0x22] sm:$0xff] }
 0x524   : > { %v5924_v52 = vadd.f32 %v13922_v53, %v5830_v17  ;;  %v11382_v56 = vpop.f32.mrb[58].mxu1  ;;  %11408 = vmatmul.mubr.msk.bf16.gmra.mrb[48].mxu0 %vm374_vm1, %v14013_v19  ;;  %10683 = vmatprep.subr.bf16.mxu1 %v14013_v19  ;;  %v6003_v7 = vld [vmem:[#allocation2 + $0x50] sm:$0xff]  ;;  %v6002_v17 = vld [vmem:[#allocation2 + $0x48] sm:$0xff] }
 0x525   : > { %v5958_v13 = vmax.f32 %v5926_v50, 0.0  ;;  %v5927_v1 = vadd.f32 %v11382_v56, %v13922_v53  ;;  %v5833_v27 = vpop.f32.mrb[59].mxu1  ;;  %11411 = vmatprep.mubr.msk.bf16.mxu0 %vm374_vm1, %v14016_v30  ;;  %10684 = vmatpush3.bf16.msra.mxu1 %v13940_v23  ;;  %v6005_v50 = vld [vmem:[#allocation2 + $0x68] sm:$0xff]  ;;  %v6004_v56 = vld [vmem:[#allocation2 + $0x60] sm:$0xff] }
 0x526   : > { %v5956_v21 = vmax.f32 %v5924_v52, 0.0  ;;  %v5925_v12 = vadd.f32 %v13922_v53, %v5833_v27  ;;  %10685 = vmatprep.subr.bf16.mxu1 %v14016_v30  ;;  %v6072_v4 = vld [vmem:[#allocation2 + $0x121] sm:$0xff]  ;;  %v14093_v52 = vpack.c.bf16 %v6003_v7, %v6002_v17  ;;  %v6006_v27 = vld [vmem:[#allocation2 + $0x78] sm:$0xff] }
 0x527   : > { %5990 = vst.msk [vmem:[#allocation2 + $0x151] sm:$0xff] %vm374_vm1, %v5958_v13  ;;  %v5959_v57 = vmax.f32 %v5927_v1, 0.0  ;;  %v6070_v44 = vld [vmem:[#allocation2 + $0x109] sm:$0xff]  ;;  %v14096_v13 = vpack.c.bf16 %v6005_v50, %v6004_v56  ;;  %v6009_v1 = vld [vmem:[#allocation2 + $0x98] sm:$0xff]  ;;  %v14147_v50 = vpack.c.bf16 %v6546_v2, %v6545_v28 }
 0x528   : > { %5988 = vst.msk [vmem:[#allocation2 + $0x139] sm:$0xff] %vm374_vm1, %v5956_v21  ;;  %v5957_v40 = vmax.f32 %v5925_v12, 0.0  ;;  %v6073_v36 = vld [vmem:[#allocation2 + $0x129] sm:$0xff]  ;;  %v6548_v7 = vld [vmem:[#allocation2 + $0x3a] sm:$0xff] }
 0x529   : > { %5991 = vst.msk [vmem:[#allocation2 + $0x159] sm:$0xff] %vm374_vm1, %v5959_v57  ;;  %10686 = vmatpush3.bf16.msra.mxu1 %v13946_v46  ;;  %v6071_v48 = vld [vmem:[#allocation2 + $0x111] sm:$0xff]  ;;  %v14036_v42 = vpack.c.bf16 %v6073_v36, %v6072_v4  ;;  %v6013_v36 = vld [vmem:[#allocation2 + $0xc8] sm:$0xff] }
 0x52a   : > { %5989 = vst.msk [vmem:[#allocation2 + $0x141] sm:$0xff] %vm374_vm1, %v5957_v40  ;;  %v11385_v39 = vpop.f32.mrb[60].mxu1  ;;  %v14033_v26 = vpack.c.bf16 %v6071_v48, %v6070_v44  ;;  %v6008_v12 = vld [vmem:[#allocation2 + $0x90] sm:$0xff]  ;;  %v6010_v44 = vld [vmem:[#allocation2 + $0xa8] sm:$0xff]  ;;  %v12545_v17 = vld [vmem:[%s14586_s5 + $0x38] sm:$0xff]  }
 0x52b   : > { %v5930_v35 = vadd.f32 %v11385_v39, %v13922_v53  ;;  %v5846_v18 = vpop.f32.mrb[61].mxu1  ;;  %v14104_v57 = vpack.c.bf16 %v6009_v1, %v6008_v12  ;;  %v6011_v40 = vld [vmem:[#allocation2 + $0xb0] sm:$0xff]  ;;  %v6012_v39 = vld [vmem:[#allocation2 + $0xc0] sm:$0xff] }
 0x52c   : > { %v5928_v43 = vadd.f32 %v13922_v53, %v5846_v18  ;;  %v11386_v55 = vpop.f32.mrb[62].mxu1  ;;  %11412 = vmatmul.mubr.msk.bf16.gmra.mrb[52].mxu0 %vm374_vm1, %v14033_v26  ;;  %10687 = vmatprep.subr.bf16.mxu1 %v14033_v26  ;;  %v14110_v48 = vpack.c.bf16 %v6011_v40, %v6010_v44  ;;  %v14112_v4 = vpack.c.bf16 %v6013_v36, %v6012_v39  ;;  %v6017_v18 = vld [vmem:[#allocation2 + $0xf8] sm:$0xff]  ;;  %v6549_v1 = vld [vmem:[#allocation2 + $0x4a] sm:$0xff]  ;;  %v6551_v12 = vld [vmem:[#allocation2 + $0x62] sm:$0xff] }
 0x52d   : > { %v5962_v51 = vmax.f32 %v5930_v35, 0.0  ;;  %v5931_v9 = vadd.f32 %v11386_v55, %v13922_v53  ;;  %v5849_v33 = vpop.f32.mrb[63].mxu1  ;;  %11415 = vmatprep.mubr.msk.bf16.mxu0 %vm374_vm1, %v14036_v42  ;;  %10688 = vmatpush3.bf16.msra.mxu1 %v13964_v16  ;;  %v6015_v35 = vld [vmem:[#allocation2 + $0xe0] sm:$0xff]  ;;  %v6552_v40 = vld [vmem:[#allocation2 + $0x6a] sm:$0xff]  ;;  %v6566_v28 = vld [vmem:[#allocation2 + $0x112] sm:$0xff] }
 0x52e   : > { %v5960_v25 = vmax.f32 %v5928_v43, 0.0  ;;  %v5929_v22 = vadd.f32 %v13922_v53, %v5849_v33  ;;  %10689 = vmatprep.subr.bf16.mxu1 %v14036_v42  ;;  %v6076_v53 = vld [vmem:[#allocation2 + $0x151] sm:$0xff]  ;;  %v14164_v44 = vpack.c.bf16 %v6552_v40, %v6551_v12  ;;  %v6554_v39 = vld [vmem:[#allocation2 + $0x82] sm:$0xff] }
 0x52f   : > { %5994 = vst.msk [vmem:[#allocation2 + $0x181] sm:$0xff] %vm374_vm1, %v5962_v51  ;;  %v5963_v59 = vmax.f32 %v5931_v9, 0.0  ;;  %v6074_v32 = vld [vmem:[#allocation2 + $0x139] sm:$0xff]  ;;  %v6016_v51 = vld [vmem:[#allocation2 + $0xf0] sm:$0xff]  ;;  %v6567_v2 = vld [vmem:[#allocation2 + $0x122] sm:$0xff] }
 0x530   : > { %5992 = vst.msk [vmem:[#allocation2 + $0x169] sm:$0xff] %vm374_vm1, %v5960_v25  ;;  %v5961_v8 = vmax.f32 %v5929_v22, 0.0  ;;  %v6077_v41 = vld [vmem:[#allocation2 + $0x159] sm:$0xff]  ;;  %v14120_v9 = vpack.c.bf16 %v6017_v18, %v6016_v51  ;;  %v6019_v33 = vld [vmem:[#allocation2 + $0x110] sm:$0xff]  ;;  %v6021_v25 = vld [vmem:[#allocation2 + $0x128] sm:$0xff] }
 0x531   : > { %5995 = vst.msk [vmem:[#allocation2 + $0x189] sm:$0xff] %vm374_vm1, %v5963_v59  ;;  %10690 = vmatpush3.bf16.msra.mxu1 %v13968_v15  ;;  %v6075_v29 = vld [vmem:[#allocation2 + $0x141] sm:$0xff]  ;;  %v14055_v0 = vpack.c.bf16 %v6077_v41, %v6076_v53  ;;  %v6014_v43 = vld [vmem:[#allocation2 + $0xd8] sm:$0xff]  ;;  %v6024_v5 = vld [vmem:[#allocation2 + $0x150] sm:$0xff] }
 0x532   : > { %5993 = vst.msk [vmem:[#allocation2 + $0x171] sm:$0xff] %vm374_vm1, %v5961_v8  ;;  %v14053_v20 = vpack.c.bf16 %v6075_v29, %v6074_v32  ;;  %v14118_v55 = vpack.c.bf16 %v6015_v35, %v6014_v43  ;;  %v6018_v22 = vld [vmem:[#allocation2 + $0x108] sm:$0xff]  ;;  %v6020_v8 = vld [vmem:[#allocation2 + $0x120] sm:$0xff]  ;;  %v6025_v29 = vld [vmem:[#allocation2 + $0x158] sm:$0xff] }
 0x533   : > { %v14126_v59 = vpack.c.bf16 %v6019_v33, %v6018_v22  ;;  %v14128_v41 = vpack.c.bf16 %v6021_v25, %v6020_v8  ;;  %v6023_v32 = vld [vmem:[#allocation2 + $0x140] sm:$0xff]  ;;  %v6022_v53 = vld [vmem:[#allocation2 + $0x138] sm:$0xff]  ;;  %v6557_v33 = vld [vmem:[#allocation2 + $0xaa] sm:$0xff] }
 0x534   : > { %11416 = vmatmul.mubr.msk.bf16.gmra.mrb[56].mxu0 %vm374_vm1, %v14053_v20  ;;  %10691 = vmatprep.subr.bf16.mxu1 %v14053_v20  ;;  %v14134_v6 = vpack.c.bf16 %v6023_v32, %v6022_v53  ;;  %v6555_v35 = vld [vmem:[#allocation2 + $0x92] sm:$0xff]  ;;  %v6556_v18 = vld [vmem:[#allocation2 + $0x9a] sm:$0xff]  ;;  %v6559_v22 = vld [vmem:[#allocation2 + $0xc2] sm:$0xff] }
 0x535   : > { %11419 = vmatprep.mubr.msk.bf16.mxu0 %vm374_vm1, %v14055_v0  ;;  %10692 = vmatpush3.bf16.msra.mxu1 %v13981_v62  ;;  %v14172_v51 = vpack.c.bf16 %v6556_v18, %v6555_v35  ;;  %v6558_v25 = vld [vmem:[#allocation2 + $0xb2] sm:$0xff]  ;;  %v6560_v8 = vld [vmem:[#allocation2 + $0xca] sm:$0xff]  ;;  %v6561_v53 = vld [vmem:[#allocation2 + $0xda] sm:$0xff] }
 0x536   : > { %10693 = vmatprep.subr.bf16.mxu1 %v14055_v0  ;;  %v9106_v11 = vld [vmem:[#allocation2 + $0x181] sm:$0xff]  ;;  %v14178_v32 = vpack.c.bf16 %v6558_v25, %v6557_v33  ;;  %v6571_v12 = vld [vmem:[#allocation2 + $0x152] sm:$0xff] }
 0x537   : > { %v6078_v24 = vld [vmem:[#allocation2 + $0x169] sm:$0xff]  ;;  %v6572_v40 = vld [vmem:[#allocation2 + $0x15a] sm:$0xff] }
 0x538   : > { %v9107_v3 = vld [vmem:[#allocation2 + $0x189] sm:$0xff] }
 0x539   : > { %10694 = vmatpush3.bf16.msra.mxu1 %v13984_v60  ;;  %v6079_v14 = vld [vmem:[#allocation2 + $0x171] sm:$0xff]  ;;  %v14070_v63 = vpack.c.bf16 %v9107_v3, %v9106_v11  ;;  %v6026_v11 = vld [vmem:[#allocation2 + $0x168] sm:$0xff] }
 0x53a   : > { %v14065_v61 = vpack.c.bf16 %v6079_v14, %v6078_v24  ;;  %v14136_v24 = vpack.c.bf16 %v6025_v29, %v6024_v5  ;;  %v6543_v14 = vld [vmem:[#allocation2 + $0x2] sm:$0xff]  ;;  %v6544_v3 = vld [vmem:[#allocation2 + $0xa] sm:$0xff]  ;;  %v14180_v29 = vpack.c.bf16 %v6560_v8, %v6559_v22  ;;  %v6574_v18 = vld [vmem:[#allocation2 + $0x172] sm:$0xff] }
 0x53b   : > { %v6575_v37 = vpack.c.bf16 %v6544_v3, %v6543_v14  ;;  %v6562_v5 = vld [vmem:[#allocation2 + $0xe2] sm:$0xff]  ;;  %v6563_v14 = vld [vmem:[#allocation2 + $0xf2] sm:$0xff]  ;;  %v6564_v3 = vld [vmem:[#allocation2 + $0xfa] sm:$0xff] }
 0x53c   : > { %11420 = vmatmul.mubr.msk.bf16.gmra.mrb[60].mxu0 %vm374_vm1, %v14065_v61  ;;  %10695 = vmatprep.subr.bf16.mxu1 %v14065_v61  ;;  %v6573_v35 = vld [vmem:[#allocation2 + $0x16a] sm:$0xff] }
 0x53d   : > { %10696 = vmatpush3.bf16.msra.mxu1 %v13997_v47  ;;  %11427 = vmatprep.mubr.msk.bf16.mxu0 %vm374_vm1, %v6028_v58  ;;  %v6027_v58 = vld [vmem:[#allocation2 + $0x170] sm:$0xff]  ;;  %v14210_v33 = vpack.c.bf16 %v6574_v18, %v6573_v35  ;;  %v12547_v25 = vld [vmem:[%s14586_s5 + $0x48] sm:$0xff]  }
 0x53e   : > { %10697 = vmatprep.subr.bf16.mxu1 %v14070_v63  ;;  %v14142_v34 = vpack.c.bf16 %v6027_v58, %v6026_v11  ;;  %v14186_v58 = vpack.c.bf16 %v6562_v5, %v6561_v53  ;;  %v14188_v11 = vpack.c.bf16 %v6564_v3, %v6563_v14  ;;  %v12548_v22 = vld [vmem:[%s14586_s5 + $0x50] sm:$0xff]   ;;  %v12549_v53 = vld [vmem:[%s14586_s5 + $0x58] sm:$0xff]   ;;  %v12550_v5 = vld [vmem:[%s14586_s5 + $0x60] sm:$0xff]  }
 0x53f   : > { %v8088_v3 = vld [vmem:[#allocation2 + $0xe1] sm:$0xff] }
 0x540   : > { %v8093_v18 = vld [vmem:[#allocation2 + $0x121] sm:$0xff] }
 0x541   : > { %10698 = vmatpush3.bf16.msra.mxu1 %v14000_v31 }
 0x544   : > { %11428 = vmatmul.mubr.msk.bf16.vlgmr.msra.gmra.mrb[32].mxu0 %vm374_vm1, %v14076_v38 }
 0x545   : > { %11460 = vmatpush3.bf16.msra.mxu0 %v13958_v54  ;;  %11431 = vmatprep.mubr.msk.bf16.mxu0 %vm374_vm1, %v14081_v10  ;;  %v6007_v54 = vld [vmem:[#allocation2 + $0x80] sm:$0xff] }
 0x546   : > { %11461 = vmatprep.subr.bf16.mxu0 %v12543_v45  ;;  %v14102_v21 = vpack.c.bf16 %v6007_v54, %v6006_v27  ;;  %v12546_v54 = vld [vmem:[%s14586_s5 + $0x40] sm:$0xff]   ;;  %v6550_v27 = vld [vmem:[#allocation2 + $0x52] sm:$0xff] }
 0x547   : > { %v14162_v36 = vpack.c.bf16 %v6550_v27, %v6549_v1  ;;  %v6569_v1 = vld [vmem:[#allocation2 + $0x13a] sm:$0xff]  ;;  %v6570_v27 = vld [vmem:[#allocation2 + $0x142] sm:$0xff] }
 0x549   : > { %11462 = vmatpush3.bf16.msra.mxu0 %v12543_v45  ;;  %v6547_v45 = vld [vmem:[#allocation2 + $0x32] sm:$0xff] }
 0x54a   : > { %11495 = vmatprep.subr.bf16.mxu0 %v14091_v49  ;;  %v14152_v56 = vpack.c.bf16 %v6548_v7, %v6547_v45  ;;  %v6568_v45 = vld [vmem:[#allocation2 + $0x12a] sm:$0xff] }
 0x54c   : > { %11432 = vmatmul.mubr.msk.bf16.gmra.mrb[36].mxu0 %vm374_vm1, %v14093_v52 }
 0x54d   : > { %11435 = vmatprep.mubr.msk.bf16.mxu0 %vm374_vm1, %v14096_v13 }
 0x554   : > { %11436 = vmatmul.mubr.msk.bf16.gmra.mrb[40].mxu0 %vm374_vm1, %v14102_v21 }
 0x555   : > { %11439 = vmatprep.mubr.msk.bf16.mxu0 %vm374_vm1, %v14104_v57 }
 0x55c   : > { %11440 = vmatmul.mubr.msk.bf16.gmra.mrb[44].mxu0 %vm374_vm1, %v14110_v48 }
 0x55d   : > { %11443 = vmatprep.mubr.msk.bf16.mxu0 %vm374_vm1, %v14112_v4 }
 0x564   : > { %11444 = vmatmul.mubr.msk.bf16.gmra.mrb[48].mxu0 %vm374_vm1, %v14118_v55 }
 0x565   : > { %11447 = vmatprep.mubr.msk.bf16.mxu0 %vm374_vm1, %v14120_v9 }
 0x56c   : > { %11448 = vmatmul.mubr.msk.bf16.gmra.mrb[52].mxu0 %vm374_vm1, %v14126_v59 }
 0x56d   : > { %11451 = vmatprep.mubr.msk.bf16.mxu0 %vm374_vm1, %v14128_v41 }
 0x574   : > { %11452 = vmatmul.mubr.msk.bf16.gmra.mrb[56].mxu0 %vm374_vm1, %v14134_v6 }
 0x575   : > { %11455 = vmatprep.mubr.msk.bf16.mxu0 %vm374_vm1, %v14136_v24 }
 0x57c   : > { %11456 = vmatmul.mubr.msk.bf16.gmra.mrb[60].mxu0 %vm374_vm1, %v14142_v34 }
 0x57d   : > { %11463 = vmatprep.mubr.msk.bf16.mxu0 %vm374_vm1, %v6575_v37  ;;  %v6565_v37 = vld [vmem:[#allocation2 + $0x10a] sm:$0xff] }
 0x57e   : > { %v14194_v7 = vpack.c.bf16 %v6566_v28, %v6565_v37  ;;  %v8090_v37 = vld [vmem:[#allocation2 + $0xf9] sm:$0xff] }
 0x57f   : > { %v8087_v28 = vld [vmem:[#allocation2 + $0xd9] sm:$0xff] }
 0x584   : > { %11464 = vmatmul.mubr.msk.bf16.vlgmr.msra.gmra.mrb[32].mxu0 %vm374_vm1, %v14147_v50 }
 0x585   : > { %11496 = vmatpush3.bf16.msra.mxu0 %v14091_v49  ;;  %11467 = vmatprep.mubr.msk.bf16.mxu0 %vm374_vm1, %v14152_v56  ;;  %v6553_v49 = vld [vmem:[#allocation2 + $0x7a] sm:$0xff] }
 0x586   : > { %11497 = vmatprep.subr.bf16.mxu0 %v12545_v17  ;;  %v14170_v43 = vpack.c.bf16 %v6554_v39, %v6553_v49  ;;  %v14202_v49 = vpack.c.bf16 %v6570_v27, %v6569_v1  ;;  %v14204_v39 = vpack.c.bf16 %v6572_v40, %v6571_v12  ;;  %v8092_v27 = vld [vmem:[#allocation2 + $0x111] sm:$0xff]  ;;  %v8094_v12 = vld [vmem:[#allocation2 + $0x129] sm:$0xff] }
 0x587   : > { %v8091_v40 = vld [vmem:[#allocation2 + $0x109] sm:$0xff] }
 0x588   : > { %v8114_v35 = vpack.c.bf16 %v8092_v27, %v8091_v40 }
 0x589   : > { %11498 = vmatpush3.bf16.msra.mxu0 %v12545_v17  ;;  %v14196_v17 = vpack.c.bf16 %v6568_v45, %v6567_v2  ;;  %v8112_v2 = vpack.c.bf16 %v8088_v3, %v8087_v28  ;;  %v8089_v45 = vld [vmem:[#allocation2 + $0xf1] sm:$0xff] }
 0x58a   : > { %11531 = vmatprep.subr.bf16.mxu0 %v12546_v54  ;;  %v8113_v1 = vpack.c.bf16 %v8090_v37, %v8089_v45 }
 0x58c   : > { %11468 = vmatmul.mubr.msk.bf16.gmra.mrb[36].mxu0 %vm374_vm1, %v14162_v36 }
 0x58d   : > { %11471 = vmatprep.mubr.msk.bf16.mxu0 %vm374_vm1, %v14164_v44 }
 0x594   : > { %11472 = vmatmul.mubr.msk.bf16.gmra.mrb[40].mxu0 %vm374_vm1, %v14170_v43 }
 0x595   : > { %11475 = vmatprep.mubr.msk.bf16.mxu0 %vm374_vm1, %v14172_v51 }
 0x59c   : > { %11476 = vmatmul.mubr.msk.bf16.gmra.mrb[44].mxu0 %vm374_vm1, %v14178_v32 }
 0x59d   : > { %11479 = vmatprep.mubr.msk.bf16.mxu0 %vm374_vm1, %v14180_v29 }
 0x5a4   : > { %11480 = vmatmul.mubr.msk.bf16.gmra.mrb[48].mxu0 %vm374_vm1, %v14186_v58 }
 0x5a5   : > { %11483 = vmatprep.mubr.msk.bf16.mxu0 %vm374_vm1, %v14188_v11 }
 0x5ac   : > { %11484 = vmatmul.mubr.msk.bf16.gmra.mrb[52].mxu0 %vm374_vm1, %v14194_v7 }
 0x5ad   : > { %11487 = vmatprep.mubr.msk.bf16.mxu0 %vm374_vm1, %v14196_v17 }
 0x5b4   : > { %11488 = vmatmul.mubr.msk.bf16.gmra.mrb[56].mxu0 %vm374_vm1, %v14202_v49 }
 0x5b5   : > { %11491 = vmatprep.mubr.msk.bf16.mxu0 %vm374_vm1, %v14204_v39 }
 0x5bc   : > { %11492 = vmatmul.mubr.msk.bf16.gmra.mrb[60].mxu0 %vm374_vm1, %v14210_v33 }
 0x5bd   : > { %11499 = vmatprep.mubr.msk.bf16.mxu0 %vm374_vm1, %v14076_v38  ;;  %v6880_v38 = vld [vmem:[#allocation2 + $0x188] sm:$0xff] }
 0x5c4   : > { %11500 = vmatmul.mubr.msk.bf16.vlgmr.msra.gmra.mrb[32].mxu0 %vm374_vm1, %v14081_v10 }
 0x5c5   : > { %11532 = vmatpush3.bf16.msra.mxu0 %v12546_v54  ;;  %11503 = vmatprep.mubr.msk.bf16.mxu0 %vm374_vm1, %v14093_v52  ;;  %v6879_v54 = vld [vmem:[#allocation2 + $0x180] sm:$0xff] }
 0x5c6   : > { %11533 = vmatprep.subr.bf16.mxu0 %v12547_v25  ;;  %v14250_v8 = vpack.c.bf16 %v6880_v38, %v6879_v54  ;;  %v8098_v38 = vld [vmem:[#allocation2 + $0x159] sm:$0xff] }
 0x5c7   : > { %v8095_v54 = vld [vmem:[#allocation2 + $0x139] sm:$0xff] }
 0x5c9   : > { %11534 = vmatpush3.bf16.msra.mxu0 %v12547_v25  ;;  %v8115_v25 = vpack.c.bf16 %v8094_v12, %v8093_v18 }
 0x5ca   : > { %11567 = vmatprep.subr.bf16.mxu0 %v12548_v22 }
 0x5cc   : > { %11504 = vmatmul.mubr.msk.bf16.gmra.mrb[36].mxu0 %vm374_vm1, %v14096_v13 }
 0x5cd   : > { %11507 = vmatprep.mubr.msk.bf16.mxu0 %vm374_vm1, %v14102_v21 }
 0x5d4   : > { %11508 = vmatmul.mubr.msk.bf16.gmra.mrb[40].mxu0 %vm374_vm1, %v14104_v57 }
 0x5d5   : > { %11511 = vmatprep.mubr.msk.bf16.mxu0 %vm374_vm1, %v14110_v48 }
 0x5dc   : > { %11512 = vmatmul.mubr.msk.bf16.gmra.mrb[44].mxu0 %vm374_vm1, %v14112_v4 }
 0x5dd   : > { %11515 = vmatprep.mubr.msk.bf16.mxu0 %vm374_vm1, %v14118_v55 }
 0x5e4   : > { %11516 = vmatmul.mubr.msk.bf16.gmra.mrb[48].mxu0 %vm374_vm1, %v14120_v9 }
 0x5e5   : > { %11519 = vmatprep.mubr.msk.bf16.mxu0 %vm374_vm1, %v14126_v59 }
 0x5ec   : > { %11520 = vmatmul.mubr.msk.bf16.gmra.mrb[52].mxu0 %vm374_vm1, %v14128_v41 }
 0x5ed   : > { %11523 = vmatprep.mubr.msk.bf16.mxu0 %vm374_vm1, %v14134_v6 }
 0x5f4   : > { %11524 = vmatmul.mubr.msk.bf16.gmra.mrb[56].mxu0 %vm374_vm1, %v14136_v24 }
 0x5f5   : > { %11527 = vmatprep.mubr.msk.bf16.mxu0 %vm374_vm1, %v14142_v34 }
 0x5fc   : > { %11528 = vmatmul.mubr.msk.bf16.gmra.mrb[60].mxu0 %vm374_vm1, %v14250_v8 }
 0x5fd   : > { %11535 = vmatprep.mubr.msk.bf16.mxu0 %vm374_vm1, %v13940_v23  ;;  %v12551_v23 = vld [vmem:[%s14586_s5 + $0x68] sm:$0xff]  }
 0x604   : > { %11536 = vmatmul.mubr.msk.bf16.vlgmr.msra.gmra.mrb[32].mxu0 %vm374_vm1, %v13946_v46  ;;  %v12552_v46 = vld [vmem:[%s14586_s5 + $0x70] sm:$0xff]  }
 0x605   : > { %11568 = vmatpush3.bf16.msra.mxu0 %v12548_v22  ;;  %11539 = vmatprep.mubr.msk.bf16.mxu0 %vm374_vm1, %v13964_v16  ;;  %v7491_v16 = vld [vmem:[#allocation2 + $0x182] sm:$0xff] }
 0x606   : > { %11569 = vmatprep.subr.bf16.mxu0 %v12549_v53  ;;  %v8096_v22 = vld [vmem:[#allocation2 + $0x141] sm:$0xff] }
 0x609   : > { %11570 = vmatpush3.bf16.msra.mxu0 %v12549_v53  ;;  %v8097_v53 = vld [vmem:[#allocation2 + $0x151] sm:$0xff] }
 0x60a   : > { %11603 = vmatprep.subr.bf16.mxu0 %v12550_v5 }
 0x60c   : > { %11540 = vmatmul.mubr.msk.bf16.gmra.mrb[36].mxu0 %vm374_vm1, %v13968_v15  ;;  %v7492_v15 = vld [vmem:[#allocation2 + $0x18a] sm:$0xff] }
 0x60d   : > { %11543 = vmatprep.mubr.msk.bf16.mxu0 %vm374_vm1, %v13981_v62  ;;  %v14328_v62 = vpack.c.bf16 %v7492_v15, %v7491_v16  ;;  %v8099_v16 = vld [vmem:[#allocation2 + $0x169] sm:$0xff] }
 0x614   : > { %11544 = vmatmul.mubr.msk.bf16.gmra.mrb[40].mxu0 %vm374_vm1, %v13984_v60  ;;  %v12553_v60 = vld [vmem:[%s14586_s5 + $0x78] sm:$0xff]  }
 0x615   : > { %11547 = vmatprep.mubr.msk.bf16.mxu0 %vm374_vm1, %v13997_v47  ;;  %v12554_v47 = vld [vmem:[%s14586_s5 + $0x80] sm:$0xff]  }
 0x61c   : > { %11548 = vmatmul.mubr.msk.bf16.gmra.mrb[44].mxu0 %vm374_vm1, %v14000_v31  ;;  %v7797_v31 = vld [vmem:[#allocation2 + $0x198] sm:$0xff] }
 0x61d   : > { %11551 = vmatprep.mubr.msk.bf16.mxu0 %vm374_vm1, %v14013_v19  ;;  %v7798_v19 = vld [vmem:[#allocation2 + $0x1a0] sm:$0xff] }
 0x624   : > { %11552 = vmatmul.mubr.msk.bf16.gmra.mrb[48].mxu0 %vm374_vm1, %v14016_v30  ;;  %v7814_v30 = vpack.c.bf16 %v7798_v19, %v7797_v31  ;;  %v8103_v31 = vld [vmem:[#allocation2 + $0x199] sm:$0xff]  ;;  %v8104_v19 = vld [vmem:[#allocation2 + $0x1a1] sm:$0xff] }
 0x625   : > { %11555 = vmatprep.mubr.msk.bf16.mxu0 %vm374_vm1, %v14033_v26  ;;  %v8074_v26 = vld [vmem:[#allocation2 + $0x39] sm:$0xff] }
 0x62c   : > { %11556 = vmatmul.mubr.msk.bf16.gmra.mrb[52].mxu0 %vm374_vm1, %v14036_v42  ;;  %v8073_v42 = vld [vmem:[#allocation2 + $0x31] sm:$0xff] }
 0x62d   : > { %11559 = vmatprep.mubr.msk.bf16.mxu0 %vm374_vm1, %v14053_v20  ;;  %v8105_v20 = vpack.c.bf16 %v8074_v26, %v8073_v42 }
 0x634   : > { %11560 = vmatmul.mubr.msk.bf16.gmra.mrb[56].mxu0 %vm374_vm1, %v14055_v0  ;;  %v8076_v0 = vld [vmem:[#allocation2 + $0x51] sm:$0xff] }
 0x635   : > { %11563 = vmatprep.mubr.msk.bf16.mxu0 %vm374_vm1, %v14065_v61  ;;  %v8078_v61 = vld [vmem:[#allocation2 + $0x69] sm:$0xff] }
 0x63c   : > { %11564 = vmatmul.mubr.msk.bf16.gmra.mrb[60].mxu0 %vm374_vm1, %v14070_v63  ;;  %v8075_v63 = vld [vmem:[#allocation2 + $0x49] sm:$0xff] }
 0x63d   : > { %11571 = vmatprep.mubr.msk.bf16.mxu0 %vm374_vm1, %v14147_v50  ;;  %v8085_v50 = vld [vmem:[#allocation2 + $0xc1] sm:$0xff] }
 0x644   : > { %11572 = vmatmul.mubr.msk.bf16.vlgmr.msra.gmra.mrb[32].mxu0 %vm374_vm1, %v14152_v56 }
 0x645   : > { %11604 = vmatpush3.bf16.msra.mxu0 %v12550_v5  ;;  %11575 = vmatprep.mubr.msk.bf16.mxu0 %vm374_vm1, %v14162_v36  ;;  %v8117_v5 = vpack.c.bf16 %v8098_v38, %v8097_v53 }
 0x646   : > { %11605 = vmatprep.subr.bf16.mxu0 %v12551_v23 }
 0x649   : > { %11606 = vmatpush3.bf16.msra.mxu0 %v12551_v23  ;;  %v8100_v23 = vld [vmem:[#allocation2 + $0x171] sm:$0xff] }
 0x64a   : > { %11639 = vmatprep.subr.bf16.mxu0 %v12552_v46  ;;  %v8118_v15 = vpack.c.bf16 %v8100_v23, %v8099_v16 }
 0x64c   : > { %11576 = vmatmul.mubr.msk.bf16.gmra.mrb[36].mxu0 %vm374_vm1, %v14164_v44 }
 0x64d   : > { %11579 = vmatprep.mubr.msk.bf16.mxu0 %vm374_vm1, %v14170_v43 }
 0x654   : > { %11580 = vmatmul.mubr.msk.bf16.gmra.mrb[40].mxu0 %vm374_vm1, %v14172_v51 }
 0x655   : > { %11583 = vmatprep.mubr.msk.bf16.mxu0 %vm374_vm1, %v14178_v32 }
 0x65c   : > { %11584 = vmatmul.mubr.msk.bf16.gmra.mrb[44].mxu0 %vm374_vm1, %v14180_v29 }
 0x65d   : > { %11587 = vmatprep.mubr.msk.bf16.mxu0 %vm374_vm1, %v14186_v58 }
 0x664   : > { %11588 = vmatmul.mubr.msk.bf16.gmra.mrb[48].mxu0 %vm374_vm1, %v14188_v11 }
 0x665   : > { %11591 = vmatprep.mubr.msk.bf16.mxu0 %vm374_vm1, %v14194_v7 }
 0x66c   : > { %11592 = vmatmul.mubr.msk.bf16.gmra.mrb[52].mxu0 %vm374_vm1, %v14196_v17 }
 0x66d   : > { %11595 = vmatprep.mubr.msk.bf16.mxu0 %vm374_vm1, %v14202_v49 }
 0x674   : > { %11596 = vmatmul.mubr.msk.bf16.gmra.mrb[56].mxu0 %vm374_vm1, %v14204_v39 }
 0x675   : > { %11599 = vmatprep.mubr.msk.bf16.mxu0 %vm374_vm1, %v14210_v33 }
 0x67c   : > { %11600 = vmatmul.mubr.msk.bf16.gmra.mrb[60].mxu0 %vm374_vm1, %v14328_v62 }
 0x67d   : > { %11607 = vmatprep.mubr.msk.bf16.mxu0 %vm374_vm1, %v14081_v10  ;;  %v8106_v10 = vpack.c.bf16 %v8076_v0, %v8075_v63 }
 0x684   : > { %11608 = vmatmul.mubr.msk.bf16.vlgmr.msra.gmra.mrb[32].mxu0 %vm374_vm1, %v14093_v52  ;;  %v8077_v52 = vld [vmem:[#allocation2 + $0x61] sm:$0xff] }
 0x685   : > { %11640 = vmatpush3.bf16.msra.mxu0 %v12552_v46  ;;  %11611 = vmatprep.mubr.msk.bf16.mxu0 %vm374_vm1, %v14096_v13  ;;  %v12555_v13 = vld [vmem:[%s14586_s5 + $0x88] sm:$0xff]  }
 0x686   : > { %11641 = vmatprep.subr.bf16.mxu0 %v12553_v60  ;;  %v8102_v46 = vld [vmem:[#allocation2 + $0x189] sm:$0xff] }
 0x689   : > { %11642 = vmatpush3.bf16.msra.mxu0 %v12553_v60  ;;  %v8101_v60 = vld [vmem:[#allocation2 + $0x181] sm:$0xff] }
 0x68a   : > { %11675 = vmatprep.subr.bf16.mxu0 %v12554_v47 }
 0x68c   : > { %11612 = vmatmul.mubr.msk.bf16.gmra.mrb[36].mxu0 %vm374_vm1, %v14102_v21  ;;  %v8107_v21 = vpack.c.bf16 %v8078_v61, %v8077_v52 }
 0x68d   : > { %11615 = vmatprep.mubr.msk.bf16.mxu0 %vm374_vm1, %v14104_v57  ;;  %v8080_v57 = vld [vmem:[#allocation2 + $0x81] sm:$0xff] }
 0x694   : > { %11616 = vmatmul.mubr.msk.bf16.gmra.mrb[40].mxu0 %vm374_vm1, %v14110_v48  ;;  %v8082_v48 = vld [vmem:[#allocation2 + $0x99] sm:$0xff] }
 0x695   : > { %11619 = vmatprep.mubr.msk.bf16.mxu0 %vm374_vm1, %v14112_v4  ;;  %v8079_v4 = vld [vmem:[#allocation2 + $0x79] sm:$0xff] }
 0x69c   : > { %11620 = vmatmul.mubr.msk.bf16.gmra.mrb[44].mxu0 %vm374_vm1, %v14118_v55  ;;  %v8108_v55 = vpack.c.bf16 %v8080_v57, %v8079_v4 }
 0x69d   : > { %11623 = vmatprep.mubr.msk.bf16.mxu0 %vm374_vm1, %v14120_v9  ;;  %v8081_v9 = vld [vmem:[#allocation2 + $0x91] sm:$0xff] }
 0x6a4   : > { %11624 = vmatmul.mubr.msk.bf16.gmra.mrb[48].mxu0 %vm374_vm1, %v14126_v59  ;;  %v8109_v59 = vpack.c.bf16 %v8082_v48, %v8081_v9 }
 0x6a5   : > { %11627 = vmatprep.mubr.msk.bf16.mxu0 %vm374_vm1, %v14128_v41  ;;  %v8084_v41 = vld [vmem:[#allocation2 + $0xb1] sm:$0xff] }
 0x6ac   : > { %11628 = vmatmul.mubr.msk.bf16.gmra.mrb[52].mxu0 %vm374_vm1, %v14134_v6  ;;  %v8086_v6 = vld [vmem:[#allocation2 + $0xc9] sm:$0xff] }
 0x6ad   : > { %11631 = vmatprep.mubr.msk.bf16.mxu0 %vm374_vm1, %v14136_v24  ;;  %v8083_v24 = vld [vmem:[#allocation2 + $0xa9] sm:$0xff]  ;;  %v8111_v14 = vpack.c.bf16 %v8086_v6, %v8085_v50 }
 0x6b4   : > { %11632 = vmatmul.mubr.msk.bf16.gmra.mrb[56].mxu0 %vm374_vm1, %v14142_v34  ;;  %v8110_v34 = vpack.c.bf16 %v8084_v41, %v8083_v24 }
 0x6b5   : > { %11635 = vmatprep.mubr.msk.bf16.mxu0 %vm374_vm1, %v14250_v8  ;;  %v8116_v8 = vpack.c.bf16 %v8096_v22, %v8095_v54 }
 0x6bc   : > { %11636 = vmatmul.mubr.msk.bf16.gmra.mrb[60].mxu0 %vm374_vm1, %v7814_v30  ;;  %v8120_v30 = vpack.c.bf16 %v8104_v19, %v8103_v31 }
 0x6bd   : > { %11643 = vmatprep.mubr.msk.bf16.mxu0 %vm374_vm1, %v8105_v20 }
 0x6c4   : > { %11644 = vmatmul.mubr.msk.bf16.vlgmr.msra.gmra.mrb[32].mxu0 %vm374_vm1, %v8106_v10 }
 0x6c5   : > { %11676 = vmatpush3.bf16.msra.mxu0 %v12554_v47  ;;  %11647 = vmatprep.mubr.msk.bf16.mxu0 %vm374_vm1, %v8107_v21  ;;  %v8119_v47 = vpack.c.bf16 %v8102_v46, %v8101_v60 }
 0x6c6   : > { %11677 = vmatprep.subr.bf16.mxu0 %v12555_v13 }
 0x6c9   : > { %11678 = vmatpush3.bf16.msra.mxu0 %v12555_v13 }
 0x6cc   : > { %11648 = vmatmul.mubr.msk.bf16.gmra.mrb[36].mxu0 %vm374_vm1, %v8108_v55 }
 0x6cd   : > { %11651 = vmatprep.mubr.msk.bf16.mxu0 %vm374_vm1, %v8109_v59 }
 0x6d4   : > { %11652 = vmatmul.mubr.msk.bf16.gmra.mrb[40].mxu0 %vm374_vm1, %v8110_v34 }
 0x6d5   : > { %11655 = vmatprep.mubr.msk.bf16.mxu0 %vm374_vm1, %v8111_v14 }
 0x6dc   : > { %11656 = vmatmul.mubr.msk.bf16.gmra.mrb[44].mxu0 %vm374_vm1, %v8112_v2 }
 0x6dd   : > { %11659 = vmatprep.mubr.msk.bf16.mxu0 %vm374_vm1, %v8113_v1 }
 0x6e4   : > { %11660 = vmatmul.mubr.msk.bf16.gmra.mrb[48].mxu0 %vm374_vm1, %v8114_v35 }
 0x6e5   : > { %11663 = vmatprep.mubr.msk.bf16.mxu0 %vm374_vm1, %v8115_v25 }
 0x6ec   : > { %11664 = vmatmul.mubr.msk.bf16.gmra.mrb[52].mxu0 %vm374_vm1, %v8116_v8 }
 0x6ed   : > { %11667 = vmatprep.mubr.msk.bf16.mxu0 %vm374_vm1, %v8117_v5 }
 0x6f4   : > { %11668 = vmatmul.mubr.msk.bf16.gmra.mrb[56].mxu0 %vm374_vm1, %v8118_v15 }
 0x6f5   : > { %11671 = vmatprep.mubr.msk.bf16.mxu0 %vm374_vm1, %v8119_v47 }
 0x6fc   : > { %11672 = vmatmul.mubr.msk.bf16.gmra.mrb[60].mxu0 %vm374_vm1, %v8120_v30 }
 0x6fd   : > { %11679 = vmatprep.mubr.msk.bf16.mxu0 %vm374_vm1, %v14152_v56  ;;  %v8409_v56 = vld [vmem:[#allocation2 + $0x19a] sm:$0xff] }
 0x704   : > { %11680 = vmatmul.mubr.msk.bf16.vlgmr.msra.gmra.mrb[32].mxu0 %vm374_vm1, %v14162_v36  ;;  %v8410_v36 = vld [vmem:[#allocation2 + $0x1a2] sm:$0xff] }
 0x705   : > { %11683 = vmatprep.mubr.msk.bf16.mxu0 %vm374_vm1, %v14164_v44  ;;  %v8426_v44 = vpack.c.bf16 %v8410_v36, %v8409_v56 }
 0x70c   : > { %11684 = vmatmul.mubr.msk.bf16.gmra.mrb[36].mxu0 %vm374_vm1, %v14170_v43  ;;  %v14422_v43 = vld [vmem:[%s14587_s6] ss:$0 sm:$0xff] }
 0x70d   : > { %11687 = vmatprep.mubr.msk.bf16.mxu0 %vm374_vm1, %v14172_v51 }
 0x714   : > { %11688 = vmatmul.mubr.msk.bf16.gmra.mrb[40].mxu0 %vm374_vm1, %v14178_v32 }
 0x715   : > { %11691 = vmatprep.mubr.msk.bf16.mxu0 %vm374_vm1, %v14180_v29 }
 0x71c   : > { %11692 = vmatmul.mubr.msk.bf16.gmra.mrb[44].mxu0 %vm374_vm1, %v14186_v58 }
 0x71d   : > { %11695 = vmatprep.mubr.msk.bf16.mxu0 %vm374_vm1, %v14188_v11 }
 0x724   : > { %11696 = vmatmul.mubr.msk.bf16.gmra.mrb[48].mxu0 %vm374_vm1, %v14194_v7 }
 0x725   : > { %11699 = vmatprep.mubr.msk.bf16.mxu0 %vm374_vm1, %v14196_v17 }
 0x72c   : > { %11700 = vmatmul.mubr.msk.bf16.gmra.mrb[52].mxu0 %vm374_vm1, %v14202_v49 }
 0x72d   : > { %11703 = vmatprep.mubr.msk.bf16.mxu0 %vm374_vm1, %v14204_v39 }
 0x734   : > { %11704 = vmatmul.mubr.msk.bf16.gmra.mrb[56].mxu0 %vm374_vm1, %v14210_v33 }
 0x735   : > { %11707 = vmatprep.mubr.msk.bf16.mxu0 %vm374_vm1, %v14328_v62 }
 0x73c   : > { %11708 = vmatmul.mubr.msk.bf16.gmra.mrb[60].mxu0 %vm374_vm1, %v8426_v44 }
 0x7d7   : > { %v11681_v51 = vpop.f32.mrb[32].mxu0 }
 0x7d8   : > { %v8526_v32 = vpop.f32.mrb[33].mxu0  ;;  %v8694_v39 = vadd.f32 %v11681_v51, %v14422_v43 }
 0x7d9   : > { %v11682_v29 = vpop.f32.mrb[34].mxu0  ;;  %v8692_v58 = vadd.f32 %v14422_v43, %v8526_v32 }
 0x7da   : > { %v8529_v11 = vpop.f32.mrb[35].mxu0  ;;  %v8695_v26 = vadd.f32 %v11682_v29, %v14422_v43 }
 0x7db   : > { %8724 = vxpose.xlu1.b32.start [1/16] %v8692_v58, 128  ;;  %v8693_v7 = vadd.f32 %v14422_v43, %v8529_v11 }
 0x7df   : > { %8725 = vxpose.xlu1.b32.cont [2/16] %v8693_v7, 128  ;;  %v11685_v17 = vpop.f32.mrb[36].mxu0 }
 0x7e0   : > { %v8542_v49 = vpop.f32.mrb[37].mxu0  ;;  %v8698_v21 = vadd.f32 %v11685_v17, %v14422_v43 }
 0x7e1   : > { %v11686_v33 = vpop.f32.mrb[38].mxu0  ;;  %v8696_v0 = vadd.f32 %v14422_v43, %v8542_v49 }
 0x7e2   : > { %v8545_v62 = vpop.f32.mrb[39].mxu0  ;;  %v8699_v4 = vadd.f32 %v11686_v33, %v14422_v43 }
 0x7e3   : > { %8726 = vxpose.xlu1.b32.cont [3/16] %v8694_v39, 128  ;;  %v8697_v10 = vadd.f32 %v14422_v43, %v8545_v62 }
 0x7e7   : > { %8727 = vxpose.xlu1.b32.cont [4/16] %v8695_v26, 128  ;;  %v11689_v42 = vpop.f32.mrb[40].mxu0 }
 0x7e8   : > { %v8558_v20 = vpop.f32.mrb[41].mxu0  ;;  %v8702_v37 = vadd.f32 %v11689_v42, %v14422_v43 }
 0x7e9   : > { %v11690_v61 = vpop.f32.mrb[42].mxu0  ;;  %v8700_v59 = vadd.f32 %v14422_v43, %v8558_v20 }
 0x7ea   : > { %v8561_v63 = vpop.f32.mrb[43].mxu0  ;;  %v8703_v1 = vadd.f32 %v11690_v61, %v14422_v43 }
 0x7eb   : > { %8728 = vxpose.xlu1.b32.cont [5/16] %v8696_v0, 128  ;;  %v8701_v34 = vadd.f32 %v14422_v43, %v8561_v63 }
 0x7ef   : > { %8729 = vxpose.xlu1.b32.cont [6/16] %v8697_v10, 128  ;;  %v11693_v52 = vpop.f32.mrb[44].mxu0 }
 0x7f0   : > { %v8574_v13 = vpop.f32.mrb[45].mxu0  ;;  %v8706_v60 = vadd.f32 %v11693_v52, %v14422_v43 }
 0x7f1   : > { %v11694_v57 = vpop.f32.mrb[46].mxu0  ;;  %v8704_v18 = vadd.f32 %v14422_v43, %v8574_v13 }
 0x7f2   : > { %v8577_v48 = vpop.f32.mrb[47].mxu0  ;;  %v8707_v44 = vadd.f32 %v11694_v57, %v14422_v43 }
 0x7f3   : > { %8730 = vxpose.xlu1.b32.cont [7/16] %v8698_v21, 128  ;;  %v8705_v5 = vadd.f32 %v14422_v43, %v8577_v48 }
 0x7f7   : > { %8731 = vxpose.xlu1.b32.cont [8/16] %v8699_v4, 128  ;;  %v11697_v55 = vpop.f32.mrb[48].mxu0 }
 0x7f8   : > { %v8590_v9 = vpop.f32.mrb[49].mxu0  ;;  %v8710_v28 = vadd.f32 %v11697_v55, %v14422_v43 }
 0x7f9   : > { %v11698_v41 = vpop.f32.mrb[50].mxu0  ;;  %v8708_v6 = vadd.f32 %v14422_v43, %v8590_v9 }
 0x7fa   : > { %v8593_v24 = vpop.f32.mrb[51].mxu0  ;;  %v8711_v27 = vadd.f32 %v11698_v41, %v14422_v43 }
 0x7fb   : > { %8732 = vxpose.xlu1.b32.cont [9/16] %v8700_v59, 128  ;;  %8756 = vxpose.xlu0.b32.start [1/16] %v8708_v6, 128  ;;  %v8709_v50 = vadd.f32 %v14422_v43, %v8593_v24 }
 0x7ff   : > { %8733 = vxpose.xlu1.b32.cont [10/16] %v8701_v34, 128  ;;  %8757 = vxpose.xlu0.b32.cont [2/16] %v8709_v50, 128  ;;  %v11701_v14 = vpop.f32.mrb[52].mxu0 }
 0x800   : > { %v8606_v3 = vpop.f32.mrb[53].mxu0  ;;  %v8714_v47 = vadd.f32 %v11701_v14, %v14422_v43 }
 0x801   : > { %v11702_v2 = vpop.f32.mrb[54].mxu0  ;;  %v8712_v25 = vadd.f32 %v14422_v43, %v8606_v3 }
 0x802   : > { %v8609_v45 = vpop.f32.mrb[55].mxu0  ;;  %v8715_v51 = vadd.f32 %v11702_v2, %v14422_v43 }
 0x803   : > { %8734 = vxpose.xlu1.b32.cont [11/16] %v8702_v37, 128  ;;  %8758 = vxpose.xlu0.b32.cont [3/16] %v8710_v28, 128  ;;  %v8713_v23 = vadd.f32 %v14422_v43, %v8609_v45 }
 0x807   : > { %8735 = vxpose.xlu1.b32.cont [12/16] %v8703_v1, 128  ;;  %8759 = vxpose.xlu0.b32.cont [4/16] %v8711_v27, 128  ;;  %v11705_v12 = vpop.f32.mrb[56].mxu0 }
 0x808   : > { %v8718_v40 = vadd.f32 %v11705_v12, %v14422_v43  ;;  %v8622_v35 = vpop.f32.mrb[57].mxu0 }
 0x809   : > { %v8716_v22 = vadd.f32 %v14422_v43, %v8622_v35  ;;  %v11706_v38 = vpop.f32.mrb[58].mxu0 }
 0x80a   : > { %v8719_v54 = vadd.f32 %v11706_v38, %v14422_v43  ;;  %v8625_v8 = vpop.f32.mrb[59].mxu0 }
 0x80b   : > { %v8717_v53 = vadd.f32 %v14422_v43, %v8625_v8  ;;  %8736 = vxpose.xlu1.b32.cont [13/16] %v8704_v18, 128  ;;  %8760 = vxpose.xlu0.b32.cont [5/16] %v8712_v25, 128 }
 0x80f   : > { %8737 = vxpose.xlu1.b32.cont [14/16] %v8705_v5, 128  ;;  %8761 = vxpose.xlu0.b32.cont [6/16] %v8713_v23, 128  ;;  %v11709_v46 = vpop.f32.mrb[60].mxu0 }
 0x810   : > { %v8722_v16 = vadd.f32 %v11709_v46, %v14422_v43  ;;  %v8638_v15 = vpop.f32.mrb[61].mxu0 }
 0x811   : > { %v8720_v31 = vadd.f32 %v14422_v43, %v8638_v15  ;;  %v11710_v19 = vpop.f32.mrb[62].mxu0 }
 0x812   : > { %v8723_v30 = vadd.f32 %v11710_v19, %v14422_v43  ;;  %v8641_v56 = vpop.f32.mrb[63].mxu0 }
 0x813   : > { %v8721_v36 = vadd.f32 %v14422_v43, %v8641_v56  ;;  %8738 = vxpose.xlu1.b32.cont [15/16] %v8706_v60, 128  ;;  %8762 = vxpose.xlu0.b32.cont [7/16] %v8714_v47, 128 }
 0x817   : > { %8739 = vxpose.xlu1.b32.end [16/16] %v8707_v44, 128  ;;  %8763 = vxpose.xlu0.b32.cont [8/16] %v8715_v51, 128 }
 0x81b   : > { %8764 = vxpose.xlu0.b32.cont [9/16] %v8716_v22, 128 }
 0x81f   : > { %8765 = vxpose.xlu0.b32.cont [10/16] %v8717_v53, 128 }
 0x823   : > { %8766 = vxpose.xlu0.b32.cont [11/16] %v8718_v40, 128 }
 0x827   : > { %8767 = vxpose.xlu0.b32.cont [12/16] %v8719_v54, 128 }
 0x82b   : > { %8768 = vxpose.xlu0.b32.cont [13/16] %v8720_v31, 128 }
 0x82f   : > { %8769 = vxpose.xlu0.b32.cont [14/16] %v8721_v36, 128 }
 0x833   : > { %8770 = vxpose.xlu0.b32.cont [15/16] %v8722_v16, 128 }
 0x837   : > { %8771 = vxpose.xlu0.b32.end [16/16] %v8723_v30, 128 }
 0x85b   : > { %v8740_v43 = vpop.trf.xlu1 }
 0x85c   : > { %8788 = vst [vmem:[%s14460_s15] sm:$0xff] %v8740_v43  ;;  %v10079_v17 = vmul.f32 -1.442695, %v8740_v43 }
 0x85e   : > { %12558 = vpow2.f32 %v10079_v17 }
 0x85f   : > { %v8741_v32 = vpop.trf.xlu1 }
 0x860   : > { %8790 = vst [vmem:[%s14460_s15 + $0x10] sm:$0xff] %v8741_v32  ;;  %v10081_v33 = vmul.f32 -1.442695, %v8741_v32 }
 0x862   : > { %12560 = vpow2.f32 %v10081_v33 }
 0x863   : > { %v8742_v29 = vpop.trf.xlu1 }
 0x864   : > { %8792 = vst [vmem:[%s14460_s15 + $0x20] sm:$0xff] %v8742_v29  ;;  %v10083_v26 = vmul.f32 -1.442695, %v8742_v29 }
 0x867   : > { %v8743_v58 = vpop.trf.xlu1 }
 0x868   : > { %8794 = vst [vmem:[%s14460_s15 + $0x30] sm:$0xff] %v8743_v58  ;;  %v10085_v0 = vmul.f32 -1.442695, %v8743_v58  ;;  %v12559_v13 = vpop.eup %12558 }
 0x869   : > { %v8916_v48 = vadd.f32 1.0, %v12559_v13 }
 0x86b   : > { %v8744_v11 = vpop.trf.xlu1 }
 0x86c   : > { %8796 = vst [vmem:[%s14460_s15 + $0x40] sm:$0xff] %v8744_v11  ;;  %v10087_v52 = vmul.f32 -1.442695, %v8744_v11  ;;  %v12561_v9 = vpop.eup %12560 }
 0x86d   : > { %v8918_v3 = vadd.f32 1.0, %v12561_v9 }
 0x86f   : > { %v8745_v7 = vpop.trf.xlu1 }
 0x870   : > { %8798 = vst [vmem:[%s14460_s15 + $0x50] sm:$0xff] %v8745_v7  ;;  %v10089_v55 = vmul.f32 -1.442695, %v8745_v7 }
 0x873   : > { %v8746_v49 = vpop.trf.xlu1 }
 0x874   : > { %8800 = vst [vmem:[%s14460_s15 + $0x60] sm:$0xff] %v8746_v49  ;;  %v10091_v34 = vmul.f32 -1.442695, %v8746_v49 }
 0x877   : > { %v14469_v39 = vpop.trf.xlu1 }
 0x878   : > { %8802 = vst [vmem:[%s14460_s15 + $0x70] sm:$0xff] %v14469_v39  ;;  %v10093_v54 = vmul.f32 -1.442695, %v14469_v39 }
 0x87b   : > { %v8772_v62 = vpop.trf.xlu0  ;;  %v14473_v42 = vpop.trf.xlu1 }
 0x87c   : > { %8789 = vst [vmem:[%s14460_s15 + $0x8] sm:$0xff] %v8772_v62  ;;  %v10080_v20 = vmul.f32 -1.442695, %v8772_v62  ;;  %8804 = vst [vmem:[%s14460_s15 + $0x80] sm:$0xff] %v14473_v42  ;;  %v10095_v47 = vmul.f32 -1.442695, %v14473_v42 }
 0x87e   : > { %12562 = vpow2.f32 %v10080_v20 }
 0x87f   : > { %v8773_v61 = vpop.trf.xlu0  ;;  %12564 = vpow2.f32 %v10083_v26  ;;  %v14478_v63 = vpop.trf.xlu1 }
 0x880   : > { %8791 = vst [vmem:[%s14460_s15 + $0x18] sm:$0xff] %v8773_v61  ;;  %v10082_v10 = vmul.f32 -1.442695, %v8773_v61  ;;  %12566 = vpow2.f32 %v10085_v0  ;;  %8806 = vst [vmem:[%s14460_s15 + $0x90] sm:$0xff] %v14478_v63  ;;  %v10097_v30 = vmul.f32 -1.442695, %v14478_v63 }
 0x882   : > { %12568 = vpow2.f32 %v10082_v10 }
 0x883   : > { %v8774_v21 = vpop.trf.xlu0  ;;  %v14483_v57 = vpop.trf.xlu1  ;;  %12570 = vpow2.f32 %v10087_v52 }
 0x884   : > { %8793 = vst [vmem:[%s14460_s15 + $0x28] sm:$0xff] %v8774_v21  ;;  %v10084_v4 = vmul.f32 -1.442695, %v8774_v21  ;;  %8808 = vst [vmem:[%s14460_s15 + $0xa0] sm:$0xff] %v14483_v57  ;;  %v10099_v61 = vmul.f32 -1.442695, %v14483_v57 }
 0x886   : > { %12572 = vpow2.f32 %v10084_v4 }
 0x887   : > { %v8775_v59 = vpop.trf.xlu0  ;;  %v14488_v41 = vpop.trf.xlu1  ;;  %12574 = vrcp.f32 %v8916_v48 }
 0x888   : > { %v12563_v6 = vpop.eup %12562  ;;  %8795 = vst [vmem:[%s14460_s15 + $0x38] sm:$0xff] %v8775_v59  ;;  %v10086_v24 = vmul.f32 -1.442695, %v8775_v59  ;;  %8810 = vst [vmem:[%s14460_s15 + $0xb0] sm:$0xff] %v14488_v41  ;;  %12576 = vpow2.f32 %v10089_v55  ;;  %v10101_v52 = vmul.f32 -1.442695, %v14488_v41 }
 0x889   : > { %v12565_v50 = vpop.eup %12564  ;;  %v8917_v14 = vadd.f32 1.0, %v12563_v6 }
 0x88a   : > { %v12567_v37 = vpop.eup %12566  ;;  %12578 = vpow2.f32 %v10086_v24  ;;  %v8920_v1 = vadd.f32 1.0, %v12565_v50 }
 0x88b   : > { %12580 = vrcp.f32 %v8917_v14  ;;  %v8776_v28 = vpop.trf.xlu0  ;;  %v14493_v2 = vpop.trf.xlu1  ;;  %v8922_v40 = vadd.f32 1.0, %v12567_v37 }
 0x88c   : > { %v12569_v45 = vpop.eup %12568  ;;  %8797 = vst [vmem:[%s14460_s15 + $0x48] sm:$0xff] %v8776_v28  ;;  %v10088_v27 = vmul.f32 -1.442695, %v8776_v28  ;;  %12582 = vpow2.f32 %v10091_v34  ;;  %8812 = vst [vmem:[%s14460_s15 + $0xc0] sm:$0xff] %v14493_v2 }
 0x88d   : > { %12584 = vrcp.f32 %v8918_v3  ;;  %v8919_v12 = vadd.f32 1.0, %v12569_v45  ;;  %v12571_v35 = vpop.eup %12570  ;;  %v10103_v45 = vmul.f32 -1.442695, %v14493_v2 }
 0x88e   : > { %12586 = vpow2.f32 %v10088_v27  ;;  %v8924_v53 = vadd.f32 1.0, %v12571_v35 }
 0x88f   : > { %12588 = vrcp.f32 %v8919_v12  ;;  %v8777_v18 = vpop.trf.xlu0  ;;  %v14498_v25 = vpop.trf.xlu1 }
 0x890   : > { %v12573_v22 = vpop.eup %12572  ;;  %12590 = vrcp.f32 %v8920_v1  ;;  %8799 = vst [vmem:[%s14460_s15 + $0x58] sm:$0xff] %v8777_v18  ;;  %v10090_v38 = vmul.f32 -1.442695, %v8777_v18  ;;  %8814 = vst [vmem:[%s14460_s15 + $0xd0] sm:$0xff] %v14498_v25 }
 0x891   : > { %v8921_v8 = vadd.f32 1.0, %v12573_v22  ;;  %12592 = vrcp.f32 %v8922_v40  ;;  %v12575_v5 = vpop.eup %12574 }
 0x892   : > { %12594 = vpow2.f32 %v10090_v38  ;;  %v12577_v23 = vpop.eup %12576 }
 0x893   : > { %12596 = vrcp.f32 %v8921_v8  ;;  %v8778_v46 = vpop.trf.xlu0  ;;  %v14504_v16 = vpop.trf.xlu1  ;;  %v8926_v29 = vadd.f32 1.0, %v12577_v23 }
 0x894   : > { %v12579_v15 = vpop.eup %12578  ;;  %8801 = vst [vmem:[%s14460_s15 + $0x68] sm:$0xff] %v8778_v46  ;;  %v10092_v60 = vmul.f32 -1.442695, %v8778_v46  ;;  %12598 = vpow2.f32 %v10093_v54  ;;  %8816 = vst [vmem:[%s14460_s15 + $0xe0] sm:$0xff] %v14504_v16 }
 0x895   : > { %v12581_v31 = vpop.eup %12580  ;;  %v8923_v19 = vadd.f32 1.0, %v12579_v15  ;;  %12600 = vrcp.f32 %v8924_v53 }
 0x896   : > { %v12583_v56 = vpop.eup %12582  ;;  %12602 = vpow2.f32 %v10092_v60  ;;  %v9012_v36 = vadd.f32 %v12581_v31, %v12575_v5 }
 0x897   : > { %v12585_v44 = vpop.eup %12584  ;;  %12604 = vrcp.f32 %v8923_v19  ;;  %v8779_v51 = vpop.trf.xlu0  ;;  %v8928_v17 = vadd.f32 1.0, %v12583_v56  ;;  %v10107_v56 = vmul.f32 -1.442695, %v14504_v16 }
 0x898   : > { %v14511_v43 = vpop.trf.xlu1  ;;  %v12587_v32 = vpop.eup %12586  ;;  %8803 = vst [vmem:[%s14460_s15 + $0x78] sm:$0xff] %v8779_v51  ;;  %v10094_v58 = vmul.f32 -1.442695, %v8779_v51  ;;  %12606 = vpow2.f32 %v10095_v47  ;;  %9013 = vadd.xlane.f32.xlu0 %v9012_v36  ;;  %v9124_v42 = vpack.c.bf16 %v12585_v44, %v12575_v5  ;;  %v10105_v5 = vmul.f32 -1.442695, %v14498_v25 }
 0x899   : > { %8818 = vst [vmem:[%s14460_s15 + $0xf0] sm:$0xff] %v14511_v43  ;;  %v12589_v11 = vpop.eup %12588  ;;  %v8925_v7 = vadd.f32 1.0, %v12587_v32  ;;  %12608 = vpow2.f32 %v10097_v30 }
 0x89a   : > { %v12591_v49 = vpop.eup %12590  ;;  %12610 = vpow2.f32 %v10094_v58  ;;  %v9125_v39 = vpack.c.bf16 %v12589_v11, %v12581_v31  ;;  %v9015_v33 = vadd.f32 %v12589_v11, %v12585_v44 }
 0x89b   : > { %v12593_v62 = vpop.eup %12592  ;;  %12612 = vrcp.f32 %v8925_v7  ;;  %v8780_v26 = vpop.trf.xlu0 }
 0x89c   : > { %v12595_v20 = vpop.eup %12594  ;;  %12614 = vrcp.f32 %v8926_v29  ;;  %8805 = vst [vmem:[%s14460_s15 + $0x88] sm:$0xff] %v8780_v26  ;;  %v10096_v0 = vmul.f32 -1.442695, %v8780_v26  ;;  %9172 = vmatprep.mubr.bf16.mxu1 %v9125_v39  ;;  %9016 = vadd.xlane.f32.xlu1 %v9015_v33  ;;  %v9126_v3 = vpack.c.bf16 %v12593_v62, %v12591_v49 }
 0x89d   : > { %v12597_v63 = vpop.eup %12596  ;;  %v8927_v10 = vadd.f32 1.0, %v12595_v20  ;;  %12616 = vrcp.f32 %v8928_v17  ;;  %9173 = vmatmul.mubr.bf16.vlgmr.msra.gmra.mrb[64].mxu1 %v9124_v42 }
 0x89e   : > { %v12599_v13 = vpop.eup %12598  ;;  %12618 = vpow2.f32 %v10096_v0  ;;  %v9018_v21 = vadd.f32 %v12597_v63, %v12591_v49  ;;  %v10109_v49 = vmul.f32 -1.442695, %v14511_v43 }
 0x89f   : > { %v14519_v48 = vpop.eup %12600  ;;  %12620 = vrcp.f32 %v8927_v10  ;;  %v8781_v4 = vpop.trf.xlu0  ;;  %v8930_v6 = vadd.f32 1.0, %v12599_v13 }
 0x8a0   : > { %v12603_v55 = vpop.eup %12602  ;;  %8807 = vst [vmem:[%s14460_s15 + $0x98] sm:$0xff] %v8781_v4  ;;  %v10098_v9 = vmul.f32 -1.442695, %v8781_v4  ;;  %12622 = vpow2.f32 %v10099_v61  ;;  %9019 = vadd.xlane.f32.xlu1 %v9018_v21 }
 0x8a1   : > { %v12605_v57 = vpop.eup %12604  ;;  %v8929_v59 = vadd.f32 1.0, %v12603_v55  ;;  %12624 = vpow2.f32 %v10101_v52 }
 0x8a2   : > { %v12607_v24 = vpop.eup %12606  ;;  %12626 = vpow2.f32 %v10098_v9  ;;  %v9127_v41 = vpack.c.bf16 %v12605_v57, %v12597_v63  ;;  %v9021_v34 = vadd.f32 %v12605_v57, %v12593_v62 }
 0x8a3   : > { %v12609_v50 = vpop.eup %12608  ;;  %12628 = vrcp.f32 %v8929_v59  ;;  %v8782_v14 = vpop.trf.xlu0  ;;  %v8932_v12 = vadd.f32 1.0, %v12607_v24 }
 0x8a4   : > { %v12611_v37 = vpop.eup %12610  ;;  %8809 = vst [vmem:[%s14460_s15 + $0xa8] sm:$0xff] %v8782_v14  ;;  %v10100_v28 = vmul.f32 -1.442695, %v8782_v14  ;;  %9180 = vmatprep.mubr.bf16.mxu1 %v9127_v41  ;;  %9022 = vadd.xlane.f32.xlu1 %v9021_v34  ;;  %12630 = vrcp.f32 %v8930_v6  ;;  %v8934_v54 = vadd.f32 1.0, %v12609_v50 }
 0x8a5   : > { %v12613_v1 = vpop.eup %12612  ;;  %v8931_v27 = vadd.f32 1.0, %v12611_v37  ;;  %9181 = vmatmul.mubr.bf16.gmra.mrb[68].mxu1 %v9126_v3 }
 0x8a6   : > { %v12615_v40 = vpop.eup %12614  ;;  %12632 = vpow2.f32 %v10100_v28  ;;  %v9024_v35 = vadd.f32 %v12613_v1, %v14519_v48 }
 0x8a7   : > { %v14525_v18 = vpop.eup %12616  ;;  %12634 = vrcp.f32 %v8931_v27  ;;  %v8783_v22 = vpop.trf.xlu0  ;;  %v9128_v31 = vpack.c.bf16 %v12615_v40, %v14519_v48 }
 0x8a8   : > { %v12619_v38 = vpop.eup %12618  ;;  %8811 = vst [vmem:[%s14460_s15 + $0xb8] sm:$0xff] %v8783_v22  ;;  %v10102_v8 = vmul.f32 -1.442695, %v8783_v22  ;;  %12636 = vpow2.f32 %v10103_v45  ;;  %9025 = vadd.xlane.f32.xlu0 %v9024_v35 }
 0x8a9   : > { %v12621_v2 = vpop.eup %12620  ;;  %12638 = vrcp.f32 %v8932_v12  ;;  %v8933_v53 = vadd.f32 1.0, %v12619_v38 }
 0x8aa   : > { %v12623_v23 = vpop.eup %12622  ;;  %12640 = vpow2.f32 %v10102_v8  ;;  %v9129_v46 = vpack.c.bf16 %v12621_v2, %v12613_v1  ;;  %v9027_v15 = vadd.f32 %v12621_v2, %v12615_v40 }
 0x8ab   : > { %v12625_v60 = vpop.eup %12624  ;;  %12642 = vrcp.f32 %v8933_v53  ;;  %v8784_v47 = vpop.trf.xlu0  ;;  %v8936_v44 = vadd.f32 1.0, %v12623_v23 }
 0x8ac   : > { %v12627_v19 = vpop.eup %12626  ;;  %12644 = vrcp.f32 %v8934_v54  ;;  %8813 = vst [vmem:[%s14460_s15 + $0xc8] sm:$0xff] %v8784_v47  ;;  %v10104_v30 = vmul.f32 -1.442695, %v8784_v47  ;;  %9188 = vmatprep.mubr.bf16.mxu1 %v9129_v46  ;;  %9028 = vadd.xlane.f32.xlu1 %v9027_v15  ;;  %v8938_v11 = vadd.f32 1.0, %v12625_v60 }
 0x8ad   : > { %v12629_v36 = vpop.eup %12628  ;;  %v8935_v25 = vadd.f32 1.0, %v12627_v19  ;;  %12646 = vpow2.f32 %v10105_v5  ;;  %9189 = vmatmul.mubr.bf16.gmra.mrb[72].mxu1 %v9128_v31 }
 0x8ae   : > { %12648 = vpow2.f32 %v10104_v30  ;;  %v9030_v51 = vadd.f32 %v12629_v36, %v14525_v18  ;;  %v12631_v32 = vpop.eup %12630 }
 0x8af   : > { %12650 = vrcp.f32 %v8935_v25  ;;  %v8785_v29 = vpop.trf.xlu0  ;;  %v9130_v20 = vpack.c.bf16 %v12631_v32, %v14525_v18 }
 0x8b0   : > { %v12633_v58 = vpop.eup %12632  ;;  %8815 = vst [vmem:[%s14460_s15 + $0xd8] sm:$0xff] %v8785_v29  ;;  %v10106_v7 = vmul.f32 -1.442695, %v8785_v29  ;;  %12652 = vpow2.f32 %v10107_v56  ;;  %9031 = vadd.xlane.f32.xlu0 %v9030_v51  ;;  %v12556_v29 = vld [vmem:[%s14588_s7] sm:$0xff]  }
 0x8b1   : > { %v12635_v17 = vpop.eup %12634  ;;  %12654 = vrcp.f32 %v8936_v44  ;;  %v8937_v16 = vadd.f32 1.0, %v12633_v58  ;;  %11711 = vmatprep.subr.bf16.mxu1 %v12556_v29  ;;  %v12557_v58 = vld [vmem:[%s14588_s7 + $0x8] sm:$0xff]  }
 0x8b2   : > { %v12637_v39 = vpop.eup %12636  ;;  %12656 = vpow2.f32 %v10106_v7  ;;  %v9131_v33 = vpack.c.bf16 %v12635_v17, %v12629_v36  ;;  %v9033_v62 = vadd.f32 %v12635_v17, %v12631_v32  ;;  %11712 = vmatpush3.bf16.msra.mxu1 %v12556_v29 }
 0x8b3   : > { %v12639_v26 = vpop.eup %12638  ;;  %12658 = vrcp.f32 %v8937_v16  ;;  %v8786_v42 = vpop.trf.xlu0  ;;  %v8940_v52 = vadd.f32 1.0, %v12637_v39  ;;  %11713 = vmatprep.subr.bf16.mxu1 %v12557_v58 }
 0x8b4   : > { %v12641_v0 = vpop.eup %12640  ;;  %12660 = vrcp.f32 %v8938_v11  ;;  %8817 = vst [vmem:[%s14460_s15 + $0xe8] sm:$0xff] %v8786_v42  ;;  %v10108_v61 = vmul.f32 -1.442695, %v8786_v42  ;;  %9196 = vmatprep.mubr.bf16.mxu1 %v9131_v33  ;;  %9034 = vadd.xlane.f32.xlu1 %v9033_v62 }
 0x8b5   : > { %v12643_v63 = vpop.eup %12642  ;;  %v8939_v10 = vadd.f32 1.0, %v12641_v0  ;;  %12662 = vpow2.f32 %v10109_v49  ;;  %9197 = vmatmul.mubr.bf16.gmra.mrb[76].mxu1 %v9130_v20 }
 0x8b6   : > { %v12645_v43 = vpop.eup %12644  ;;  %12664 = vpow2.f32 %v10108_v61  ;;  %v9036_v13 = vadd.f32 %v12643_v63, %v12639_v26  ;;  %11714 = vmatpush3.bf16.msra.mxu1 %v12557_v58 }
 0x8b7   : > { %v12647_v21 = vpop.eup %12646  ;;  %12666 = vrcp.f32 %v8939_v10  ;;  %v8787_v48 = vpop.trf.xlu0  ;;  %v9132_v50 = vpack.c.bf16 %v12645_v43, %v12639_v26 }
 0x8b8   : > { %v12649_v4 = vpop.eup %12648  ;;  %8819 = vst [vmem:[%s14460_s15 + $0xf8] sm:$0xff] %v8787_v48  ;;  %v10110_v55 = vmul.f32 -1.442695, %v8787_v48  ;;  %9037 = vadd.xlane.f32.xlu0 %v9036_v13  ;;  %12668 = vrcp.f32 %v8940_v52  ;;  %v8942_v6 = vadd.f32 1.0, %v12647_v21 }
 0x8b9   : > { %v12651_v9 = vpop.eup %12650  ;;  %v8941_v57 = vadd.f32 1.0, %v12649_v4 }
 0x8ba   : > { %v12653_v59 = vpop.eup %12652  ;;  %12670 = vpow2.f32 %v10110_v55  ;;  %v9133_v24 = vpack.c.bf16 %v12651_v9, %v12643_v63  ;;  %v9039_v41 = vadd.f32 %v12651_v9, %v12645_v43 }
 0x8bb   : > { %v12655_v34 = vpop.eup %12654  ;;  %12672 = vrcp.f32 %v8941_v57  ;;  %v8944_v28 = vadd.f32 1.0, %v12653_v59 }
 0x8bc   : > { %v12657_v14 = vpop.eup %12656  ;;  %9204 = vmatprep.mubr.bf16.mxu1 %v9133_v24  ;;  %9040 = vadd.xlane.f32.xlu1 %v9039_v41  ;;  %12674 = vrcp.f32 %v8942_v6 }
 0x8bd   : > { %v12659_v3 = vpop.eup %12658  ;;  %v8943_v37 = vadd.f32 1.0, %v12657_v14  ;;  %9205 = vmatmul.mubr.bf16.gmra.mrb[80].mxu1 %v9132_v50 }
 0x8be   : > { %v12661_v45 = vpop.eup %12660  ;;  %v9042_v1 = vadd.f32 %v12659_v3, %v12655_v34 }
 0x8bf   : > { %v12663_v27 = vpop.eup %12662  ;;  %12676 = vrcp.f32 %v8943_v37  ;;  %v9134_v8 = vpack.c.bf16 %v12661_v45, %v12655_v34 }
 0x8c0   : > { %v12665_v12 = vpop.eup %12664  ;;  %9043 = vadd.xlane.f32.xlu0 %v9042_v1  ;;  %12678 = vrcp.f32 %v8944_v28  ;;  %v8946_v18 = vadd.f32 1.0, %v12663_v27 }
 0x8c1   : > { %v12667_v40 = vpop.eup %12666  ;;  %v8945_v35 = vadd.f32 1.0, %v12665_v12 }
 0x8c2   : > { %v9135_v22 = vpack.c.bf16 %v12667_v40, %v12659_v3  ;;  %v9045_v38 = vadd.f32 %v12667_v40, %v12661_v45  ;;  %v12669_v54 = vpop.eup %12668 }
 0x8c3   : > { %12680 = vrcp.f32 %v8945_v35 }
 0x8c4   : > { %v12671_v2 = vpop.eup %12670  ;;  %9212 = vmatprep.mubr.bf16.mxu1 %v9135_v22  ;;  %9046 = vadd.xlane.f32.xlu1 %v9045_v38  ;;  %12682 = vrcp.f32 %v8946_v18 }
 0x8c5   : > { %v12673_v53 = vpop.eup %12672  ;;  %v8947_v5 = vadd.f32 1.0, %v12671_v2  ;;  %9213 = vmatmul.mubr.bf16.gmra.mrb[84].mxu1 %v9134_v8 }
 0x8c6   : > { %v9048_v23 = vadd.f32 %v12673_v53, %v12669_v54  ;;  %v12675_v46 = vpop.eup %12674 }
 0x8c7   : > { %12684 = vrcp.f32 %v8947_v5  ;;  %v9136_v19 = vpack.c.bf16 %v12675_v46, %v12669_v54 }
 0x8c8   : > { %9049 = vadd.xlane.f32.xlu0 %v9048_v23 }
 0x8c9   : > { %v12677_v15 = vpop.eup %12676 }
 0x8ca   : > { %v9137_v60 = vpack.c.bf16 %v12677_v15, %v12673_v53  ;;  %v9051_v47 = vadd.f32 %v12677_v15, %v12675_v46  ;;  %v12679_v31 = vpop.eup %12678 }
 0x8cc   : > { %9220 = vmatprep.mubr.bf16.mxu1 %v9137_v60  ;;  %9052 = vadd.xlane.f32.xlu1 %v9051_v47 }
 0x8cd   : > { %v12681_v30 = vpop.eup %12680  ;;  %9221 = vmatmul.mubr.bf16.gmra.mrb[88].mxu1 %v9136_v19 }
 0x8ce   : > { %v9054_v56 = vadd.f32 %v12681_v30, %v12679_v31  ;;  %v12683_v36 = vpop.eup %12682 }
 0x8cf   : > { %v9138_v32 = vpack.c.bf16 %v12683_v36, %v12679_v31 }
 0x8d0   : > { %9055 = vadd.xlane.f32.xlu0 %v9054_v56 }
 0x8d1   : > { %v12685_v25 = vpop.eup %12684 }
 0x8d2   : > { %v9139_v44 = vpack.c.bf16 %v12685_v25, %v12681_v30  ;;  %v9057_v51 = vadd.f32 %v12685_v25, %v12683_v36 }
 0x8d4   : > { %9228 = vmatprep.mubr.bf16.mxu1 %v9139_v44  ;;  %9058 = vadd.xlane.f32.xlu1 %v9057_v51 }
 0x8d5   : > { %9229 = vmatmul.mubr.bf16.gmra.mrb[92].mxu1 %v9138_v32 }
 0x925   : > { %v9014_v7 = vpop.xlane.xlu0 %9013 }
 0x926   : > { %v9060_v17 = vmax.f32 %v9014_v7, 1e-06 }
 0x928   : > { %12686 = vrcp.f32 %v9060_v17 }
 0x929   : > { %v9017_v11 = vpop.xlane.xlu1 %9016 }
 0x92a   : > { %v9061_v49 = vmax.f32 %v9017_v11, 1e-06 }
 0x92c   : > { %12688 = vrcp.f32 %v9061_v49 }
 0x92d   : > { %v9020_v16 = vpop.xlane.xlu1 %9019 }
 0x92e   : > { %v9062_v33 = vmax.f32 %v9020_v16, 1e-06 }
 0x930   : > { %12690 = vrcp.f32 %v9062_v33 }
 0x931   : > { %v9023_v39 = vpop.xlane.xlu1 %9022 }
 0x932   : > { %v9063_v62 = vmax.f32 %v9023_v39, 1e-06  ;;  %v12687_v10 = vpop.eup %12686 }
 0x934   : > { %12692 = vrcp.f32 %v9063_v62 }
 0x935   : > { %v9026_v61 = vpop.xlane.xlu0 %9025 }
 0x936   : > { %v12689_v13 = vpop.eup %12688  ;;  %v9064_v21 = vmax.f32 %v9026_v61, 1e-06 }
 0x938   : > { %12694 = vrcp.f32 %v9064_v21 }
 0x939   : > { %v9029_v52 = vpop.xlane.xlu1 %9028 }
 0x93a   : > { %v9065_v55 = vmax.f32 %v9029_v52, 1e-06  ;;  %v12691_v50 = vpop.eup %12690 }
 0x93c   : > { %12696 = vrcp.f32 %v9065_v55 }
 0x93d   : > { %v9032_v41 = vpop.xlane.xlu0 %9031 }
 0x93e   : > { %v12693_v37 = vpop.eup %12692  ;;  %v9066_v28 = vmax.f32 %v9032_v41, 1e-06 }
 0x940   : > { %12698 = vrcp.f32 %v9066_v28 }
 0x941   : > { %v9035_v14 = vpop.xlane.xlu1 %9034 }
 0x942   : > { %v9067_v27 = vmax.f32 %v9035_v14, 1e-06  ;;  %v12695_v8 = vpop.eup %12694 }
 0x944   : > { %12700 = vrcp.f32 %v9067_v27 }
 0x945   : > { %v9038_v38 = vpop.xlane.xlu0 %9037 }
 0x946   : > { %v12697_v5 = vpop.eup %12696  ;;  %v9068_v23 = vmax.f32 %v9038_v38, 1e-06 }
 0x948   : > { %12702 = vrcp.f32 %v9068_v23 }
 0x949   : > { %v9041_v2 = vpop.xlane.xlu1 %9040 }
 0x94a   : > { %v9069_v60 = vmax.f32 %v9041_v2, 1e-06  ;;  %v12699_v44 = vpop.eup %12698 }
 0x94c   : > { %12704 = vrcp.f32 %v9069_v60 }
 0x94d   : > { %v9044_v36 = vpop.xlane.xlu0 %9043 }
 0x94e   : > { %v12701_v29 = vpop.eup %12700  ;;  %v9070_v58 = vmax.f32 %v9044_v36, 1e-06 }
 0x950   : > { %12706 = vrcp.f32 %v9070_v58 }
 0x951   : > { %v9047_v51 = vpop.xlane.xlu1 %9046 }
 0x952   : > { %v9071_v17 = vmax.f32 %v9047_v51, 1e-06 }
 0x954   : > { %12708 = vrcp.f32 %v9071_v17 }
 0x970   : > { %v10699_v26 = vpop.f32.mrb[64].mxu1 }
 0x971   : > { %v10700_v42 = vpop.f32.mrb[65].mxu1 }
 0x972   : > { %v10701_v20 = vadd.f32 %v10700_v42, %v10699_v26  ;;  %v10702_v0 = vpop.f32.mrb[66].mxu1  ;;  %v9050_v26 = vpop.xlane.xlu0 %9049 }
 0x973   : > { %v10703_v63 = vpop.f32.mrb[67].mxu1 }
 0x974   : > { %v10704_v43 = vadd.f32 %v10703_v63, %v10702_v0  ;;  %v9238_v48 = vmul.f32 %v12687_v10, %v10701_v20  ;;  %v12703_v20 = vpop.eup %12702  ;;  %v9053_v0 = vpop.xlane.xlu1 %9052  ;;  %v9072_v10 = vmax.f32 %v9050_v26, 1e-06 }
 0x975   : > { %v12705_v63 = vpop.eup %12704 }
 0x976   : > { %v9240_v4 = vmul.f32 %v12689_v13, %v10704_v43  ;;  %v9073_v13 = vmax.f32 %v9053_v0, 1e-06  ;;  %12710 = vrcp.f32 %v9072_v10 }
 0x978   : > { %v9269_v9 = vpack.c.bf16 %v9240_v4, %v9238_v48  ;;  %v10705_v57 = vpop.f32.mrb[68].mxu1  ;;  %12712 = vrcp.f32 %v9073_v13 }
 0x979   : > { %v10706_v59 = vpop.f32.mrb[69].mxu1 }
 0x97a   : > { %v10707_v6 = vadd.f32 %v10706_v59, %v10705_v57  ;;  %v10708_v24 = vpop.f32.mrb[70].mxu1  ;;  %11715 = vmatprep.mubr.msk.bf16.mxu1 %vm374_vm1, %v9269_v9  ;;  %v9056_v57 = vpop.xlane.xlu0 %9055 }
 0x97b   : > { %v10709_v34 = vpop.f32.mrb[71].mxu1 }
 0x97c   : > { %v10710_v3 = vadd.f32 %v10709_v34, %v10708_v24  ;;  %v9242_v45 = vmul.f32 %v12691_v50, %v10707_v6  ;;  %v12707_v6 = vpop.eup %12706  ;;  %v9059_v24 = vpop.xlane.xlu1 %9058  ;;  %v9074_v50 = vmax.f32 %v9056_v57, 1e-06 }
 0x97d   : > { %v12709_v34 = vpop.eup %12708 }
 0x97e   : > { %v9244_v1 = vmul.f32 %v12693_v37, %v10710_v3  ;;  %v9075_v37 = vmax.f32 %v9059_v24, 1e-06  ;;  %12714 = vrcp.f32 %v9074_v50 }
 0x980   : > { %v9270_v12 = vpack.c.bf16 %v9244_v1, %v9242_v45  ;;  %v10711_v40 = vpop.f32.mrb[72].mxu1  ;;  %12716 = vrcp.f32 %v9075_v37 }
 0x981   : > { %v10712_v35 = vpop.f32.mrb[73].mxu1 }
 0x982   : > { %v10713_v18 = vadd.f32 %v10712_v35, %v10711_v40  ;;  %v10714_v22 = vpop.f32.mrb[74].mxu1  ;;  %11716 = vmatmul.mubr.msk.bf16.vlgmr.msra.gmra.mrb[96].mxu1 %vm374_vm1, %v9270_v12  ;;  %v12711_v35 = vpop.eup %12710 }
 0x983   : > { %v10715_v54 = vpop.f32.mrb[75].mxu1 }
 0x984   : > { %v10716_v53 = vadd.f32 %v10715_v54, %v10714_v22  ;;  %v9246_v46 = vmul.f32 %v12695_v8, %v10713_v18  ;;  %v12713_v22 = vpop.eup %12712 }
 0x986   : > { %v9248_v15 = vmul.f32 %v12697_v5, %v10716_v53 }
 0x988   : > { %v9271_v47 = vpack.c.bf16 %v9248_v15, %v9246_v46  ;;  %v10717_v31 = vpop.f32.mrb[76].mxu1  ;;  %v12715_v15 = vpop.eup %12714 }
 0x989   : > { %v10718_v19 = vpop.f32.mrb[77].mxu1 }
 0x98a   : > { %v10719_v30 = vadd.f32 %v10718_v19, %v10717_v31  ;;  %v10720_v56 = vpop.f32.mrb[78].mxu1  ;;  %11719 = vmatprep.mubr.msk.bf16.mxu1 %vm374_vm1, %v9271_v47  ;;  %v12717_v47 = vpop.eup %12716 }
 0x98b   : > { %v10721_v25 = vpop.f32.mrb[79].mxu1 }
 0x98c   : > { %v10722_v32 = vadd.f32 %v10721_v25, %v10720_v56  ;;  %v9250_v11 = vmul.f32 %v12699_v44, %v10719_v30  ;;  %v10111_v56 = vld [vmem:[%s14589_s8] ss:$0 sm:$0xff] }
 0x98e   : > { %v9252_v7 = vmul.f32 %v12701_v29, %v10722_v32 }
 0x990   : > { %v9272_v16 = vpack.c.bf16 %v9252_v7, %v9250_v11  ;;  %v10723_v49 = vpop.f32.mrb[80].mxu1 }
 0x991   : > { %v10724_v39 = vpop.f32.mrb[81].mxu1 }
 0x992   : > { %v10725_v33 = vadd.f32 %v10724_v39, %v10723_v49  ;;  %v10726_v62 = vpop.f32.mrb[82].mxu1  ;;  %11720 = vmatmul.mubr.msk.bf16.gmra.mrb[100].mxu1 %vm374_vm1, %v9272_v16 }
 0x993   : > { %v10727_v42 = vpop.f32.mrb[83].mxu1 }
 0x994   : > { %v10728_v61 = vadd.f32 %v10727_v42, %v10726_v62  ;;  %v9254_v52 = vmul.f32 %v12703_v20, %v10725_v33 }
 0x996   : > { %v9256_v43 = vmul.f32 %v12705_v63, %v10728_v61 }
 0x998   : > { %v9273_v21 = vpack.c.bf16 %v9256_v43, %v9254_v52  ;;  %v10729_v48 = vpop.f32.mrb[84].mxu1 }
 0x999   : > { %v10730_v4 = vpop.f32.mrb[85].mxu1 }
 0x99a   : > { %v10731_v55 = vadd.f32 %v10730_v4, %v10729_v48  ;;  %v10732_v9 = vpop.f32.mrb[86].mxu1  ;;  %11723 = vmatprep.mubr.msk.bf16.mxu1 %vm374_vm1, %v9273_v21 }
 0x99b   : > { %v10733_v59 = vpop.f32.mrb[87].mxu1 }
 0x99c   : > { %v10734_v41 = vadd.f32 %v10733_v59, %v10732_v9  ;;  %v9258_v14 = vmul.f32 %v12707_v6, %v10731_v55 }
 0x99e   : > { %v9260_v3 = vmul.f32 %v12709_v34, %v10734_v41 }
 0x9a0   : > { %v9274_v28 = vpack.c.bf16 %v9260_v3, %v9258_v14  ;;  %v10735_v45 = vpop.f32.mrb[88].mxu1 }
 0x9a1   : > { %v10736_v1 = vpop.f32.mrb[89].mxu1 }
 0x9a2   : > { %v10737_v27 = vadd.f32 %v10736_v1, %v10735_v45  ;;  %v10738_v12 = vpop.f32.mrb[90].mxu1  ;;  %11724 = vmatmul.mubr.msk.bf16.gmra.mrb[104].mxu1 %vm374_vm1, %v9274_v28 }
 0x9a3   : > { %v10739_v40 = vpop.f32.mrb[91].mxu1 }
 0x9a4   : > { %v10740_v18 = vadd.f32 %v10739_v40, %v10738_v12  ;;  %v9262_v38 = vmul.f32 %v12711_v35, %v10737_v27 }
 0x9a6   : > { %v9264_v54 = vmul.f32 %v12713_v22, %v10740_v18 }
 0x9a8   : > { %v9275_v8 = vpack.c.bf16 %v9264_v54, %v9262_v38  ;;  %v10741_v2 = vpop.f32.mrb[92].mxu1 }
 0x9a9   : > { %v10742_v53 = vpop.f32.mrb[93].mxu1 }
 0x9aa   : > { %v10743_v5 = vadd.f32 %v10742_v53, %v10741_v2  ;;  %v10744_v23 = vpop.f32.mrb[94].mxu1  ;;  %11727 = vmatprep.mubr.msk.bf16.mxu1 %vm374_vm1, %v9275_v8 }
 0x9ab   : > { %v10745_v46 = vpop.f32.mrb[95].mxu1 }
 0x9ac   : > { %v10746_v60 = vadd.f32 %v10745_v46, %v10744_v23  ;;  %v9266_v31 = vmul.f32 %v12715_v15, %v10743_v5 }
 0x9ae   : > { %v9268_v19 = vmul.f32 %v12717_v47, %v10746_v60 }
 0x9b0   : > { %v9276_v30 = vpack.c.bf16 %v9268_v19, %v9266_v31 }
 0x9b2   : > { %11728 = vmatmul.mubr.msk.bf16.gmra.mrb[108].mxu1 %vm374_vm1, %v9276_v30 }
 0xa55   : > { %v11717_v36 = vpop.f32.mrb[96].mxu1 }
 0xa56   : > { %v9367_v25 = vadd.f32 %v11717_v36, %v10111_v56  ;;  %v9358_v44 = vpop.f32.mrb[97].mxu1 }
 0xa57   : > { %v9359_v51 = vadd.f32 %v10111_v56, %v9358_v44  ;;  %v11718_v32 = vpop.f32.mrb[98].mxu1 }
 0xa58   : > { %9423 = vst [vmem:[%s14560_s25 + $0x10] sm:$0xff] %v9367_v25  ;;  %v9370_v29 = vadd.f32 %v11718_v32, %v10111_v56  ;;  %v9361_v58 = vpop.f32.mrb[99].mxu1 }
 0xa59   : > { %9421 = vst [vmem:[%s14560_s25] sm:$0xff] %v9359_v51  ;;  %v9362_v11 = vadd.f32 %v10111_v56, %v9361_v58 }
 0xa5a   : > { %9424 = vst [vmem:[%s14560_s25 + $0x18] sm:$0xff] %v9370_v29 }
 0xa5b   : > { %9422 = vst [vmem:[%s14560_s25 + $0x8] sm:$0xff] %v9362_v11 }
 0xa65   : > { %v11721_v7 = vpop.f32.mrb[100].mxu1 }
 0xa66   : > { %v9383_v17 = vadd.f32 %v11721_v7, %v10111_v56  ;;  %v9374_v16 = vpop.f32.mrb[101].mxu1 }
 0xa67   : > { %v9375_v49 = vadd.f32 %v10111_v56, %v9374_v16  ;;  %v11722_v39 = vpop.f32.mrb[102].mxu1 }
 0xa68   : > { %9427 = vst [vmem:[%s14560_s25 + $0x30] sm:$0xff] %v9383_v17  ;;  %v9386_v33 = vadd.f32 %v11722_v39, %v10111_v56  ;;  %v9377_v62 = vpop.f32.mrb[103].mxu1 }
 0xa69   : > { %9425 = vst [vmem:[%s14560_s25 + $0x20] sm:$0xff] %v9375_v49  ;;  %v9378_v26 = vadd.f32 %v10111_v56, %v9377_v62 }
 0xa6a   : > { %9428 = vst [vmem:[%s14560_s25 + $0x38] sm:$0xff] %v9386_v33 }
 0xa6b   : > { %9426 = vst [vmem:[%s14560_s25 + $0x28] sm:$0xff] %v9378_v26 }
 0xa75   : > { %v11725_v42 = vpop.f32.mrb[104].mxu1 }
 0xa76   : > { %v9399_v20 = vadd.f32 %v11725_v42, %v10111_v56  ;;  %v9390_v0 = vpop.f32.mrb[105].mxu1 }
 0xa77   : > { %v9391_v61 = vadd.f32 %v10111_v56, %v9390_v0  ;;  %v11726_v63 = vpop.f32.mrb[106].mxu1 }
 0xa78   : > { %9431 = vst [vmem:[%s14560_s25 + $0x50] sm:$0xff] %v9399_v20  ;;  %v9402_v10 = vadd.f32 %v11726_v63, %v10111_v56  ;;  %v9393_v52 = vpop.f32.mrb[107].mxu1 }
 0xa79   : > { %9429 = vst [vmem:[%s14560_s25 + $0x40] sm:$0xff] %v9391_v61  ;;  %v9394_v43 = vadd.f32 %v10111_v56, %v9393_v52 }
 0xa7a   : > { %9432 = vst [vmem:[%s14560_s25 + $0x58] sm:$0xff] %v9402_v10 }
 0xa7b   : > { %9430 = vst [vmem:[%s14560_s25 + $0x48] sm:$0xff] %v9394_v43 }
 0xa85   : > { %v11729_v13 = vpop.f32.mrb[108].mxu1 }
 0xa86   : > { %v9415_v21 = vadd.f32 %v11729_v13, %v10111_v56  ;;  %v9406_v48 = vpop.f32.mrb[109].mxu1 }
 0xa87   : > { %v9407_v4 = vadd.f32 %v10111_v56, %v9406_v48  ;;  %v11730_v55 = vpop.f32.mrb[110].mxu1 }
 0xa88   : > { %9435 = vst [vmem:[%s14560_s25 + $0x70] sm:$0xff] %v9415_v21  ;;  %v9418_v9 = vadd.f32 %v11730_v55, %v10111_v56  ;;  %v9409_v57 = vpop.f32.mrb[111].mxu1 }
 0xa89   : > { %9433 = vst [vmem:[%s14560_s25 + $0x60] sm:$0xff] %v9407_v4  ;;  %v9410_v59 = vadd.f32 %v10111_v56, %v9409_v57 }
 0xa8a   : > { %9436 = vst [vmem:[%s14560_s25 + $0x78] sm:$0xff] %v9418_v9 }
 0xa8b   : > { %9434 = vst [vmem:[%s14560_s25 + $0x68] sm:$0xff] %v9410_v59 }
 0xa8c PF: > { %s21_s13 = sadd.s32 1, %s12724_s13  }
 0xa8d   : > { %p18_p4 = scmp.ge.s32.totalorder %s21_s13, 4  }
 0xa8f   :  { %20 = sbr.rel (!%p18_p4) target bundleno = 1 (0x1), region = 125 }

</bundles_post_ra>
